<compile_context>
chip_gen: v6e
topology: v6e:2x2x1
jax: 0.10.0
libtpu: 0.0.40
codegen_flags: <defaults>
</compile_context>

<pallas_src>
import functools

import numpy as np
import jax
import jax.numpy as jnp
from jax.experimental import pallas as pl
from jax.experimental.pallas import tpu as pltpu

NEG_BIG = -1.0e30          # stands in for -inf padding (avoids inf/NaN arithmetic)
GARB = 1 << 28             # sentinel added to wrapped ("garbage") lanes in the index table
BIG_LIN = 1 << 30          # larger than any encoded winner index


# --------------------------- fused pool+conv+fire+winner ------------------------- #
def _snn_fused_kernel(x_ref, w_ref, lin_ref, valid_ref,
                      pot_ref, spk_ref, res_ref,
                      xpad_s, colmax_s, pooled_s, patch_s,
                      *, t_steps, c_in, height, width, wp, lf, lc, lp, n_out,
                      n_feat, k_pool, k_conv, threshold):
    tc = t_steps * c_in

    # ---- stage 1: build padded, row-flattened input (pad value = NEG_BIG) ----------
    xpad_s[...] = jnp.full((tc, lf), NEG_BIG, jnp.float32)
    for r in range(height):
        dst = (r + 1) * wp + 1                                 # +1 row pad, +1 col pad
        xpad_s[:, dst:dst + width] = x_ref[:, r * width:(r + 1) * width]

    # ---- stage 2: separable 5x5 max pool (stride 1), flat layout (row stride wp) ---
    cm = xpad_s[:, 0:lc]
    for dj in range(1, k_pool):                                # 4 column-shift maxes
        cm = jnp.maximum(cm, xpad_s[:, dj:dj + lc])
    colmax_s[...] = cm
    pm = colmax_s[:, 0:lp]
    for di in range(1, k_pool):                                # 4 row-shift maxes
        off = di * wp
        pm = jnp.maximum(pm, colmax_s[:, off:off + lp])
    pooled_s[...] = pm

    # ---- stage 3: conv(3x3) as (F, C*9) @ (C*9, n_out) per timestep + fire ---------
    valid = valid_ref[...]                                     # (1, n_out) f32 {0,1}
    lin = lin_ref[...]                                         # (F, n_out) packed index

    n_spk = jnp.zeros((n_feat, n_out), jnp.float32)
    val = jnp.zeros((n_feat, n_out), jnp.float32)

    for t in range(t_steps):
        base = t * c_in
        # im2col patch matrix for this timestep: rows ordered (d, c), built by slices.
        for d in range(k_conv * k_conv):
            off = (d // k_conv) * wp + (d % k_conv)
            patch_s[d * c_in:(d + 1) * c_in, :] = pooled_s[base:base + c_in,
                                                           off:off + n_out]
        p_t = jnp.dot(w_ref[...], patch_s[...],
                      preferred_element_type=jnp.float32)      # (F, n_out) raw potentials

        fired = p_t >= threshold                               # fire(): keep p == threshold
        pot_t = jnp.where(fired, p_t, 0.0)
        spk_t = fired.astype(jnp.float32)
        pot_ref[t * n_feat:(t + 1) * n_feat, :] = pot_t        # lane-dense (F, n_out) rows
        spk_ref[t * n_feat:(t + 1) * n_feat, :] = spk_t

        # winner statistics (garbage lanes masked out)
        spk_w = spk_t * valid
        newly = jnp.logical_and(spk_w > 0.0, n_spk == 0.0)     # first spike at this pos
        val = jnp.where(newly, p_t, val)                       # potential at first spike
        n_spk = n_spk + spk_w

    # ---- stage 4: get_k_winners (kwta=1, inhibition_radius=0) ----------------------
    val_m = jnp.where(n_spk > 0.0, val, 0.0)
    vmax = jnp.max(jnp.max(val_m, axis=1, keepdims=True), axis=0, keepdims=True)
    v = vmax * float(t_steps)
    total = n_spk * (val_m + v)                                # == sum_t(spk*val + spk*v)

    mx = jnp.max(jnp.max(total, axis=1, keepdims=True), axis=0, keepdims=True)
    cand = jnp.where(total == mx, lin, BIG_LIN)                # first-occurrence tiebreak
    wl = jnp.min(jnp.min(cand, axis=1, keepdims=True), axis=0, keepdims=True)  # (1,1) i32

    has = mx != 0.0                                            # winner exists iff max != 0
    cls_w = wl >> 24                                           # decision_map[f] (packed)
    f_w = (wl >> 16) & 0xFF
    i_w = (wl >> 8) & 0xFF
    j_w = wl & 0xFF
    neg1 = jnp.full((1, 1), -1, jnp.int32)
    res_ref[0:1, 0:1] = jnp.where(has, cls_w, neg1)
    res_ref[0:1, 1:2] = jnp.where(has, f_w, neg1)
    res_ref[0:1, 2:3] = jnp.where(has, i_w, neg1)
    res_ref[0:1, 3:4] = jnp.where(has, j_w, neg1)


# ----------------------------------- wrapper ------------------------------------- #
def snn_forward(x, weight, features_per_class, *, pool_kernel_size=5, pool_padding=1,
                conv_kernel_size=3, threshold=20.0):
    T, C, H, W = x.shape
    F_out = weight.shape[0]
    pp = pool_padding
    Hp, Wp = H + 2 * pp, W + 2 * pp
    hq = Hp - pool_kernel_size + 1
    wq = Wp - pool_kernel_size + 1
    ho = hq - conv_kernel_size + 1
    wo = wq - conv_kernel_size + 1

    # flat-layout geometry (row stride Wp everywhere; trailing guard lanes hold NEG_BIG)
    n_out = ho * Wp                                              # conv output incl. wrap lanes
    Lp = n_out + (conv_kernel_size - 1) * Wp + (conv_kernel_size - 1)
    Lc = Lp + (pool_kernel_size - 1) * Wp
    Lf = max(Lc + (pool_kernel_size - 1), Hp * Wp)

    xf = x.astype(jnp.float32).reshape(T * C, H * W)             # free reshape
    # weight columns ordered (d, c) to match the in-kernel patch rows
    w2 = jnp.transpose(weight.astype(jnp.float32), (0, 2, 3, 1)).reshape(
        F_out, conv_kernel_size * conv_kernel_size * C)

    # trace-time constant index / mask tables
    o = np.arange(n_out)
    i2, j2 = o // Wp, o % Wp
    valid_np = (j2 < wo).astype(np.float32).reshape(1, n_out)
    sl_np = np.where(j2 < wo, (i2 << 8) | j2, GARB).astype(np.int64)
    f_np = np.arange(F_out)
    fenc_np = ((f_np // features_per_class) << 24) | (f_np << 16)
    lin_np = (fenc_np[:, None] + sl_np[None, :]).astype(np.int32)   # (F, n_out)

    kernel = functools.partial(
        _snn_fused_kernel, t_steps=T, c_in=C, height=H, width=W, wp=Wp,
        lf=Lf, lc=Lc, lp=Lp, n_out=n_out, n_feat=F_out,
        k_pool=pool_kernel_size, k_conv=conv_kernel_size, threshold=float(threshold))

    pot_full, spk_full, res = pl.pallas_call(
        kernel,
        out_shape=(
            jax.ShapeDtypeStruct((T * F_out, n_out), jnp.float32),   # thresholded potentials
            jax.ShapeDtypeStruct((T * F_out, n_out), jnp.float32),   # output spikes
            jax.ShapeDtypeStruct((1, 4), jnp.int32),                 # [class, f, i, j]
        ),
        in_specs=[pl.BlockSpec(memory_space=pltpu.MemorySpace.VMEM)] * 4,
        out_specs=(pl.BlockSpec(memory_space=pltpu.MemorySpace.VMEM),) * 3,
        scratch_shapes=[
            pltpu.VMEM((T * C, Lf), jnp.float32),                    # padded flat input
            pltpu.VMEM((T * C, Lc), jnp.float32),                    # column-max intermediate
            pltpu.VMEM((T * C, Lp), jnp.float32),                    # pooled (flat)
            pltpu.VMEM((C * conv_kernel_size ** 2, n_out), jnp.float32),  # im2col patches
        ],
    )(xf, w2, jnp.asarray(lin_np), jnp.asarray(valid_np))

    # ctx tensors in PyTorch NCHW layout (T, F, Ho, Wo): reshape is free, one small slice
    potentials = pot_full.reshape(T, F_out, ho, Wp)[:, :, :, :wo]
    spikes = spk_full.reshape(T, F_out, ho, Wp)[:, :, :, :wo]
    out_class = res[0, 0]
    winner = res[0, 1:4]
    return out_class, winner, spikes, potentials
    # TODO(synk): STDP / anti-STDP (reward/punish) weight updates are not part of forward.


if __name__ == "__main__":
    key = jax.random.PRNGKey(0)
    T, C, H, W = 8, 4, 16, 16
    features_per_class, number_of_classes = 4, 3
    F_out = features_per_class * number_of_classes

    k_w, k_lat = jax.random.split(key)
    # Convolution(input_channels, F, 3, weight_mean=0.8, weight_std=0.05)
    weight = 0.8 + 0.05 * jax.random.normal(k_w, (F_out, C, 3, 3), dtype=jnp.float32)

    # deterministic cumulative binary spike-wave input (intensity-to-latency encoding)
    latency = jax.random.randint(k_lat, (C, H, W), 0, T + 1)
    t_axis = jnp.arange(T)[:, None, None, None]
    x = (t_axis >= latency[None]).astype(jnp.float32)            # (T, C, H, W)

    out_class, winner, spikes, potentials = jax.block_until_ready(
        snn_forward(x, weight, features_per_class))

    ho = wo = H + 2 - 5 + 1 - 3 + 1
    assert spikes.shape == (T, F_out, ho, wo)
    assert potentials.shape == (T, F_out, ho, wo)
    assert bool(jnp.all((spikes == 0.0) | (spikes == 1.0)))
    assert bool(jnp.all(potentials >= 0.0))
    assert int(out_class) in set(range(-1, number_of_classes))
    if int(winner[0]) >= 0:
        assert int(out_class) == int(winner[0]) // features_per_class
    print("KERNEL_OK")
</pallas_src>

<mosaic_0001>
module attributes {stable_mosaic.version = 11 : i64} {
  func.func @_snn_fused_kernel(%arg0: memref<32x256xf32, #tpu.memory_space<vmem>>, %arg1: memref<12x36xf32, #tpu.memory_space<vmem>>, %arg2: memref<12x216xi32, #tpu.memory_space<vmem>>, %arg3: memref<1x216xf32, #tpu.memory_space<vmem>>, %arg4: memref<96x216xf32, #tpu.memory_space<vmem>>, %arg5: memref<96x216xf32, #tpu.memory_space<vmem>>, %arg6: memref<1x4xi32, #tpu.memory_space<vmem>>, %arg7: memref<32x330xf32, #tpu.memory_space<vmem>>, %arg8: memref<32x326xf32, #tpu.memory_space<vmem>>, %arg9: memref<32x254xf32, #tpu.memory_space<vmem>>, %arg10: memref<36x216xf32, #tpu.memory_space<vmem>>) attributes {dimension_semantics = [], scalar_prefetch = 0 : i64, scratch_operands = 4 : i64, tpu.core_type = #tpu.core_type<tc>} {
    %cst = arith.constant -1.000000e+30 : f32
    %0 = vector.broadcast %cst : f32 to vector<32x330xf32>
    %c0 = arith.constant 0 : index
    %c0_0 = arith.constant 0 : index
    %1 = vector.load %arg7[%c0, %c0_0] : memref<32x330xf32, #tpu.memory_space<vmem>>, vector<32x330xf32>
    tpu.vector_store %arg7[%c0, %c0_0], %0 {strides = array<i32>} : memref<32x330xf32, #tpu.memory_space<vmem>>, vector<32x330xf32>,
    %c0_1 = arith.constant 0 : index
    %c0_2 = arith.constant 0 : index
    %2 = vector.load %arg0[%c0_1, %c0_2] : memref<32x256xf32, #tpu.memory_space<vmem>>, vector<32x16xf32>
    %c0_3 = arith.constant 0 : index
    %c19 = arith.constant 19 : index
    %3 = vector.load %arg7[%c0_3, %c19] : memref<32x330xf32, #tpu.memory_space<vmem>>, vector<32x16xf32>
    tpu.vector_store %arg7[%c0_3, %c19], %2 {strides = array<i32>} : memref<32x330xf32, #tpu.memory_space<vmem>>, vector<32x16xf32>,
    %c0_4 = arith.constant 0 : index
    %c16 = arith.constant 16 : index
    %4 = vector.load %arg0[%c0_4, %c16] : memref<32x256xf32, #tpu.memory_space<vmem>>, vector<32x16xf32>
    %c0_5 = arith.constant 0 : index
    %c37 = arith.constant 37 : index
    %5 = vector.load %arg7[%c0_5, %c37] : memref<32x330xf32, #tpu.memory_space<vmem>>, vector<32x16xf32>
    tpu.vector_store %arg7[%c0_5, %c37], %4 {strides = array<i32>} : memref<32x330xf32, #tpu.memory_space<vmem>>, vector<32x16xf32>,
    %c0_6 = arith.constant 0 : index
    %c32 = arith.constant 32 : index
    %6 = vector.load %arg0[%c0_6, %c32] : memref<32x256xf32, #tpu.memory_space<vmem>>, vector<32x16xf32>
    %c0_7 = arith.constant 0 : index
    %c55 = arith.constant 55 : index
    %7 = vector.load %arg7[%c0_7, %c55] : memref<32x330xf32, #tpu.memory_space<vmem>>, vector<32x16xf32>
    tpu.vector_store %arg7[%c0_7, %c55], %6 {strides = array<i32>} : memref<32x330xf32, #tpu.memory_space<vmem>>, vector<32x16xf32>,
    %c0_8 = arith.constant 0 : index
    %c48 = arith.constant 48 : index
    %8 = vector.load %arg0[%c0_8, %c48] : memref<32x256xf32, #tpu.memory_space<vmem>>, vector<32x16xf32>
    %c0_9 = arith.constant 0 : index
    %c73 = arith.constant 73 : index
    %9 = vector.load %arg7[%c0_9, %c73] : memref<32x330xf32, #tpu.memory_space<vmem>>, vector<32x16xf32>
    tpu.vector_store %arg7[%c0_9, %c73], %8 {strides = array<i32>} : memref<32x330xf32, #tpu.memory_space<vmem>>, vector<32x16xf32>,
    %c0_10 = arith.constant 0 : index
    %c64 = arith.constant 64 : index
    %10 = vector.load %arg0[%c0_10, %c64] : memref<32x256xf32, #tpu.memory_space<vmem>>, vector<32x16xf32>
    %c0_11 = arith.constant 0 : index
    %c91 = arith.constant 91 : index
    %11 = vector.load %arg7[%c0_11, %c91] : memref<32x330xf32, #tpu.memory_space<vmem>>, vector<32x16xf32>
    tpu.vector_store %arg7[%c0_11, %c91], %10 {strides = array<i32>} : memref<32x330xf32, #tpu.memory_space<vmem>>, vector<32x16xf32>,
    %c0_12 = arith.constant 0 : index
    %c80 = arith.constant 80 : index
    %12 = vector.load %arg0[%c0_12, %c80] : memref<32x256xf32, #tpu.memory_space<vmem>>, vector<32x16xf32>
    %c0_13 = arith.constant 0 : index
    %c109 = arith.constant 109 : index
    %13 = vector.load %arg7[%c0_13, %c109] : memref<32x330xf32, #tpu.memory_space<vmem>>, vector<32x16xf32>
    tpu.vector_store %arg7[%c0_13, %c109], %12 {strides = array<i32>} : memref<32x330xf32, #tpu.memory_space<vmem>>, vector<32x16xf32>,
    %c0_14 = arith.constant 0 : index
    %c96 = arith.constant 96 : index
    %14 = vector.load %arg0[%c0_14, %c96] : memref<32x256xf32, #tpu.memory_space<vmem>>, vector<32x16xf32>
    %c0_15 = arith.constant 0 : index
    %c127 = arith.constant 127 : index
    %15 = vector.load %arg7[%c0_15, %c127] : memref<32x330xf32, #tpu.memory_space<vmem>>, vector<32x16xf32>
    tpu.vector_store %arg7[%c0_15, %c127], %14 {strides = array<i32>} : memref<32x330xf32, #tpu.memory_space<vmem>>, vector<32x16xf32>,
    %c0_16 = arith.constant 0 : index
    %c112 = arith.constant 112 : index
    %16 = vector.load %arg0[%c0_16, %c112] : memref<32x256xf32, #tpu.memory_space<vmem>>, vector<32x16xf32>
    %c0_17 = arith.constant 0 : index
    %c145 = arith.constant 145 : index
    %17 = vector.load %arg7[%c0_17, %c145] : memref<32x330xf32, #tpu.memory_space<vmem>>, vector<32x16xf32>
    tpu.vector_store %arg7[%c0_17, %c145], %16 {strides = array<i32>} : memref<32x330xf32, #tpu.memory_space<vmem>>, vector<32x16xf32>,
    %c0_18 = arith.constant 0 : index
    %c128 = arith.constant 128 : index
    %18 = vector.load %arg0[%c0_18, %c128] : memref<32x256xf32, #tpu.memory_space<vmem>>, vector<32x16xf32>
    %c0_19 = arith.constant 0 : index
    %c163 = arith.constant 163 : index
    %19 = vector.load %arg7[%c0_19, %c163] : memref<32x330xf32, #tpu.memory_space<vmem>>, vector<32x16xf32>
    tpu.vector_store %arg7[%c0_19, %c163], %18 {strides = array<i32>} : memref<32x330xf32, #tpu.memory_space<vmem>>, vector<32x16xf32>,
    %c0_20 = arith.constant 0 : index
    %c144 = arith.constant 144 : index
    %20 = vector.load %arg0[%c0_20, %c144] : memref<32x256xf32, #tpu.memory_space<vmem>>, vector<32x16xf32>
    %c0_21 = arith.constant 0 : index
    %c181 = arith.constant 181 : index
    %21 = vector.load %arg7[%c0_21, %c181] : memref<32x330xf32, #tpu.memory_space<vmem>>, vector<32x16xf32>
    tpu.vector_store %arg7[%c0_21, %c181], %20 {strides = array<i32>} : memref<32x330xf32, #tpu.memory_space<vmem>>, vector<32x16xf32>,
    %c0_22 = arith.constant 0 : index
    %c160 = arith.constant 160 : index
    %22 = vector.load %arg0[%c0_22, %c160] : memref<32x256xf32, #tpu.memory_space<vmem>>, vector<32x16xf32>
    %c0_23 = arith.constant 0 : index
    %c199 = arith.constant 199 : index
    %23 = vector.load %arg7[%c0_23, %c199] : memref<32x330xf32, #tpu.memory_space<vmem>>, vector<32x16xf32>
    tpu.vector_store %arg7[%c0_23, %c199], %22 {strides = array<i32>} : memref<32x330xf32, #tpu.memory_space<vmem>>, vector<32x16xf32>,
    %c0_24 = arith.constant 0 : index
    %c176 = arith.constant 176 : index
    %24 = vector.load %arg0[%c0_24, %c176] : memref<32x256xf32, #tpu.memory_space<vmem>>, vector<32x16xf32>
    %c0_25 = arith.constant 0 : index
    %c217 = arith.constant 217 : index
    %25 = vector.load %arg7[%c0_25, %c217] : memref<32x330xf32, #tpu.memory_space<vmem>>, vector<32x16xf32>
    tpu.vector_store %arg7[%c0_25, %c217], %24 {strides = array<i32>} : memref<32x330xf32, #tpu.memory_space<vmem>>, vector<32x16xf32>,
    %c0_26 = arith.constant 0 : index
    %c192 = arith.constant 192 : index
    %26 = vector.load %arg0[%c0_26, %c192] : memref<32x256xf32, #tpu.memory_space<vmem>>, vector<32x16xf32>
    %c0_27 = arith.constant 0 : index
    %c235 = arith.constant 235 : index
    %27 = vector.load %arg7[%c0_27, %c235] : memref<32x330xf32, #tpu.memory_space<vmem>>, vector<32x16xf32>
    tpu.vector_store %arg7[%c0_27, %c235], %26 {strides = array<i32>} : memref<32x330xf32, #tpu.memory_space<vmem>>, vector<32x16xf32>,
    %c0_28 = arith.constant 0 : index
    %c208 = arith.constant 208 : index
    %28 = vector.load %arg0[%c0_28, %c208] : memref<32x256xf32, #tpu.memory_space<vmem>>, vector<32x16xf32>
    %c0_29 = arith.constant 0 : index
    %c253 = arith.constant 253 : index
    %29 = vector.load %arg7[%c0_29, %c253] : memref<32x330xf32, #tpu.memory_space<vmem>>, vector<32x16xf32>
    tpu.vector_store %arg7[%c0_29, %c253], %28 {strides = array<i32>} : memref<32x330xf32, #tpu.memory_space<vmem>>, vector<32x16xf32>,
    %c0_30 = arith.constant 0 : index
    %c224 = arith.constant 224 : index
    %30 = vector.load %arg0[%c0_30, %c224] : memref<32x256xf32, #tpu.memory_space<vmem>>, vector<32x16xf32>
    %c0_31 = arith.constant 0 : index
    %c271 = arith.constant 271 : index
    %31 = vector.load %arg7[%c0_31, %c271] : memref<32x330xf32, #tpu.memory_space<vmem>>, vector<32x16xf32>
    tpu.vector_store %arg7[%c0_31, %c271], %30 {strides = array<i32>} : memref<32x330xf32, #tpu.memory_space<vmem>>, vector<32x16xf32>,
    %c0_32 = arith.constant 0 : index
    %c240 = arith.constant 240 : index
    %32 = vector.load %arg0[%c0_32, %c240] : memref<32x256xf32, #tpu.memory_space<vmem>>, vector<32x16xf32>
    %c0_33 = arith.constant 0 : index
    %c289 = arith.constant 289 : index
    %33 = vector.load %arg7[%c0_33, %c289] : memref<32x330xf32, #tpu.memory_space<vmem>>, vector<32x16xf32>
    tpu.vector_store %arg7[%c0_33, %c289], %32 {strides = array<i32>} : memref<32x330xf32, #tpu.memory_space<vmem>>, vector<32x16xf32>,
    %c0_34 = arith.constant 0 : index
    %c0_35 = arith.constant 0 : index
    %34 = vector.load %arg7[%c0_34, %c0_35] : memref<32x330xf32, #tpu.memory_space<vmem>>, vector<32x326xf32>
    %c0_36 = arith.constant 0 : index
    %c1 = arith.constant 1 : index
    %35 = vector.load %arg7[%c0_36, %c1] : memref<32x330xf32, #tpu.memory_space<vmem>>, vector<32x326xf32>
    %36 = arith.maximumf %34, %35 : vector<32x326xf32>
    %c0_37 = arith.constant 0 : index
    %c2 = arith.constant 2 : index
    %37 = vector.load %arg7[%c0_37, %c2] : memref<32x330xf32, #tpu.memory_space<vmem>>, vector<32x326xf32>
    %38 = arith.maximumf %36, %37 : vector<32x326xf32>
    %c0_38 = arith.constant 0 : index
    %c3 = arith.constant 3 : index
    %39 = vector.load %arg7[%c0_38, %c3] : memref<32x330xf32, #tpu.memory_space<vmem>>, vector<32x326xf32>
    %40 = arith.maximumf %38, %39 : vector<32x326xf32>
    %c0_39 = arith.constant 0 : index
    %c4 = arith.constant 4 : index
    %41 = vector.load %arg7[%c0_39, %c4] : memref<32x330xf32, #tpu.memory_space<vmem>>, vector<32x326xf32>
    %42 = arith.maximumf %40, %41 : vector<32x326xf32>
    %c0_40 = arith.constant 0 : index
    %c0_41 = arith.constant 0 : index
    %43 = vector.load %arg8[%c0_40, %c0_41] : memref<32x326xf32, #tpu.memory_space<vmem>>, vector<32x326xf32>
    tpu.vector_store %arg8[%c0_40, %c0_41], %42 {strides = array<i32>} : memref<32x326xf32, #tpu.memory_space<vmem>>, vector<32x326xf32>,
    %c0_42 = arith.constant 0 : index
    %c0_43 = arith.constant 0 : index
    %44 = vector.load %arg8[%c0_42, %c0_43] : memref<32x326xf32, #tpu.memory_space<vmem>>, vector<32x254xf32>
    %c0_44 = arith.constant 0 : index
    %c18 = arith.constant 18 : index
    %45 = vector.load %arg8[%c0_44, %c18] : memref<32x326xf32, #tpu.memory_space<vmem>>, vector<32x254xf32>
    %46 = arith.maximumf %44, %45 : vector<32x254xf32>
    %c0_45 = arith.constant 0 : index
    %c36 = arith.constant 36 : index
    %47 = vector.load %arg8[%c0_45, %c36] : memref<32x326xf32, #tpu.memory_space<vmem>>, vector<32x254xf32>
    %48 = arith.maximumf %46, %47 : vector<32x254xf32>
    %c0_46 = arith.constant 0 : index
    %c54 = arith.constant 54 : index
    %49 = vector.load %arg8[%c0_46, %c54] : memref<32x326xf32, #tpu.memory_space<vmem>>, vector<32x254xf32>
    %50 = arith.maximumf %48, %49 : vector<32x254xf32>
    %c0_47 = arith.constant 0 : index
    %c72 = arith.constant 72 : index
    %51 = vector.load %arg8[%c0_47, %c72] : memref<32x326xf32, #tpu.memory_space<vmem>>, vector<32x254xf32>
    %52 = arith.maximumf %50, %51 : vector<32x254xf32>
    %c0_48 = arith.constant 0 : index
    %c0_49 = arith.constant 0 : index
    %53 = vector.load %arg9[%c0_48, %c0_49] : memref<32x254xf32, #tpu.memory_space<vmem>>, vector<32x254xf32>
    tpu.vector_store %arg9[%c0_48, %c0_49], %52 {strides = array<i32>} : memref<32x254xf32, #tpu.memory_space<vmem>>, vector<32x254xf32>,
    %c0_50 = arith.constant 0 : index
    %c0_51 = arith.constant 0 : index
    %54 = vector.load %arg3[%c0_50, %c0_51] : memref<1x216xf32, #tpu.memory_space<vmem>>, vector<1x216xf32>
    %c0_52 = arith.constant 0 : index
    %c0_53 = arith.constant 0 : index
    %55 = vector.load %arg2[%c0_52, %c0_53] : memref<12x216xi32, #tpu.memory_space<vmem>>, vector<12x216xi32>
    %cst_54 = arith.constant 0.000000e+00 : f32
    %56 = vector.broadcast %cst_54 : f32 to vector<12x216xf32>
    %cst_55 = arith.constant 0.000000e+00 : f32
    %57 = vector.broadcast %cst_55 : f32 to vector<12x216xf32>
    %c0_56 = arith.constant 0 : index
    %c0_57 = arith.constant 0 : index
    %58 = vector.load %arg9[%c0_56, %c0_57] : memref<32x254xf32, #tpu.memory_space<vmem>>, vector<4x216xf32>
    %c0_58 = arith.constant 0 : index
    %c0_59 = arith.constant 0 : index
    %59 = vector.load %arg10[%c0_58, %c0_59] : memref<36x216xf32, #tpu.memory_space<vmem>>, vector<4x216xf32>
    tpu.vector_store %arg10[%c0_58, %c0_59], %58 {strides = array<i32>} : memref<36x216xf32, #tpu.memory_space<vmem>>, vector<4x216xf32>,
    %c0_60 = arith.constant 0 : index
    %c1_61 = arith.constant 1 : index
    %60 = vector.load %arg9[%c0_60, %c1_61] : memref<32x254xf32, #tpu.memory_space<vmem>>, vector<4x216xf32>
    %c4_62 = arith.constant 4 : index
    %c0_63 = arith.constant 0 : index
    %61 = vector.load %arg10[%c4_62, %c0_63] : memref<36x216xf32, #tpu.memory_space<vmem>>, vector<4x216xf32>
    tpu.vector_store %arg10[%c4_62, %c0_63], %60 {strides = array<i32>} : memref<36x216xf32, #tpu.memory_space<vmem>>, vector<4x216xf32>,
    %c0_64 = arith.constant 0 : index
    %c2_65 = arith.constant 2 : index
    %62 = vector.load %arg9[%c0_64, %c2_65] : memref<32x254xf32, #tpu.memory_space<vmem>>, vector<4x216xf32>
    %c8 = arith.constant 8 : index
    %c0_66 = arith.constant 0 : index
    %63 = vector.load %arg10[%c8, %c0_66] : memref<36x216xf32, #tpu.memory_space<vmem>>, vector<4x216xf32>
    tpu.vector_store %arg10[%c8, %c0_66], %62 {strides = array<i32>} : memref<36x216xf32, #tpu.memory_space<vmem>>, vector<4x216xf32>,
    %c0_67 = arith.constant 0 : index
    %c18_68 = arith.constant 18 : index
    %64 = vector.load %arg9[%c0_67, %c18_68] : memref<32x254xf32, #tpu.memory_space<vmem>>, vector<4x216xf32>
    %c12 = arith.constant 12 : index
    %c0_69 = arith.constant 0 : index
    %65 = vector.load %arg10[%c12, %c0_69] : memref<36x216xf32, #tpu.memory_space<vmem>>, vector<4x216xf32>
    tpu.vector_store %arg10[%c12, %c0_69], %64 {strides = array<i32>} : memref<36x216xf32, #tpu.memory_space<vmem>>, vector<4x216xf32>,
    %c0_70 = arith.constant 0 : index
    %c19_71 = arith.constant 19 : index
    %66 = vector.load %arg9[%c0_70, %c19_71] : memref<32x254xf32, #tpu.memory_space<vmem>>, vector<4x216xf32>
    %c16_72 = arith.constant 16 : index
    %c0_73 = arith.constant 0 : index
    %67 = vector.load %arg10[%c16_72, %c0_73] : memref<36x216xf32, #tpu.memory_space<vmem>>, vector<4x216xf32>
    tpu.vector_store %arg10[%c16_72, %c0_73], %66 {strides = array<i32>} : memref<36x216xf32, #tpu.memory_space<vmem>>, vector<4x216xf32>,
    %c0_74 = arith.constant 0 : index
    %c20 = arith.constant 20 : index
    %68 = vector.load %arg9[%c0_74, %c20] : memref<32x254xf32, #tpu.memory_space<vmem>>, vector<4x216xf32>
    %c20_75 = arith.constant 20 : index
    %c0_76 = arith.constant 0 : index
    %69 = vector.load %arg10[%c20_75, %c0_76] : memref<36x216xf32, #tpu.memory_space<vmem>>, vector<4x216xf32>
    tpu.vector_store %arg10[%c20_75, %c0_76], %68 {strides = array<i32>} : memref<36x216xf32, #tpu.memory_space<vmem>>, vector<4x216xf32>,
    %c0_77 = arith.constant 0 : index
    %c36_78 = arith.constant 36 : index
    %70 = vector.load %arg9[%c0_77, %c36_78] : memref<32x254xf32, #tpu.memory_space<vmem>>, vector<4x216xf32>
    %c24 = arith.constant 24 : index
    %c0_79 = arith.constant 0 : index
    %71 = vector.load %arg10[%c24, %c0_79] : memref<36x216xf32, #tpu.memory_space<vmem>>, vector<4x216xf32>
    tpu.vector_store %arg10[%c24, %c0_79], %70 {strides = array<i32>} : memref<36x216xf32, #tpu.memory_space<vmem>>, vector<4x216xf32>,
    %c0_80 = arith.constant 0 : index
    %c37_81 = arith.constant 37 : index
    %72 = vector.load %arg9[%c0_80, %c37_81] : memref<32x254xf32, #tpu.memory_space<vmem>>, vector<4x216xf32>
    %c28 = arith.constant 28 : index
    %c0_82 = arith.constant 0 : index
    %73 = vector.load %arg10[%c28, %c0_82] : memref<36x216xf32, #tpu.memory_space<vmem>>, vector<4x216xf32>
    tpu.vector_store %arg10[%c28, %c0_82], %72 {strides = array<i32>} : memref<36x216xf32, #tpu.memory_space<vmem>>, vector<4x216xf32>,
    %c0_83 = arith.constant 0 : index
    %c38 = arith.constant 38 : index
    %74 = vector.load %arg9[%c0_83, %c38] : memref<32x254xf32, #tpu.memory_space<vmem>>, vector<4x216xf32>
    %c32_84 = arith.constant 32 : index
    %c0_85 = arith.constant 0 : index
    %75 = vector.load %arg10[%c32_84, %c0_85] : memref<36x216xf32, #tpu.memory_space<vmem>>, vector<4x216xf32>
    tpu.vector_store %arg10[%c32_84, %c0_85], %74 {strides = array<i32>} : memref<36x216xf32, #tpu.memory_space<vmem>>, vector<4x216xf32>,
    %c0_86 = arith.constant 0 : index
    %c0_87 = arith.constant 0 : index
    %76 = vector.load %arg1[%c0_86, %c0_87] : memref<12x36xf32, #tpu.memory_space<vmem>>, vector<12x36xf32>
    %c0_88 = arith.constant 0 : index
    %c0_89 = arith.constant 0 : index
    %77 = vector.load %arg10[%c0_88, %c0_89] : memref<36x216xf32, #tpu.memory_space<vmem>>, vector<36x216xf32>
    %cst_90 = arith.constant dense<0.000000e+00> : vector<12x216xf32>
    %78 = tpu.matmul %76, %77, %cst_90 {dimension_numbers = #tpu.dot_dimension_numbers<[1], [0], [0], [1], [0, 0, 1, 1], [], []>} : vector<12x36xf32>, vector<36x216xf32>, vector<12x216xf32> -> vector<12x216xf32>
    %cst_91 = arith.constant 2.000000e+01 : f32
    %79 = vector.broadcast %cst_91 : f32 to vector<12x216xf32>
    %80 = arith.cmpf oge, %78, %79 : vector<12x216xf32>
    %cst_92 = arith.constant 0.000000e+00 : f32
    %81 = vector.broadcast %cst_92 : f32 to vector<12x216xf32>
    %82 = arith.select %80, %78, %81 : vector<12x216xi1>, vector<12x216xf32>
    %83 = arith.extui %80 : vector<12x216xi1> to vector<12x216xi32>
    %84 = arith.sitofp %83 : vector<12x216xi32> to vector<12x216xf32>
    %c0_93 = arith.constant 0 : index
    %c0_94 = arith.constant 0 : index
    %85 = vector.load %arg4[%c0_93, %c0_94] : memref<96x216xf32, #tpu.memory_space<vmem>>, vector<12x216xf32>
    tpu.vector_store %arg4[%c0_93, %c0_94], %82 {strides = array<i32>} : memref<96x216xf32, #tpu.memory_space<vmem>>, vector<12x216xf32>,
    %c0_95 = arith.constant 0 : index
    %c0_96 = arith.constant 0 : index
    %86 = vector.load %arg5[%c0_95, %c0_96] : memref<96x216xf32, #tpu.memory_space<vmem>>, vector<12x216xf32>
    tpu.vector_store %arg5[%c0_95, %c0_96], %84 {strides = array<i32>} : memref<96x216xf32, #tpu.memory_space<vmem>>, vector<12x216xf32>,
    %87 = vector.broadcast %54 : vector<1x216xf32> to vector<12x216xf32>
    %88 = arith.mulf %84, %87 : vector<12x216xf32>
    %cst_97 = arith.constant 0.000000e+00 : f32
    %89 = vector.broadcast %cst_97 : f32 to vector<12x216xf32>
    %90 = arith.cmpf ogt, %88, %89 : vector<12x216xf32>
    %cst_98 = arith.constant 0.000000e+00 : f32
    %91 = vector.broadcast %cst_98 : f32 to vector<12x216xf32>
    %92 = arith.cmpf oeq, %56, %91 : vector<12x216xf32>
    %93 = arith.andi %90, %92 : vector<12x216xi1>
    %94 = arith.select %93, %78, %57 : vector<12x216xi1>, vector<12x216xf32>
    %95 = arith.addf %56, %88 : vector<12x216xf32>
    %c4_99 = arith.constant 4 : index
    %c0_100 = arith.constant 0 : index
    %96 = vector.load %arg9[%c4_99, %c0_100] : memref<32x254xf32, #tpu.memory_space<vmem>>, vector<4x216xf32>
    %c0_101 = arith.constant 0 : index
    %c0_102 = arith.constant 0 : index
    %97 = vector.load %arg10[%c0_101, %c0_102] : memref<36x216xf32, #tpu.memory_space<vmem>>, vector<4x216xf32>
    tpu.vector_store %arg10[%c0_101, %c0_102], %96 {strides = array<i32>} : memref<36x216xf32, #tpu.memory_space<vmem>>, vector<4x216xf32>,
    %c4_103 = arith.constant 4 : index
    %c1_104 = arith.constant 1 : index
    %98 = vector.load %arg9[%c4_103, %c1_104] : memref<32x254xf32, #tpu.memory_space<vmem>>, vector<4x216xf32>
    %c4_105 = arith.constant 4 : index
    %c0_106 = arith.constant 0 : index
    %99 = vector.load %arg10[%c4_105, %c0_106] : memref<36x216xf32, #tpu.memory_space<vmem>>, vector<4x216xf32>
    tpu.vector_store %arg10[%c4_105, %c0_106], %98 {strides = array<i32>} : memref<36x216xf32, #tpu.memory_space<vmem>>, vector<4x216xf32>,
    %c4_107 = arith.constant 4 : index
    %c2_108 = arith.constant 2 : index
    %100 = vector.load %arg9[%c4_107, %c2_108] : memref<32x254xf32, #tpu.memory_space<vmem>>, vector<4x216xf32>
    %c8_109 = arith.constant 8 : index
    %c0_110 = arith.constant 0 : index
    %101 = vector.load %arg10[%c8_109, %c0_110] : memref<36x216xf32, #tpu.memory_space<vmem>>, vector<4x216xf32>
    tpu.vector_store %arg10[%c8_109, %c0_110], %100 {strides = array<i32>} : memref<36x216xf32, #tpu.memory_space<vmem>>, vector<4x216xf32>,
    %c4_111 = arith.constant 4 : index
    %c18_112 = arith.constant 18 : index
    %102 = vector.load %arg9[%c4_111, %c18_112] : memref<32x254xf32, #tpu.memory_space<vmem>>, vector<4x216xf32>
    %c12_113 = arith.constant 12 : index
    %c0_114 = arith.constant 0 : index
    %103 = vector.load %arg10[%c12_113, %c0_114] : memref<36x216xf32, #tpu.memory_space<vmem>>, vector<4x216xf32>
    tpu.vector_store %arg10[%c12_113, %c0_114], %102 {strides = array<i32>} : memref<36x216xf32, #tpu.memory_space<vmem>>, vector<4x216xf32>,
    %c4_115 = arith.constant 4 : index
    %c19_116 = arith.constant 19 : index
    %104 = vector.load %arg9[%c4_115, %c19_116] : memref<32x254xf32, #tpu.memory_space<vmem>>, vector<4x216xf32>
    %c16_117 = arith.constant 16 : index
    %c0_118 = arith.constant 0 : index
    %105 = vector.load %arg10[%c16_117, %c0_118] : memref<36x216xf32, #tpu.memory_space<vmem>>, vector<4x216xf32>
    tpu.vector_store %arg10[%c16_117, %c0_118], %104 {strides = array<i32>} : memref<36x216xf32, #tpu.memory_space<vmem>>, vector<4x216xf32>,
    %c4_119 = arith.constant 4 : index
    %c20_120 = arith.constant 20 : index
    %106 = vector.load %arg9[%c4_119, %c20_120] : memref<32x254xf32, #tpu.memory_space<vmem>>, vector<4x216xf32>
    %c20_121 = arith.constant 20 : index
    %c0_122 = arith.constant 0 : index
    %107 = vector.load %arg10[%c20_121, %c0_122] : memref<36x216xf32, #tpu.memory_space<vmem>>, vector<4x216xf32>
    tpu.vector_store %arg10[%c20_121, %c0_122], %106 {strides = array<i32>} : memref<36x216xf32, #tpu.memory_space<vmem>>, vector<4x216xf32>,
    %c4_123 = arith.constant 4 : index
    %c36_124 = arith.constant 36 : index
    %108 = vector.load %arg9[%c4_123, %c36_124] : memref<32x254xf32, #tpu.memory_space<vmem>>, vector<4x216xf32>
    %c24_125 = arith.constant 24 : index
    %c0_126 = arith.constant 0 : index
    %109 = vector.load %arg10[%c24_125, %c0_126] : memref<36x216xf32, #tpu.memory_space<vmem>>, vector<4x216xf32>
    tpu.vector_store %arg10[%c24_125, %c0_126], %108 {strides = array<i32>} : memref<36x216xf32, #tpu.memory_space<vmem>>, vector<4x216xf32>,
    %c4_127 = arith.constant 4 : index
    %c37_128 = arith.constant 37 : index
    %110 = vector.load %arg9[%c4_127, %c37_128] : memref<32x254xf32, #tpu.memory_space<vmem>>, vector<4x216xf32>
    %c28_129 = arith.constant 28 : index
    %c0_130 = arith.constant 0 : index
    %111 = vector.load %arg10[%c28_129, %c0_130] : memref<36x216xf32, #tpu.memory_space<vmem>>, vector<4x216xf32>
    tpu.vector_store %arg10[%c28_129, %c0_130], %110 {strides = array<i32>} : memref<36x216xf32, #tpu.memory_space<vmem>>, vector<4x216xf32>,
    %c4_131 = arith.constant 4 : index
    %c38_132 = arith.constant 38 : index
    %112 = vector.load %arg9[%c4_131, %c38_132] : memref<32x254xf32, #tpu.memory_space<vmem>>, vector<4x216xf32>
    %c32_133 = arith.constant 32 : index
    %c0_134 = arith.constant 0 : index
    %113 = vector.load %arg10[%c32_133, %c0_134] : memref<36x216xf32, #tpu.memory_space<vmem>>, vector<4x216xf32>
    tpu.vector_store %arg10[%c32_133, %c0_134], %112 {strides = array<i32>} : memref<36x216xf32, #tpu.memory_space<vmem>>, vector<4x216xf32>,
    %c0_135 = arith.constant 0 : index
    %c0_136 = arith.constant 0 : index
    %114 = vector.load %arg1[%c0_135, %c0_136] : memref<12x36xf32, #tpu.memory_space<vmem>>, vector<12x36xf32>
    %c0_137 = arith.constant 0 : index
    %c0_138 = arith.constant 0 : index
    %115 = vector.load %arg10[%c0_137, %c0_138] : memref<36x216xf32, #tpu.memory_space<vmem>>, vector<36x216xf32>
    %cst_139 = arith.constant dense<0.000000e+00> : vector<12x216xf32>
    %116 = tpu.matmul %114, %115, %cst_139 {dimension_numbers = #tpu.dot_dimension_numbers<[1], [0], [0], [1], [0, 0, 1, 1], [], []>} : vector<12x36xf32>, vector<36x216xf32>, vector<12x216xf32> -> vector<12x216xf32>
    %cst_140 = arith.constant 2.000000e+01 : f32
    %117 = vector.broadcast %cst_140 : f32 to vector<12x216xf32>
    %118 = arith.cmpf oge, %116, %117 : vector<12x216xf32>
    %cst_141 = arith.constant 0.000000e+00 : f32
    %119 = vector.broadcast %cst_141 : f32 to vector<12x216xf32>
    %120 = arith.select %118, %116, %119 : vector<12x216xi1>, vector<12x216xf32>
    %121 = arith.extui %118 : vector<12x216xi1> to vector<12x216xi32>
    %122 = arith.sitofp %121 : vector<12x216xi32> to vector<12x216xf32>
    %c12_142 = arith.constant 12 : index
    %c0_143 = arith.constant 0 : index
    %123 = vector.load %arg4[%c12_142, %c0_143] : memref<96x216xf32, #tpu.memory_space<vmem>>, vector<12x216xf32>
    tpu.vector_store %arg4[%c12_142, %c0_143], %120 {strides = array<i32>} : memref<96x216xf32, #tpu.memory_space<vmem>>, vector<12x216xf32>,
    %c12_144 = arith.constant 12 : index
    %c0_145 = arith.constant 0 : index
    %124 = vector.load %arg5[%c12_144, %c0_145] : memref<96x216xf32, #tpu.memory_space<vmem>>, vector<12x216xf32>
    tpu.vector_store %arg5[%c12_144, %c0_145], %122 {strides = array<i32>} : memref<96x216xf32, #tpu.memory_space<vmem>>, vector<12x216xf32>,
    %125 = vector.broadcast %54 : vector<1x216xf32> to vector<12x216xf32>
    %126 = arith.mulf %122, %125 : vector<12x216xf32>
    %cst_146 = arith.constant 0.000000e+00 : f32
    %127 = vector.broadcast %cst_146 : f32 to vector<12x216xf32>
    %128 = arith.cmpf ogt, %126, %127 : vector<12x216xf32>
    %cst_147 = arith.constant 0.000000e+00 : f32
    %129 = vector.broadcast %cst_147 : f32 to vector<12x216xf32>
    %130 = arith.cmpf oeq, %95, %129 : vector<12x216xf32>
    %131 = arith.andi %128, %130 : vector<12x216xi1>
    %132 = arith.select %131, %116, %94 : vector<12x216xi1>, vector<12x216xf32>
    %133 = arith.addf %95, %126 : vector<12x216xf32>
    %c8_148 = arith.constant 8 : index
    %c0_149 = arith.constant 0 : index
    %134 = vector.load %arg9[%c8_148, %c0_149] : memref<32x254xf32, #tpu.memory_space<vmem>>, vector<4x216xf32>
    %c0_150 = arith.constant 0 : index
    %c0_151 = arith.constant 0 : index
    %135 = vector.load %arg10[%c0_150, %c0_151] : memref<36x216xf32, #tpu.memory_space<vmem>>, vector<4x216xf32>
    tpu.vector_store %arg10[%c0_150, %c0_151], %134 {strides = array<i32>} : memref<36x216xf32, #tpu.memory_space<vmem>>, vector<4x216xf32>,
    %c8_152 = arith.constant 8 : index
    %c1_153 = arith.constant 1 : index
    %136 = vector.load %arg9[%c8_152, %c1_153] : memref<32x254xf32, #tpu.memory_space<vmem>>, vector<4x216xf32>
    %c4_154 = arith.constant 4 : index
    %c0_155 = arith.constant 0 : index
    %137 = vector.load %arg10[%c4_154, %c0_155] : memref<36x216xf32, #tpu.memory_space<vmem>>, vector<4x216xf32>
    tpu.vector_store %arg10[%c4_154, %c0_155], %136 {strides = array<i32>} : memref<36x216xf32, #tpu.memory_space<vmem>>, vector<4x216xf32>,
    %c8_156 = arith.constant 8 : index
    %c2_157 = arith.constant 2 : index
    %138 = vector.load %arg9[%c8_156, %c2_157] : memref<32x254xf32, #tpu.memory_space<vmem>>, vector<4x216xf32>
    %c8_158 = arith.constant 8 : index
    %c0_159 = arith.constant 0 : index
    %139 = vector.load %arg10[%c8_158, %c0_159] : memref<36x216xf32, #tpu.memory_space<vmem>>, vector<4x216xf32>
    tpu.vector_store %arg10[%c8_158, %c0_159], %138 {strides = array<i32>} : memref<36x216xf32, #tpu.memory_space<vmem>>, vector<4x216xf32>,
    %c8_160 = arith.constant 8 : index
    %c18_161 = arith.constant 18 : index
    %140 = vector.load %arg9[%c8_160, %c18_161] : memref<32x254xf32, #tpu.memory_space<vmem>>, vector<4x216xf32>
    %c12_162 = arith.constant 12 : index
    %c0_163 = arith.constant 0 : index
    %141 = vector.load %arg10[%c12_162, %c0_163] : memref<36x216xf32, #tpu.memory_space<vmem>>, vector<4x216xf32>
    tpu.vector_store %arg10[%c12_162, %c0_163], %140 {strides = array<i32>} : memref<36x216xf32, #tpu.memory_space<vmem>>, vector<4x216xf32>,
    %c8_164 = arith.constant 8 : index
    %c19_165 = arith.constant 19 : index
    %142 = vector.load %arg9[%c8_164, %c19_165] : memref<32x254xf32, #tpu.memory_space<vmem>>, vector<4x216xf32>
    %c16_166 = arith.constant 16 : index
    %c0_167 = arith.constant 0 : index
    %143 = vector.load %arg10[%c16_166, %c0_167] : memref<36x216xf32, #tpu.memory_space<vmem>>, vector<4x216xf32>
    tpu.vector_store %arg10[%c16_166, %c0_167], %142 {strides = array<i32>} : memref<36x216xf32, #tpu.memory_space<vmem>>, vector<4x216xf32>,
    %c8_168 = arith.constant 8 : index
    %c20_169 = arith.constant 20 : index
    %144 = vector.load %arg9[%c8_168, %c20_169] : memref<32x254xf32, #tpu.memory_space<vmem>>, vector<4x216xf32>
    %c20_170 = arith.constant 20 : index
    %c0_171 = arith.constant 0 : index
    %145 = vector.load %arg10[%c20_170, %c0_171] : memref<36x216xf32, #tpu.memory_space<vmem>>, vector<4x216xf32>
    tpu.vector_store %arg10[%c20_170, %c0_171], %144 {strides = array<i32>} : memref<36x216xf32, #tpu.memory_space<vmem>>, vector<4x216xf32>,
    %c8_172 = arith.constant 8 : index
    %c36_173 = arith.constant 36 : index
    %146 = vector.load %arg9[%c8_172, %c36_173] : memref<32x254xf32, #tpu.memory_space<vmem>>, vector<4x216xf32>
    %c24_174 = arith.constant 24 : index
    %c0_175 = arith.constant 0 : index
    %147 = vector.load %arg10[%c24_174, %c0_175] : memref<36x216xf32, #tpu.memory_space<vmem>>, vector<4x216xf32>
    tpu.vector_store %arg10[%c24_174, %c0_175], %146 {strides = array<i32>} : memref<36x216xf32, #tpu.memory_space<vmem>>, vector<4x216xf32>,
    %c8_176 = arith.constant 8 : index
    %c37_177 = arith.constant 37 : index
    %148 = vector.load %arg9[%c8_176, %c37_177] : memref<32x254xf32, #tpu.memory_space<vmem>>, vector<4x216xf32>
    %c28_178 = arith.constant 28 : index
    %c0_179 = arith.constant 0 : index
    %149 = vector.load %arg10[%c28_178, %c0_179] : memref<36x216xf32, #tpu.memory_space<vmem>>, vector<4x216xf32>
    tpu.vector_store %arg10[%c28_178, %c0_179], %148 {strides = array<i32>} : memref<36x216xf32, #tpu.memory_space<vmem>>, vector<4x216xf32>,
    %c8_180 = arith.constant 8 : index
    %c38_181 = arith.constant 38 : index
    %150 = vector.load %arg9[%c8_180, %c38_181] : memref<32x254xf32, #tpu.memory_space<vmem>>, vector<4x216xf32>
    %c32_182 = arith.constant 32 : index
    %c0_183 = arith.constant 0 : index
    %151 = vector.load %arg10[%c32_182, %c0_183] : memref<36x216xf32, #tpu.memory_space<vmem>>, vector<4x216xf32>
    tpu.vector_store %arg10[%c32_182, %c0_183], %150 {strides = array<i32>} : memref<36x216xf32, #tpu.memory_space<vmem>>, vector<4x216xf32>,
    %c0_184 = arith.constant 0 : index
    %c0_185 = arith.constant 0 : index
    %152 = vector.load %arg1[%c0_184, %c0_185] : memref<12x36xf32, #tpu.memory_space<vmem>>, vector<12x36xf32>
    %c0_186 = arith.constant 0 : index
    %c0_187 = arith.constant 0 : index
    %153 = vector.load %arg10[%c0_186, %c0_187] : memref<36x216xf32, #tpu.memory_space<vmem>>, vector<36x216xf32>
    %cst_188 = arith.constant dense<0.000000e+00> : vector<12x216xf32>
    %154 = tpu.matmul %152, %153, %cst_188 {dimension_numbers = #tpu.dot_dimension_numbers<[1], [0], [0], [1], [0, 0, 1, 1], [], []>} : vector<12x36xf32>, vector<36x216xf32>, vector<12x216xf32> -> vector<12x216xf32>
    %cst_189 = arith.constant 2.000000e+01 : f32
    %155 = vector.broadcast %cst_189 : f32 to vector<12x216xf32>
    %156 = arith.cmpf oge, %154, %155 : vector<12x216xf32>
    %cst_190 = arith.constant 0.000000e+00 : f32
    %157 = vector.broadcast %cst_190 : f32 to vector<12x216xf32>
    %158 = arith.select %156, %154, %157 : vector<12x216xi1>, vector<12x216xf32>
    %159 = arith.extui %156 : vector<12x216xi1> to vector<12x216xi32>
    %160 = arith.sitofp %159 : vector<12x216xi32> to vector<12x216xf32>
    %c24_191 = arith.constant 24 : index
    %c0_192 = arith.constant 0 : index
    %161 = vector.load %arg4[%c24_191, %c0_192] : memref<96x216xf32, #tpu.memory_space<vmem>>, vector<12x216xf32>
    tpu.vector_store %arg4[%c24_191, %c0_192], %158 {strides = array<i32>} : memref<96x216xf32, #tpu.memory_space<vmem>>, vector<12x216xf32>,
    %c24_193 = arith.constant 24 : index
    %c0_194 = arith.constant 0 : index
    %162 = vector.load %arg5[%c24_193, %c0_194] : memref<96x216xf32, #tpu.memory_space<vmem>>, vector<12x216xf32>
    tpu.vector_store %arg5[%c24_193, %c0_194], %160 {strides = array<i32>} : memref<96x216xf32, #tpu.memory_space<vmem>>, vector<12x216xf32>,
    %163 = vector.broadcast %54 : vector<1x216xf32> to vector<12x216xf32>
    %164 = arith.mulf %160, %163 : vector<12x216xf32>
    %cst_195 = arith.constant 0.000000e+00 : f32
    %165 = vector.broadcast %cst_195 : f32 to vector<12x216xf32>
    %166 = arith.cmpf ogt, %164, %165 : vector<12x216xf32>
    %cst_196 = arith.constant 0.000000e+00 : f32
    %167 = vector.broadcast %cst_196 : f32 to vector<12x216xf32>
    %168 = arith.cmpf oeq, %133, %167 : vector<12x216xf32>
    %169 = arith.andi %166, %168 : vector<12x216xi1>
    %170 = arith.select %169, %154, %132 : vector<12x216xi1>, vector<12x216xf32>
    %171 = arith.addf %133, %164 : vector<12x216xf32>
    %c12_197 = arith.constant 12 : index
    %c0_198 = arith.constant 0 : index
    %172 = vector.load %arg9[%c12_197, %c0_198] : memref<32x254xf32, #tpu.memory_space<vmem>>, vector<4x216xf32>
    %c0_199 = arith.constant 0 : index
    %c0_200 = arith.constant 0 : index
    %173 = vector.load %arg10[%c0_199, %c0_200] : memref<36x216xf32, #tpu.memory_space<vmem>>, vector<4x216xf32>
    tpu.vector_store %arg10[%c0_199, %c0_200], %172 {strides = array<i32>} : memref<36x216xf32, #tpu.memory_space<vmem>>, vector<4x216xf32>,
    %c12_201 = arith.constant 12 : index
    %c1_202 = arith.constant 1 : index
    %174 = vector.load %arg9[%c12_201, %c1_202] : memref<32x254xf32, #tpu.memory_space<vmem>>, vector<4x216xf32>
    %c4_203 = arith.constant 4 : index
    %c0_204 = arith.constant 0 : index
    %175 = vector.load %arg10[%c4_203, %c0_204] : memref<36x216xf32, #tpu.memory_space<vmem>>, vector<4x216xf32>
    tpu.vector_store %arg10[%c4_203, %c0_204], %174 {strides = array<i32>} : memref<36x216xf32, #tpu.memory_space<vmem>>, vector<4x216xf32>,
    %c12_205 = arith.constant 12 : index
    %c2_206 = arith.constant 2 : index
    %176 = vector.load %arg9[%c12_205, %c2_206] : memref<32x254xf32, #tpu.memory_space<vmem>>, vector<4x216xf32>
    %c8_207 = arith.constant 8 : index
    %c0_208 = arith.constant 0 : index
    %177 = vector.load %arg10[%c8_207, %c0_208] : memref<36x216xf32, #tpu.memory_space<vmem>>, vector<4x216xf32>
    tpu.vector_store %arg10[%c8_207, %c0_208], %176 {strides = array<i32>} : memref<36x216xf32, #tpu.memory_space<vmem>>, vector<4x216xf32>,
    %c12_209 = arith.constant 12 : index
    %c18_210 = arith.constant 18 : index
    %178 = vector.load %arg9[%c12_209, %c18_210] : memref<32x254xf32, #tpu.memory_space<vmem>>, vector<4x216xf32>
    %c12_211 = arith.constant 12 : index
    %c0_212 = arith.constant 0 : index
    %179 = vector.load %arg10[%c12_211, %c0_212] : memref<36x216xf32, #tpu.memory_space<vmem>>, vector<4x216xf32>
    tpu.vector_store %arg10[%c12_211, %c0_212], %178 {strides = array<i32>} : memref<36x216xf32, #tpu.memory_space<vmem>>, vector<4x216xf32>,
    %c12_213 = arith.constant 12 : index
    %c19_214 = arith.constant 19 : index
    %180 = vector.load %arg9[%c12_213, %c19_214] : memref<32x254xf32, #tpu.memory_space<vmem>>, vector<4x216xf32>
    %c16_215 = arith.constant 16 : index
    %c0_216 = arith.constant 0 : index
    %181 = vector.load %arg10[%c16_215, %c0_216] : memref<36x216xf32, #tpu.memory_space<vmem>>, vector<4x216xf32>
    tpu.vector_store %arg10[%c16_215, %c0_216], %180 {strides = array<i32>} : memref<36x216xf32, #tpu.memory_space<vmem>>, vector<4x216xf32>,
    %c12_217 = arith.constant 12 : index
    %c20_218 = arith.constant 20 : index
    %182 = vector.load %arg9[%c12_217, %c20_218] : memref<32x254xf32, #tpu.memory_space<vmem>>, vector<4x216xf32>
    %c20_219 = arith.constant 20 : index
    %c0_220 = arith.constant 0 : index
    %183 = vector.load %arg10[%c20_219, %c0_220] : memref<36x216xf32, #tpu.memory_space<vmem>>, vector<4x216xf32>
    tpu.vector_store %arg10[%c20_219, %c0_220], %182 {strides = array<i32>} : memref<36x216xf32, #tpu.memory_space<vmem>>, vector<4x216xf32>,
    %c12_221 = arith.constant 12 : index
    %c36_222 = arith.constant 36 : index
    %184 = vector.load %arg9[%c12_221, %c36_222] : memref<32x254xf32, #tpu.memory_space<vmem>>, vector<4x216xf32>
    %c24_223 = arith.constant 24 : index
    %c0_224 = arith.constant 0 : index
    %185 = vector.load %arg10[%c24_223, %c0_224] : memref<36x216xf32, #tpu.memory_space<vmem>>, vector<4x216xf32>
    tpu.vector_store %arg10[%c24_223, %c0_224], %184 {strides = array<i32>} : memref<36x216xf32, #tpu.memory_space<vmem>>, vector<4x216xf32>,
    %c12_225 = arith.constant 12 : index
    %c37_226 = arith.constant 37 : index
    %186 = vector.load %arg9[%c12_225, %c37_226] : memref<32x254xf32, #tpu.memory_space<vmem>>, vector<4x216xf32>
    %c28_227 = arith.constant 28 : index
    %c0_228 = arith.constant 0 : index
    %187 = vector.load %arg10[%c28_227, %c0_228] : memref<36x216xf32, #tpu.memory_space<vmem>>, vector<4x216xf32>
    tpu.vector_store %arg10[%c28_227, %c0_228], %186 {strides = array<i32>} : memref<36x216xf32, #tpu.memory_space<vmem>>, vector<4x216xf32>,
    %c12_229 = arith.constant 12 : index
    %c38_230 = arith.constant 38 : index
    %188 = vector.load %arg9[%c12_229, %c38_230] : memref<32x254xf32, #tpu.memory_space<vmem>>, vector<4x216xf32>
    %c32_231 = arith.constant 32 : index
    %c0_232 = arith.constant 0 : index
    %189 = vector.load %arg10[%c32_231, %c0_232] : memref<36x216xf32, #tpu.memory_space<vmem>>, vector<4x216xf32>
    tpu.vector_store %arg10[%c32_231, %c0_232], %188 {strides = array<i32>} : memref<36x216xf32, #tpu.memory_space<vmem>>, vector<4x216xf32>,
    %c0_233 = arith.constant 0 : index
    %c0_234 = arith.constant 0 : index
    %190 = vector.load %arg1[%c0_233, %c0_234] : memref<12x36xf32, #tpu.memory_space<vmem>>, vector<12x36xf32>
    %c0_235 = arith.constant 0 : index
    %c0_236 = arith.constant 0 : index
    %191 = vector.load %arg10[%c0_235, %c0_236] : memref<36x216xf32, #tpu.memory_space<vmem>>, vector<36x216xf32>
    %cst_237 = arith.constant dense<0.000000e+00> : vector<12x216xf32>
    %192 = tpu.matmul %190, %191, %cst_237 {dimension_numbers = #tpu.dot_dimension_numbers<[1], [0], [0], [1], [0, 0, 1, 1], [], []>} : vector<12x36xf32>, vector<36x216xf32>, vector<12x216xf32> -> vector<12x216xf32>
    %cst_238 = arith.constant 2.000000e+01 : f32
    %193 = vector.broadcast %cst_238 : f32 to vector<12x216xf32>
    %194 = arith.cmpf oge, %192, %193 : vector<12x216xf32>
    %cst_239 = arith.constant 0.000000e+00 : f32
    %195 = vector.broadcast %cst_239 : f32 to vector<12x216xf32>
    %196 = arith.select %194, %192, %195 : vector<12x216xi1>, vector<12x216xf32>
    %197 = arith.extui %194 : vector<12x216xi1> to vector<12x216xi32>
    %198 = arith.sitofp %197 : vector<12x216xi32> to vector<12x216xf32>
    %c36_240 = arith.constant 36 : index
    %c0_241 = arith.constant 0 : index
    %199 = vector.load %arg4[%c36_240, %c0_241] : memref<96x216xf32, #tpu.memory_space<vmem>>, vector<12x216xf32>
    tpu.vector_store %arg4[%c36_240, %c0_241], %196 {strides = array<i32>} : memref<96x216xf32, #tpu.memory_space<vmem>>, vector<12x216xf32>,
    %c36_242 = arith.constant 36 : index
    %c0_243 = arith.constant 0 : index
    %200 = vector.load %arg5[%c36_242, %c0_243] : memref<96x216xf32, #tpu.memory_space<vmem>>, vector<12x216xf32>
    tpu.vector_store %arg5[%c36_242, %c0_243], %198 {strides = array<i32>} : memref<96x216xf32, #tpu.memory_space<vmem>>, vector<12x216xf32>,
    %201 = vector.broadcast %54 : vector<1x216xf32> to vector<12x216xf32>
    %202 = arith.mulf %198, %201 : vector<12x216xf32>
    %cst_244 = arith.constant 0.000000e+00 : f32
    %203 = vector.broadcast %cst_244 : f32 to vector<12x216xf32>
    %204 = arith.cmpf ogt, %202, %203 : vector<12x216xf32>
    %cst_245 = arith.constant 0.000000e+00 : f32
    %205 = vector.broadcast %cst_245 : f32 to vector<12x216xf32>
    %206 = arith.cmpf oeq, %171, %205 : vector<12x216xf32>
    %207 = arith.andi %204, %206 : vector<12x216xi1>
    %208 = arith.select %207, %192, %170 : vector<12x216xi1>, vector<12x216xf32>
    %209 = arith.addf %171, %202 : vector<12x216xf32>
    %c16_246 = arith.constant 16 : index
    %c0_247 = arith.constant 0 : index
    %210 = vector.load %arg9[%c16_246, %c0_247] : memref<32x254xf32, #tpu.memory_space<vmem>>, vector<4x216xf32>
    %c0_248 = arith.constant 0 : index
    %c0_249 = arith.constant 0 : index
    %211 = vector.load %arg10[%c0_248, %c0_249] : memref<36x216xf32, #tpu.memory_space<vmem>>, vector<4x216xf32>
    tpu.vector_store %arg10[%c0_248, %c0_249], %210 {strides = array<i32>} : memref<36x216xf32, #tpu.memory_space<vmem>>, vector<4x216xf32>,
    %c16_250 = arith.constant 16 : index
    %c1_251 = arith.constant 1 : index
    %212 = vector.load %arg9[%c16_250, %c1_251] : memref<32x254xf32, #tpu.memory_space<vmem>>, vector<4x216xf32>
    %c4_252 = arith.constant 4 : index
    %c0_253 = arith.constant 0 : index
    %213 = vector.load %arg10[%c4_252, %c0_253] : memref<36x216xf32, #tpu.memory_space<vmem>>, vector<4x216xf32>
    tpu.vector_store %arg10[%c4_252, %c0_253], %212 {strides = array<i32>} : memref<36x216xf32, #tpu.memory_space<vmem>>, vector<4x216xf32>,
    %c16_254 = arith.constant 16 : index
    %c2_255 = arith.constant 2 : index
    %214 = vector.load %arg9[%c16_254, %c2_255] : memref<32x254xf32, #tpu.memory_space<vmem>>, vector<4x216xf32>
    %c8_256 = arith.constant 8 : index
    %c0_257 = arith.constant 0 : index
    %215 = vector.load %arg10[%c8_256, %c0_257] : memref<36x216xf32, #tpu.memory_space<vmem>>, vector<4x216xf32>
    tpu.vector_store %arg10[%c8_256, %c0_257], %214 {strides = array<i32>} : memref<36x216xf32, #tpu.memory_space<vmem>>, vector<4x216xf32>,
    %c16_258 = arith.constant 16 : index
    %c18_259 = arith.constant 18 : index
    %216 = vector.load %arg9[%c16_258, %c18_259] : memref<32x254xf32, #tpu.memory_space<vmem>>, vector<4x216xf32>
    %c12_260 = arith.constant 12 : index
    %c0_261 = arith.constant 0 : index
    %217 = vector.load %arg10[%c12_260, %c0_261] : memref<36x216xf32, #tpu.memory_space<vmem>>, vector<4x216xf32>
    tpu.vector_store %arg10[%c12_260, %c0_261], %216 {strides = array<i32>} : memref<36x216xf32, #tpu.memory_space<vmem>>, vector<4x216xf32>,
    %c16_262 = arith.constant 16 : index
    %c19_263 = arith.constant 19 : index
    %218 = vector.load %arg9[%c16_262, %c19_263] : memref<32x254xf32, #tpu.memory_space<vmem>>, vector<4x216xf32>
    %c16_264 = arith.constant 16 : index
    %c0_265 = arith.constant 0 : index
    %219 = vector.load %arg10[%c16_264, %c0_265] : memref<36x216xf32, #tpu.memory_space<vmem>>, vector<4x216xf32>
    tpu.vector_store %arg10[%c16_264, %c0_265], %218 {strides = array<i32>} : memref<36x216xf32, #tpu.memory_space<vmem>>, vector<4x216xf32>,
    %c16_266 = arith.constant 16 : index
    %c20_267 = arith.constant 20 : index
    %220 = vector.load %arg9[%c16_266, %c20_267] : memref<32x254xf32, #tpu.memory_space<vmem>>, vector<4x216xf32>
    %c20_268 = arith.constant 20 : index
    %c0_269 = arith.constant 0 : index
    %221 = vector.load %arg10[%c20_268, %c0_269] : memref<36x216xf32, #tpu.memory_space<vmem>>, vector<4x216xf32>
    tpu.vector_store %arg10[%c20_268, %c0_269], %220 {strides = array<i32>} : memref<36x216xf32, #tpu.memory_space<vmem>>, vector<4x216xf32>,
    %c16_270 = arith.constant 16 : index
    %c36_271 = arith.constant 36 : index
    %222 = vector.load %arg9[%c16_270, %c36_271] : memref<32x254xf32, #tpu.memory_space<vmem>>, vector<4x216xf32>
    %c24_272 = arith.constant 24 : index
    %c0_273 = arith.constant 0 : index
    %223 = vector.load %arg10[%c24_272, %c0_273] : memref<36x216xf32, #tpu.memory_space<vmem>>, vector<4x216xf32>
    tpu.vector_store %arg10[%c24_272, %c0_273], %222 {strides = array<i32>} : memref<36x216xf32, #tpu.memory_space<vmem>>, vector<4x216xf32>,
    %c16_274 = arith.constant 16 : index
    %c37_275 = arith.constant 37 : index
    %224 = vector.load %arg9[%c16_274, %c37_275] : memref<32x254xf32, #tpu.memory_space<vmem>>, vector<4x216xf32>
    %c28_276 = arith.constant 28 : index
    %c0_277 = arith.constant 0 : index
    %225 = vector.load %arg10[%c28_276, %c0_277] : memref<36x216xf32, #tpu.memory_space<vmem>>, vector<4x216xf32>
    tpu.vector_store %arg10[%c28_276, %c0_277], %224 {strides = array<i32>} : memref<36x216xf32, #tpu.memory_space<vmem>>, vector<4x216xf32>,
    %c16_278 = arith.constant 16 : index
    %c38_279 = arith.constant 38 : index
    %226 = vector.load %arg9[%c16_278, %c38_279] : memref<32x254xf32, #tpu.memory_space<vmem>>, vector<4x216xf32>
    %c32_280 = arith.constant 32 : index
    %c0_281 = arith.constant 0 : index
    %227 = vector.load %arg10[%c32_280, %c0_281] : memref<36x216xf32, #tpu.memory_space<vmem>>, vector<4x216xf32>
    tpu.vector_store %arg10[%c32_280, %c0_281], %226 {strides = array<i32>} : memref<36x216xf32, #tpu.memory_space<vmem>>, vector<4x216xf32>,
    %c0_282 = arith.constant 0 : index
    %c0_283 = arith.constant 0 : index
    %228 = vector.load %arg1[%c0_282, %c0_283] : memref<12x36xf32, #tpu.memory_space<vmem>>, vector<12x36xf32>
    %c0_284 = arith.constant 0 : index
    %c0_285 = arith.constant 0 : index
    %229 = vector.load %arg10[%c0_284, %c0_285] : memref<36x216xf32, #tpu.memory_space<vmem>>, vector<36x216xf32>
    %cst_286 = arith.constant dense<0.000000e+00> : vector<12x216xf32>
    %230 = tpu.matmul %228, %229, %cst_286 {dimension_numbers = #tpu.dot_dimension_numbers<[1], [0], [0], [1], [0, 0, 1, 1], [], []>} : vector<12x36xf32>, vector<36x216xf32>, vector<12x216xf32> -> vector<12x216xf32>
    %cst_287 = arith.constant 2.000000e+01 : f32
    %231 = vector.broadcast %cst_287 : f32 to vector<12x216xf32>
    %232 = arith.cmpf oge, %230, %231 : vector<12x216xf32>
    %cst_288 = arith.constant 0.000000e+00 : f32
    %233 = vector.broadcast %cst_288 : f32 to vector<12x216xf32>
    %234 = arith.select %232, %230, %233 : vector<12x216xi1>, vector<12x216xf32>
    %235 = arith.extui %232 : vector<12x216xi1> to vector<12x216xi32>
    %236 = arith.sitofp %235 : vector<12x216xi32> to vector<12x216xf32>
    %c48_289 = arith.constant 48 : index
    %c0_290 = arith.constant 0 : index
    %237 = vector.load %arg4[%c48_289, %c0_290] : memref<96x216xf32, #tpu.memory_space<vmem>>, vector<12x216xf32>
    tpu.vector_store %arg4[%c48_289, %c0_290], %234 {strides = array<i32>} : memref<96x216xf32, #tpu.memory_space<vmem>>, vector<12x216xf32>,
    %c48_291 = arith.constant 48 : index
    %c0_292 = arith.constant 0 : index
    %238 = vector.load %arg5[%c48_291, %c0_292] : memref<96x216xf32, #tpu.memory_space<vmem>>, vector<12x216xf32>
    tpu.vector_store %arg5[%c48_291, %c0_292], %236 {strides = array<i32>} : memref<96x216xf32, #tpu.memory_space<vmem>>, vector<12x216xf32>,
    %239 = vector.broadcast %54 : vector<1x216xf32> to vector<12x216xf32>
    %240 = arith.mulf %236, %239 : vector<12x216xf32>
    %cst_293 = arith.constant 0.000000e+00 : f32
    %241 = vector.broadcast %cst_293 : f32 to vector<12x216xf32>
    %242 = arith.cmpf ogt, %240, %241 : vector<12x216xf32>
    %cst_294 = arith.constant 0.000000e+00 : f32
    %243 = vector.broadcast %cst_294 : f32 to vector<12x216xf32>
    %244 = arith.cmpf oeq, %209, %243 : vector<12x216xf32>
    %245 = arith.andi %242, %244 : vector<12x216xi1>
    %246 = arith.select %245, %230, %208 : vector<12x216xi1>, vector<12x216xf32>
    %247 = arith.addf %209, %240 : vector<12x216xf32>
    %c20_295 = arith.constant 20 : index
    %c0_296 = arith.constant 0 : index
    %248 = vector.load %arg9[%c20_295, %c0_296] : memref<32x254xf32, #tpu.memory_space<vmem>>, vector<4x216xf32>
    %c0_297 = arith.constant 0 : index
    %c0_298 = arith.constant 0 : index
    %249 = vector.load %arg10[%c0_297, %c0_298] : memref<36x216xf32, #tpu.memory_space<vmem>>, vector<4x216xf32>
    tpu.vector_store %arg10[%c0_297, %c0_298], %248 {strides = array<i32>} : memref<36x216xf32, #tpu.memory_space<vmem>>, vector<4x216xf32>,
    %c20_299 = arith.constant 20 : index
    %c1_300 = arith.constant 1 : index
    %250 = vector.load %arg9[%c20_299, %c1_300] : memref<32x254xf32, #tpu.memory_space<vmem>>, vector<4x216xf32>
    %c4_301 = arith.constant 4 : index
    %c0_302 = arith.constant 0 : index
    %251 = vector.load %arg10[%c4_301, %c0_302] : memref<36x216xf32, #tpu.memory_space<vmem>>, vector<4x216xf32>
    tpu.vector_store %arg10[%c4_301, %c0_302], %250 {strides = array<i32>} : memref<36x216xf32, #tpu.memory_space<vmem>>, vector<4x216xf32>,
    %c20_303 = arith.constant 20 : index
    %c2_304 = arith.constant 2 : index
    %252 = vector.load %arg9[%c20_303, %c2_304] : memref<32x254xf32, #tpu.memory_space<vmem>>, vector<4x216xf32>
    %c8_305 = arith.constant 8 : index
    %c0_306 = arith.constant 0 : index
    %253 = vector.load %arg10[%c8_305, %c0_306] : memref<36x216xf32, #tpu.memory_space<vmem>>, vector<4x216xf32>
    tpu.vector_store %arg10[%c8_305, %c0_306], %252 {strides = array<i32>} : memref<36x216xf32, #tpu.memory_space<vmem>>, vector<4x216xf32>,
    %c20_307 = arith.constant 20 : index
    %c18_308 = arith.constant 18 : index
    %254 = vector.load %arg9[%c20_307, %c18_308] : memref<32x254xf32, #tpu.memory_space<vmem>>, vector<4x216xf32>
    %c12_309 = arith.constant 12 : index
    %c0_310 = arith.constant 0 : index
    %255 = vector.load %arg10[%c12_309, %c0_310] : memref<36x216xf32, #tpu.memory_space<vmem>>, vector<4x216xf32>
    tpu.vector_store %arg10[%c12_309, %c0_310], %254 {strides = array<i32>} : memref<36x216xf32, #tpu.memory_space<vmem>>, vector<4x216xf32>,
    %c20_311 = arith.constant 20 : index
    %c19_312 = arith.constant 19 : index
    %256 = vector.load %arg9[%c20_311, %c19_312] : memref<32x254xf32, #tpu.memory_space<vmem>>, vector<4x216xf32>
    %c16_313 = arith.constant 16 : index
    %c0_314 = arith.constant 0 : index
    %257 = vector.load %arg10[%c16_313, %c0_314] : memref<36x216xf32, #tpu.memory_space<vmem>>, vector<4x216xf32>
    tpu.vector_store %arg10[%c16_313, %c0_314], %256 {strides = array<i32>} : memref<36x216xf32, #tpu.memory_space<vmem>>, vector<4x216xf32>,
    %c20_315 = arith.constant 20 : index
    %c20_316 = arith.constant 20 : index
    %258 = vector.load %arg9[%c20_315, %c20_316] : memref<32x254xf32, #tpu.memory_space<vmem>>, vector<4x216xf32>
    %c20_317 = arith.constant 20 : index
    %c0_318 = arith.constant 0 : index
    %259 = vector.load %arg10[%c20_317, %c0_318] : memref<36x216xf32, #tpu.memory_space<vmem>>, vector<4x216xf32>
    tpu.vector_store %arg10[%c20_317, %c0_318], %258 {strides = array<i32>} : memref<36x216xf32, #tpu.memory_space<vmem>>, vector<4x216xf32>,
    %c20_319 = arith.constant 20 : index
    %c36_320 = arith.constant 36 : index
    %260 = vector.load %arg9[%c20_319, %c36_320] : memref<32x254xf32, #tpu.memory_space<vmem>>, vector<4x216xf32>
    %c24_321 = arith.constant 24 : index
    %c0_322 = arith.constant 0 : index
    %261 = vector.load %arg10[%c24_321, %c0_322] : memref<36x216xf32, #tpu.memory_space<vmem>>, vector<4x216xf32>
    tpu.vector_store %arg10[%c24_321, %c0_322], %260 {strides = array<i32>} : memref<36x216xf32, #tpu.memory_space<vmem>>, vector<4x216xf32>,
    %c20_323 = arith.constant 20 : index
    %c37_324 = arith.constant 37 : index
    %262 = vector.load %arg9[%c20_323, %c37_324] : memref<32x254xf32, #tpu.memory_space<vmem>>, vector<4x216xf32>
    %c28_325 = arith.constant 28 : index
    %c0_326 = arith.constant 0 : index
    %263 = vector.load %arg10[%c28_325, %c0_326] : memref<36x216xf32, #tpu.memory_space<vmem>>, vector<4x216xf32>
    tpu.vector_store %arg10[%c28_325, %c0_326], %262 {strides = array<i32>} : memref<36x216xf32, #tpu.memory_space<vmem>>, vector<4x216xf32>,
    %c20_327 = arith.constant 20 : index
    %c38_328 = arith.constant 38 : index
    %264 = vector.load %arg9[%c20_327, %c38_328] : memref<32x254xf32, #tpu.memory_space<vmem>>, vector<4x216xf32>
    %c32_329 = arith.constant 32 : index
    %c0_330 = arith.constant 0 : index
    %265 = vector.load %arg10[%c32_329, %c0_330] : memref<36x216xf32, #tpu.memory_space<vmem>>, vector<4x216xf32>
    tpu.vector_store %arg10[%c32_329, %c0_330], %264 {strides = array<i32>} : memref<36x216xf32, #tpu.memory_space<vmem>>, vector<4x216xf32>,
    %c0_331 = arith.constant 0 : index
    %c0_332 = arith.constant 0 : index
    %266 = vector.load %arg1[%c0_331, %c0_332] : memref<12x36xf32, #tpu.memory_space<vmem>>, vector<12x36xf32>
    %c0_333 = arith.constant 0 : index
    %c0_334 = arith.constant 0 : index
    %267 = vector.load %arg10[%c0_333, %c0_334] : memref<36x216xf32, #tpu.memory_space<vmem>>, vector<36x216xf32>
    %cst_335 = arith.constant dense<0.000000e+00> : vector<12x216xf32>
    %268 = tpu.matmul %266, %267, %cst_335 {dimension_numbers = #tpu.dot_dimension_numbers<[1], [0], [0], [1], [0, 0, 1, 1], [], []>} : vector<12x36xf32>, vector<36x216xf32>, vector<12x216xf32> -> vector<12x216xf32>
    %cst_336 = arith.constant 2.000000e+01 : f32
    %269 = vector.broadcast %cst_336 : f32 to vector<12x216xf32>
    %270 = arith.cmpf oge, %268, %269 : vector<12x216xf32>
    %cst_337 = arith.constant 0.000000e+00 : f32
    %271 = vector.broadcast %cst_337 : f32 to vector<12x216xf32>
    %272 = arith.select %270, %268, %271 : vector<12x216xi1>, vector<12x216xf32>
    %273 = arith.extui %270 : vector<12x216xi1> to vector<12x216xi32>
    %274 = arith.sitofp %273 : vector<12x216xi32> to vector<12x216xf32>
    %c60 = arith.constant 60 : index
    %c0_338 = arith.constant 0 : index
    %275 = vector.load %arg4[%c60, %c0_338] : memref<96x216xf32, #tpu.memory_space<vmem>>, vector<12x216xf32>
    tpu.vector_store %arg4[%c60, %c0_338], %272 {strides = array<i32>} : memref<96x216xf32, #tpu.memory_space<vmem>>, vector<12x216xf32>,
    %c60_339 = arith.constant 60 : index
    %c0_340 = arith.constant 0 : index
    %276 = vector.load %arg5[%c60_339, %c0_340] : memref<96x216xf32, #tpu.memory_space<vmem>>, vector<12x216xf32>
    tpu.vector_store %arg5[%c60_339, %c0_340], %274 {strides = array<i32>} : memref<96x216xf32, #tpu.memory_space<vmem>>, vector<12x216xf32>,
    %277 = vector.broadcast %54 : vector<1x216xf32> to vector<12x216xf32>
    %278 = arith.mulf %274, %277 : vector<12x216xf32>
    %cst_341 = arith.constant 0.000000e+00 : f32
    %279 = vector.broadcast %cst_341 : f32 to vector<12x216xf32>
    %280 = arith.cmpf ogt, %278, %279 : vector<12x216xf32>
    %cst_342 = arith.constant 0.000000e+00 : f32
    %281 = vector.broadcast %cst_342 : f32 to vector<12x216xf32>
    %282 = arith.cmpf oeq, %247, %281 : vector<12x216xf32>
    %283 = arith.andi %280, %282 : vector<12x216xi1>
    %284 = arith.select %283, %268, %246 : vector<12x216xi1>, vector<12x216xf32>
    %285 = arith.addf %247, %278 : vector<12x216xf32>
    %c24_343 = arith.constant 24 : index
    %c0_344 = arith.constant 0 : index
    %286 = vector.load %arg9[%c24_343, %c0_344] : memref<32x254xf32, #tpu.memory_space<vmem>>, vector<4x216xf32>
    %c0_345 = arith.constant 0 : index
    %c0_346 = arith.constant 0 : index
    %287 = vector.load %arg10[%c0_345, %c0_346] : memref<36x216xf32, #tpu.memory_space<vmem>>, vector<4x216xf32>
    tpu.vector_store %arg10[%c0_345, %c0_346], %286 {strides = array<i32>} : memref<36x216xf32, #tpu.memory_space<vmem>>, vector<4x216xf32>,
    %c24_347 = arith.constant 24 : index
    %c1_348 = arith.constant 1 : index
    %288 = vector.load %arg9[%c24_347, %c1_348] : memref<32x254xf32, #tpu.memory_space<vmem>>, vector<4x216xf32>
    %c4_349 = arith.constant 4 : index
    %c0_350 = arith.constant 0 : index
    %289 = vector.load %arg10[%c4_349, %c0_350] : memref<36x216xf32, #tpu.memory_space<vmem>>, vector<4x216xf32>
    tpu.vector_store %arg10[%c4_349, %c0_350], %288 {strides = array<i32>} : memref<36x216xf32, #tpu.memory_space<vmem>>, vector<4x216xf32>,
    %c24_351 = arith.constant 24 : index
    %c2_352 = arith.constant 2 : index
    %290 = vector.load %arg9[%c24_351, %c2_352] : memref<32x254xf32, #tpu.memory_space<vmem>>, vector<4x216xf32>
    %c8_353 = arith.constant 8 : index
    %c0_354 = arith.constant 0 : index
    %291 = vector.load %arg10[%c8_353, %c0_354] : memref<36x216xf32, #tpu.memory_space<vmem>>, vector<4x216xf32>
    tpu.vector_store %arg10[%c8_353, %c0_354], %290 {strides = array<i32>} : memref<36x216xf32, #tpu.memory_space<vmem>>, vector<4x216xf32>,
    %c24_355 = arith.constant 24 : index
    %c18_356 = arith.constant 18 : index
    %292 = vector.load %arg9[%c24_355, %c18_356] : memref<32x254xf32, #tpu.memory_space<vmem>>, vector<4x216xf32>
    %c12_357 = arith.constant 12 : index
    %c0_358 = arith.constant 0 : index
    %293 = vector.load %arg10[%c12_357, %c0_358] : memref<36x216xf32, #tpu.memory_space<vmem>>, vector<4x216xf32>
    tpu.vector_store %arg10[%c12_357, %c0_358], %292 {strides = array<i32>} : memref<36x216xf32, #tpu.memory_space<vmem>>, vector<4x216xf32>,
    %c24_359 = arith.constant 24 : index
    %c19_360 = arith.constant 19 : index
    %294 = vector.load %arg9[%c24_359, %c19_360] : memref<32x254xf32, #tpu.memory_space<vmem>>, vector<4x216xf32>
    %c16_361 = arith.constant 16 : index
    %c0_362 = arith.constant 0 : index
    %295 = vector.load %arg10[%c16_361, %c0_362] : memref<36x216xf32, #tpu.memory_space<vmem>>, vector<4x216xf32>
    tpu.vector_store %arg10[%c16_361, %c0_362], %294 {strides = array<i32>} : memref<36x216xf32, #tpu.memory_space<vmem>>, vector<4x216xf32>,
    %c24_363 = arith.constant 24 : index
    %c20_364 = arith.constant 20 : index
    %296 = vector.load %arg9[%c24_363, %c20_364] : memref<32x254xf32, #tpu.memory_space<vmem>>, vector<4x216xf32>
    %c20_365 = arith.constant 20 : index
    %c0_366 = arith.constant 0 : index
    %297 = vector.load %arg10[%c20_365, %c0_366] : memref<36x216xf32, #tpu.memory_space<vmem>>, vector<4x216xf32>
    tpu.vector_store %arg10[%c20_365, %c0_366], %296 {strides = array<i32>} : memref<36x216xf32, #tpu.memory_space<vmem>>, vector<4x216xf32>,
    %c24_367 = arith.constant 24 : index
    %c36_368 = arith.constant 36 : index
    %298 = vector.load %arg9[%c24_367, %c36_368] : memref<32x254xf32, #tpu.memory_space<vmem>>, vector<4x216xf32>
    %c24_369 = arith.constant 24 : index
    %c0_370 = arith.constant 0 : index
    %299 = vector.load %arg10[%c24_369, %c0_370] : memref<36x216xf32, #tpu.memory_space<vmem>>, vector<4x216xf32>
    tpu.vector_store %arg10[%c24_369, %c0_370], %298 {strides = array<i32>} : memref<36x216xf32, #tpu.memory_space<vmem>>, vector<4x216xf32>,
    %c24_371 = arith.constant 24 : index
    %c37_372 = arith.constant 37 : index
    %300 = vector.load %arg9[%c24_371, %c37_372] : memref<32x254xf32, #tpu.memory_space<vmem>>, vector<4x216xf32>
    %c28_373 = arith.constant 28 : index
    %c0_374 = arith.constant 0 : index
    %301 = vector.load %arg10[%c28_373, %c0_374] : memref<36x216xf32, #tpu.memory_space<vmem>>, vector<4x216xf32>
    tpu.vector_store %arg10[%c28_373, %c0_374], %300 {strides = array<i32>} : memref<36x216xf32, #tpu.memory_space<vmem>>, vector<4x216xf32>,
    %c24_375 = arith.constant 24 : index
    %c38_376 = arith.constant 38 : index
    %302 = vector.load %arg9[%c24_375, %c38_376] : memref<32x254xf32, #tpu.memory_space<vmem>>, vector<4x216xf32>
    %c32_377 = arith.constant 32 : index
    %c0_378 = arith.constant 0 : index
    %303 = vector.load %arg10[%c32_377, %c0_378] : memref<36x216xf32, #tpu.memory_space<vmem>>, vector<4x216xf32>
    tpu.vector_store %arg10[%c32_377, %c0_378], %302 {strides = array<i32>} : memref<36x216xf32, #tpu.memory_space<vmem>>, vector<4x216xf32>,
    %c0_379 = arith.constant 0 : index
    %c0_380 = arith.constant 0 : index
    %304 = vector.load %arg1[%c0_379, %c0_380] : memref<12x36xf32, #tpu.memory_space<vmem>>, vector<12x36xf32>
    %c0_381 = arith.constant 0 : index
    %c0_382 = arith.constant 0 : index
    %305 = vector.load %arg10[%c0_381, %c0_382] : memref<36x216xf32, #tpu.memory_space<vmem>>, vector<36x216xf32>
    %cst_383 = arith.constant dense<0.000000e+00> : vector<12x216xf32>
    %306 = tpu.matmul %304, %305, %cst_383 {dimension_numbers = #tpu.dot_dimension_numbers<[1], [0], [0], [1], [0, 0, 1, 1], [], []>} : vector<12x36xf32>, vector<36x216xf32>, vector<12x216xf32> -> vector<12x216xf32>
    %cst_384 = arith.constant 2.000000e+01 : f32
    %307 = vector.broadcast %cst_384 : f32 to vector<12x216xf32>
    %308 = arith.cmpf oge, %306, %307 : vector<12x216xf32>
    %cst_385 = arith.constant 0.000000e+00 : f32
    %309 = vector.broadcast %cst_385 : f32 to vector<12x216xf32>
    %310 = arith.select %308, %306, %309 : vector<12x216xi1>, vector<12x216xf32>
    %311 = arith.extui %308 : vector<12x216xi1> to vector<12x216xi32>
    %312 = arith.sitofp %311 : vector<12x216xi32> to vector<12x216xf32>
    %c72_386 = arith.constant 72 : index
    %c0_387 = arith.constant 0 : index
    %313 = vector.load %arg4[%c72_386, %c0_387] : memref<96x216xf32, #tpu.memory_space<vmem>>, vector<12x216xf32>
    tpu.vector_store %arg4[%c72_386, %c0_387], %310 {strides = array<i32>} : memref<96x216xf32, #tpu.memory_space<vmem>>, vector<12x216xf32>,
    %c72_388 = arith.constant 72 : index
    %c0_389 = arith.constant 0 : index
    %314 = vector.load %arg5[%c72_388, %c0_389] : memref<96x216xf32, #tpu.memory_space<vmem>>, vector<12x216xf32>
    tpu.vector_store %arg5[%c72_388, %c0_389], %312 {strides = array<i32>} : memref<96x216xf32, #tpu.memory_space<vmem>>, vector<12x216xf32>,
    %315 = vector.broadcast %54 : vector<1x216xf32> to vector<12x216xf32>
    %316 = arith.mulf %312, %315 : vector<12x216xf32>
    %cst_390 = arith.constant 0.000000e+00 : f32
    %317 = vector.broadcast %cst_390 : f32 to vector<12x216xf32>
    %318 = arith.cmpf ogt, %316, %317 : vector<12x216xf32>
    %cst_391 = arith.constant 0.000000e+00 : f32
    %319 = vector.broadcast %cst_391 : f32 to vector<12x216xf32>
    %320 = arith.cmpf oeq, %285, %319 : vector<12x216xf32>
    %321 = arith.andi %318, %320 : vector<12x216xi1>
    %322 = arith.select %321, %306, %284 : vector<12x216xi1>, vector<12x216xf32>
    %323 = arith.addf %285, %316 : vector<12x216xf32>
    %c28_392 = arith.constant 28 : index
    %c0_393 = arith.constant 0 : index
    %324 = vector.load %arg9[%c28_392, %c0_393] : memref<32x254xf32, #tpu.memory_space<vmem>>, vector<4x216xf32>
    %c0_394 = arith.constant 0 : index
    %c0_395 = arith.constant 0 : index
    %325 = vector.load %arg10[%c0_394, %c0_395] : memref<36x216xf32, #tpu.memory_space<vmem>>, vector<4x216xf32>
    tpu.vector_store %arg10[%c0_394, %c0_395], %324 {strides = array<i32>} : memref<36x216xf32, #tpu.memory_space<vmem>>, vector<4x216xf32>,
    %c28_396 = arith.constant 28 : index
    %c1_397 = arith.constant 1 : index
    %326 = vector.load %arg9[%c28_396, %c1_397] : memref<32x254xf32, #tpu.memory_space<vmem>>, vector<4x216xf32>
    %c4_398 = arith.constant 4 : index
    %c0_399 = arith.constant 0 : index
    %327 = vector.load %arg10[%c4_398, %c0_399] : memref<36x216xf32, #tpu.memory_space<vmem>>, vector<4x216xf32>
    tpu.vector_store %arg10[%c4_398, %c0_399], %326 {strides = array<i32>} : memref<36x216xf32, #tpu.memory_space<vmem>>, vector<4x216xf32>,
    %c28_400 = arith.constant 28 : index
    %c2_401 = arith.constant 2 : index
    %328 = vector.load %arg9[%c28_400, %c2_401] : memref<32x254xf32, #tpu.memory_space<vmem>>, vector<4x216xf32>
    %c8_402 = arith.constant 8 : index
    %c0_403 = arith.constant 0 : index
    %329 = vector.load %arg10[%c8_402, %c0_403] : memref<36x216xf32, #tpu.memory_space<vmem>>, vector<4x216xf32>
    tpu.vector_store %arg10[%c8_402, %c0_403], %328 {strides = array<i32>} : memref<36x216xf32, #tpu.memory_space<vmem>>, vector<4x216xf32>,
    %c28_404 = arith.constant 28 : index
    %c18_405 = arith.constant 18 : index
    %330 = vector.load %arg9[%c28_404, %c18_405] : memref<32x254xf32, #tpu.memory_space<vmem>>, vector<4x216xf32>
    %c12_406 = arith.constant 12 : index
    %c0_407 = arith.constant 0 : index
    %331 = vector.load %arg10[%c12_406, %c0_407] : memref<36x216xf32, #tpu.memory_space<vmem>>, vector<4x216xf32>
    tpu.vector_store %arg10[%c12_406, %c0_407], %330 {strides = array<i32>} : memref<36x216xf32, #tpu.memory_space<vmem>>, vector<4x216xf32>,
    %c28_408 = arith.constant 28 : index
    %c19_409 = arith.constant 19 : index
    %332 = vector.load %arg9[%c28_408, %c19_409] : memref<32x254xf32, #tpu.memory_space<vmem>>, vector<4x216xf32>
    %c16_410 = arith.constant 16 : index
    %c0_411 = arith.constant 0 : index
    %333 = vector.load %arg10[%c16_410, %c0_411] : memref<36x216xf32, #tpu.memory_space<vmem>>, vector<4x216xf32>
    tpu.vector_store %arg10[%c16_410, %c0_411], %332 {strides = array<i32>} : memref<36x216xf32, #tpu.memory_space<vmem>>, vector<4x216xf32>,
    %c28_412 = arith.constant 28 : index
    %c20_413 = arith.constant 20 : index
    %334 = vector.load %arg9[%c28_412, %c20_413] : memref<32x254xf32, #tpu.memory_space<vmem>>, vector<4x216xf32>
    %c20_414 = arith.constant 20 : index
    %c0_415 = arith.constant 0 : index
    %335 = vector.load %arg10[%c20_414, %c0_415] : memref<36x216xf32, #tpu.memory_space<vmem>>, vector<4x216xf32>
    tpu.vector_store %arg10[%c20_414, %c0_415], %334 {strides = array<i32>} : memref<36x216xf32, #tpu.memory_space<vmem>>, vector<4x216xf32>,
    %c28_416 = arith.constant 28 : index
    %c36_417 = arith.constant 36 : index
    %336 = vector.load %arg9[%c28_416, %c36_417] : memref<32x254xf32, #tpu.memory_space<vmem>>, vector<4x216xf32>
    %c24_418 = arith.constant 24 : index
    %c0_419 = arith.constant 0 : index
    %337 = vector.load %arg10[%c24_418, %c0_419] : memref<36x216xf32, #tpu.memory_space<vmem>>, vector<4x216xf32>
    tpu.vector_store %arg10[%c24_418, %c0_419], %336 {strides = array<i32>} : memref<36x216xf32, #tpu.memory_space<vmem>>, vector<4x216xf32>,
    %c28_420 = arith.constant 28 : index
    %c37_421 = arith.constant 37 : index
    %338 = vector.load %arg9[%c28_420, %c37_421] : memref<32x254xf32, #tpu.memory_space<vmem>>, vector<4x216xf32>
    %c28_422 = arith.constant 28 : index
    %c0_423 = arith.constant 0 : index
    %339 = vector.load %arg10[%c28_422, %c0_423] : memref<36x216xf32, #tpu.memory_space<vmem>>, vector<4x216xf32>
    tpu.vector_store %arg10[%c28_422, %c0_423], %338 {strides = array<i32>} : memref<36x216xf32, #tpu.memory_space<vmem>>, vector<4x216xf32>,
    %c28_424 = arith.constant 28 : index
    %c38_425 = arith.constant 38 : index
    %340 = vector.load %arg9[%c28_424, %c38_425] : memref<32x254xf32, #tpu.memory_space<vmem>>, vector<4x216xf32>
    %c32_426 = arith.constant 32 : index
    %c0_427 = arith.constant 0 : index
    %341 = vector.load %arg10[%c32_426, %c0_427] : memref<36x216xf32, #tpu.memory_space<vmem>>, vector<4x216xf32>
    tpu.vector_store %arg10[%c32_426, %c0_427], %340 {strides = array<i32>} : memref<36x216xf32, #tpu.memory_space<vmem>>, vector<4x216xf32>,
    %c0_428 = arith.constant 0 : index
    %c0_429 = arith.constant 0 : index
    %342 = vector.load %arg1[%c0_428, %c0_429] : memref<12x36xf32, #tpu.memory_space<vmem>>, vector<12x36xf32>
    %c0_430 = arith.constant 0 : index
    %c0_431 = arith.constant 0 : index
    %343 = vector.load %arg10[%c0_430, %c0_431] : memref<36x216xf32, #tpu.memory_space<vmem>>, vector<36x216xf32>
    %cst_432 = arith.constant dense<0.000000e+00> : vector<12x216xf32>
    %344 = tpu.matmul %342, %343, %cst_432 {dimension_numbers = #tpu.dot_dimension_numbers<[1], [0], [0], [1], [0, 0, 1, 1], [], []>} : vector<12x36xf32>, vector<36x216xf32>, vector<12x216xf32> -> vector<12x216xf32>
    %cst_433 = arith.constant 2.000000e+01 : f32
    %345 = vector.broadcast %cst_433 : f32 to vector<12x216xf32>
    %346 = arith.cmpf oge, %344, %345 : vector<12x216xf32>
    %cst_434 = arith.constant 0.000000e+00 : f32
    %347 = vector.broadcast %cst_434 : f32 to vector<12x216xf32>
    %348 = arith.select %346, %344, %347 : vector<12x216xi1>, vector<12x216xf32>
    %349 = arith.extui %346 : vector<12x216xi1> to vector<12x216xi32>
    %350 = arith.sitofp %349 : vector<12x216xi32> to vector<12x216xf32>
    %c84 = arith.constant 84 : index
    %c0_435 = arith.constant 0 : index
    %351 = vector.load %arg4[%c84, %c0_435] : memref<96x216xf32, #tpu.memory_space<vmem>>, vector<12x216xf32>
    tpu.vector_store %arg4[%c84, %c0_435], %348 {strides = array<i32>} : memref<96x216xf32, #tpu.memory_space<vmem>>, vector<12x216xf32>,
    %c84_436 = arith.constant 84 : index
    %c0_437 = arith.constant 0 : index
    %352 = vector.load %arg5[%c84_436, %c0_437] : memref<96x216xf32, #tpu.memory_space<vmem>>, vector<12x216xf32>
    tpu.vector_store %arg5[%c84_436, %c0_437], %350 {strides = array<i32>} : memref<96x216xf32, #tpu.memory_space<vmem>>, vector<12x216xf32>,
    %353 = vector.broadcast %54 : vector<1x216xf32> to vector<12x216xf32>
    %354 = arith.mulf %350, %353 : vector<12x216xf32>
    %cst_438 = arith.constant 0.000000e+00 : f32
    %355 = vector.broadcast %cst_438 : f32 to vector<12x216xf32>
    %356 = arith.cmpf ogt, %354, %355 : vector<12x216xf32>
    %cst_439 = arith.constant 0.000000e+00 : f32
    %357 = vector.broadcast %cst_439 : f32 to vector<12x216xf32>
    %358 = arith.cmpf oeq, %323, %357 : vector<12x216xf32>
    %359 = arith.andi %356, %358 : vector<12x216xi1>
    %360 = arith.select %359, %344, %322 : vector<12x216xi1>, vector<12x216xf32>
    %361 = arith.addf %323, %354 : vector<12x216xf32>
    %cst_440 = arith.constant 0.000000e+00 : f32
    %362 = vector.broadcast %cst_440 : f32 to vector<12x216xf32>
    %363 = arith.cmpf ogt, %361, %362 : vector<12x216xf32>
    %cst_441 = arith.constant 0.000000e+00 : f32
    %364 = vector.broadcast %cst_441 : f32 to vector<12x216xf32>
    %365 = arith.select %363, %360, %364 : vector<12x216xi1>, vector<12x216xf32>
    %cst_442 = arith.constant dense<0xFF800000> : vector<12xf32>
    %366 = vector.multi_reduction <maximumf>, %365, %cst_442 [1] : vector<12x216xf32> to vector<12xf32>
    %367 = vector.shape_cast %366 : vector<12xf32> to vector<12x1xf32>
    %cst_443 = arith.constant dense<0xFF800000> : vector<1xf32>
    %368 = vector.multi_reduction <maximumf>, %367, %cst_443 [0] : vector<12x1xf32> to vector<1xf32>
    %369 = vector.shape_cast %368 : vector<1xf32> to vector<1x1xf32>
    %cst_444 = arith.constant 8.000000e+00 : f32
    %370 = vector.broadcast %cst_444 : f32 to vector<1x1xf32>
    %371 = arith.mulf %369, %370 : vector<1x1xf32>
    %372 = vector.broadcast %371 : vector<1x1xf32> to vector<12x216xf32>
    %373 = arith.addf %365, %372 : vector<12x216xf32>
    %374 = arith.mulf %361, %373 : vector<12x216xf32>
    %cst_445 = arith.constant dense<0xFF800000> : vector<12xf32>
    %375 = vector.multi_reduction <maximumf>, %374, %cst_445 [1] : vector<12x216xf32> to vector<12xf32>
    %376 = vector.shape_cast %375 : vector<12xf32> to vector<12x1xf32>
    %cst_446 = arith.constant dense<0xFF800000> : vector<1xf32>
    %377 = vector.multi_reduction <maximumf>, %376, %cst_446 [0] : vector<12x1xf32> to vector<1xf32>
    %378 = vector.shape_cast %377 : vector<1xf32> to vector<1x1xf32>
    %379 = vector.broadcast %378 : vector<1x1xf32> to vector<12x216xf32>
    %380 = arith.cmpf oeq, %374, %379 : vector<12x216xf32>
    %c1073741824_i32 = arith.constant 1073741824 : i32
    %381 = vector.broadcast %c1073741824_i32 : i32 to vector<12x216xi32>
    %382 = arith.select %380, %55, %381 : vector<12x216xi1>, vector<12x216xi32>
    %cst_447 = arith.constant dense<2147483647> : vector<12xi32>
    %383 = vector.multi_reduction <minsi>, %382, %cst_447 [1] : vector<12x216xi32> to vector<12xi32>
    %384 = vector.shape_cast %383 : vector<12xi32> to vector<12x1xi32>
    %cst_448 = arith.constant dense<2147483647> : vector<1xi32>
    %385 = vector.multi_reduction <minsi>, %384, %cst_448 [0] : vector<12x1xi32> to vector<1xi32>
    %386 = vector.shape_cast %385 : vector<1xi32> to vector<1x1xi32>
    %cst_449 = arith.constant 0.000000e+00 : f32
    %387 = vector.broadcast %cst_449 : f32 to vector<1x1xf32>
    %388 = arith.cmpf one, %378, %387 : vector<1x1xf32>
    %c24_i32 = arith.constant 24 : i32
    %389 = vector.broadcast %c24_i32 : i32 to vector<1x1xi32>
    %390 = arith.shrsi %386, %389 : vector<1x1xi32>
    %c16_i32 = arith.constant 16 : i32
    %391 = vector.broadcast %c16_i32 : i32 to vector<1x1xi32>
    %392 = arith.shrsi %386, %391 : vector<1x1xi32>
    %c255_i32 = arith.constant 255 : i32
    %393 = vector.broadcast %c255_i32 : i32 to vector<1x1xi32>
    %394 = arith.andi %392, %393 : vector<1x1xi32>
    %c8_i32 = arith.constant 8 : i32
    %395 = vector.broadcast %c8_i32 : i32 to vector<1x1xi32>
    %396 = arith.shrsi %386, %395 : vector<1x1xi32>
    %c255_i32_450 = arith.constant 255 : i32
    %397 = vector.broadcast %c255_i32_450 : i32 to vector<1x1xi32>
    %398 = arith.andi %396, %397 : vector<1x1xi32>
    %c255_i32_451 = arith.constant 255 : i32
    %399 = vector.broadcast %c255_i32_451 : i32 to vector<1x1xi32>
    %400 = arith.andi %386, %399 : vector<1x1xi32>
    %c-1_i32 = arith.constant -1 : i32
    %401 = vector.broadcast %c-1_i32 : i32 to vector<1x1xi32>
    %402 = arith.select %388, %390, %401 : vector<1x1xi1>, vector<1x1xi32>
    %c0_452 = arith.constant 0 : index
    %c0_453 = arith.constant 0 : index
    %403 = vector.load %arg6[%c0_452, %c0_453] : memref<1x4xi32, #tpu.memory_space<vmem>>, vector<1x1xi32>
    tpu.vector_store %arg6[%c0_452, %c0_453], %402 {strides = array<i32>} : memref<1x4xi32, #tpu.memory_space<vmem>>, vector<1x1xi32>,
    %404 = arith.select %388, %394, %401 : vector<1x1xi1>, vector<1x1xi32>
    %c0_454 = arith.constant 0 : index
    %c1_455 = arith.constant 1 : index
    %405 = vector.load %arg6[%c0_454, %c1_455] : memref<1x4xi32, #tpu.memory_space<vmem>>, vector<1x1xi32>
    tpu.vector_store %arg6[%c0_454, %c1_455], %404 {strides = array<i32>} : memref<1x4xi32, #tpu.memory_space<vmem>>, vector<1x1xi32>,
    %406 = arith.select %388, %398, %401 : vector<1x1xi1>, vector<1x1xi32>
    %c0_456 = arith.constant 0 : index
    %c2_457 = arith.constant 2 : index
    %407 = vector.load %arg6[%c0_456, %c2_457] : memref<1x4xi32, #tpu.memory_space<vmem>>, vector<1x1xi32>
    tpu.vector_store %arg6[%c0_456, %c2_457], %406 {strides = array<i32>} : memref<1x4xi32, #tpu.memory_space<vmem>>, vector<1x1xi32>,
    %408 = arith.select %388, %400, %401 : vector<1x1xi1>, vector<1x1xi32>
    %c0_458 = arith.constant 0 : index
    %c3_459 = arith.constant 3 : index
    %409 = vector.load %arg6[%c0_458, %c3_459] : memref<1x4xi32, #tpu.memory_space<vmem>>, vector<1x1xi32>
    tpu.vector_store %arg6[%c0_458, %c3_459], %408 {strides = array<i32>} : memref<1x4xi32, #tpu.memory_space<vmem>>, vector<1x1xi32>,
    return
  }
}

</mosaic_0001>

<bundles_post_ra>
// kernel: tpu_custom_call.1
= control target key start
LH: loop header
LB: loop body
LE: loop exit
PB: predicated region body
PF: predicated region fallthrough
CT: control target
= control target key end

     0   :  { %12 = vsyncpa [#allocation7], 0  ;;  %s4968_s0 = inlined_call_operand.hbm [shape: f32[32,256], index: 0, kind: input, shape index: {}]   ;;  %s4969_s1 = inlined_call_operand.hbm [shape: f32[12,36], index: 1, kind: input, shape index: {}]   ;;  %s4970_s2 = inlined_call_operand.hbm [shape: s32[12,216], index: 2, kind: input, shape index: {}]   ;;  %s4971_s3 = inlined_call_operand.vmem [shape: f32[1,216], index: 3, kind: input, shape index: {}]   ;;  %s4972_s4 = inlined_call_operand.hbm [shape: f32[96,216], index: 4, kind: output, shape index: {0}]   ;;  %s4973_s5 = inlined_call_operand.hbm [shape: f32[96,216], index: 5, kind: output, shape index: {1}]   ;;  %s4974_s6 = inlined_call_operand.hbm [shape: s32[1,4], index: 6, kind: output, shape index: {2}]  }
   0x1   :  { %13 = vsyncpa [#allocation10], 0 }
   0x2   :  { %14 = vsyncpa [#allocation8], 0 }
   0x3   :  { %15 = vsyncpa [#allocation14], 0  ;;  %s3661_s21 = smov [#allocation9]  }
   0x4   :  { %s33_s22 = sshll.u32 %s3661_s21, 4  ;;  %s34_s22 = int_to_ptr.vmem [resolvable:$true] %s33_s22 }
   0x5   :  { %s3541_s23 = scalar_lea.vmem %s34_s22, 256  ;;  %p3546_p1 = scmp.lt.s32.totalorder %s34_s22, %s34_s22 }
   0x6   :  { %p3542_p0 = scmp.ne.s32.totalorder %s34_s22, %s3541_s23  ;;  %p3547_p2 = scmp.lt.s32.totalorder %s3541_s23, %s3541_s23 }
   0x8   :  { %p3548_p3 = por %p3547_p2, %p3546_p1 }
   0xa   :  { %p3549_p4 = pnand %p3548_p3, %p3542_p0 }
   0xc   :  { %3552 = shalt.err (!%p3549_p4)
}
   0xd   :  { %s3662_s24 = smov 128   ;;  %s3663_s25 = smov 8  }
   0xe   :  { %39 = dma.hbm_to_vmem [thread:$0]  %s4969_s1, 256, %s34_s22, [#allocation10], %s3662_s24, %s3662_s24, %s3663_s25  }
   0xf   :  { %s3664_s28 = smov [#allocation6]  }
  0x10   :  { %s21_s29 = sshll.u32 %s3664_s28, 4  ;;  %s22_s29 = int_to_ptr.vmem [resolvable:$true] %s21_s29 }
  0x11   :  { %s3561_s30 = scalar_lea.vmem %s22_s29, 1024  ;;  %p3566_p6 = scmp.lt.s32.totalorder %s22_s29, %s22_s29 }
  0x12   :  { %p3562_p5 = scmp.ne.s32.totalorder %s22_s29, %s3561_s30  ;;  %p3567_p7 = scmp.lt.s32.totalorder %s3561_s30, %s3561_s30 }
  0x14   :  { %p3568_p8 = por %p3567_p7, %p3566_p6 }
  0x16   :  { %p3569_p9 = pnand %p3568_p8, %p3562_p5 }
  0x18   :  { %3572 = shalt.err (!%p3569_p9)
}
  0x19   :  { %s3665_s7 = smov 256   ;;  %s3666_s8 = smov 16  }
  0x1a   :  { %27 = dma.hbm_to_vmem [thread:$0]  %s4968_s0, 1024, %s22_s29, [#allocation7], %s3665_s7, %s3665_s7, %s3666_s8  }
  0x1b   :  { %s3667_s1 = smov [#allocation11]  }
  0x1c   :  { %s45_s11 = sshll.u32 %s3667_s1, 4  ;;  %s46_s11 = int_to_ptr.vmem [resolvable:$true] %s45_s11 }
  0x1d   :  { %s3581_s12 = scalar_lea.vmem %s46_s11, 512  ;;  %p3586_p11 = scmp.lt.s32.totalorder %s46_s11, %s46_s11 }
  0x1e   :  { %p3582_p10 = scmp.ne.s32.totalorder %s46_s11, %s3581_s12  ;;  %p3587_p12 = scmp.lt.s32.totalorder %s3581_s12, %s3581_s12 }
  0x20   :  { %p3588_p13 = por %p3587_p12, %p3586_p11 }
  0x22   :  { %p3589_p0 = pnand %p3588_p13, %p3582_p10 }
  0x24   :  { %3592 = shalt.err (!%p3589_p0)
}
  0x25   :  { %51 = dma.hbm_to_vmem [thread:$0]  %s4970_s2, 512, %s46_s11, [#allocation10], %s3665_s7, %s3665_s7, %s3666_s8  }
  0x26   :  { %3653 = dma.done.wait [#allocation7], 1024  }
  0x27   :  { %3654 = vsyncadd [#allocation7], 4294966272 }
  0x28   :  { %3655 = dma.done.wait [#allocation10], 768  }
  0x29   :  { %3656 = vsyncadd [#allocation10], 4294966528  ;;  %v3668_v0 = vmov -1e+30   ;;  %v256_v1 = vld [vmem:[#allocation6] sm:$0xff]  ;;  %s3669_s0 = smov 33  }
  0x2a   :  { %64 = vst [vmem:[#allocation2 + $0x8] sm:$0xff] %v3668_v0  ;;  %63 = vst [vmem:[#allocation2] sm:$0xff] %v3668_v0  ;;  %264 = vrot.lane.b32.xlu1 %v256_v1, %s3669_s0  ;;  %s3670_s15 = smov 31   ;;  %vm4975_vm0 = vcmask 605184   ;;  %s3671_s2 = smov 21   ;;  %v281_v2 = vld [vmem:[#allocation6 + $0x8] sm:$0xff] }
  0x2b   :  { %67 = vst [vmem:[#allocation2 + $0x18] sm:$0xff] %v3668_v0  ;;  %68 = vst [vmem:[#allocation2 + $0x20] sm:$0xff] %v3668_v0  ;;  %234 = vrot.lane.b32.xlu0 %v256_v1, %s3670_s15  ;;  %s3672_s16 = smov 19   ;;  %s3673_s17 = smov 23   ;;  %v77_v3 = vld [vmem:[#allocation6 + $0x10] sm:$0xff]  ;;  %v282_v4 = vld [vmem:[#allocation6 + $0x18] sm:$0xff] }
  0x2c   :  { %70 = vst [vmem:[#allocation2 + $0x30] sm:$0xff] %v3668_v0  ;;  %71 = vst [vmem:[#allocation2 + $0x38] sm:$0xff] %v3668_v0  ;;  %s3674_s18 = smov 35   ;;  %s3675_s19 = smov 25   ;;  %v78_v5 = vld [vmem:[#allocation6 + $0x20] sm:$0xff]  ;;  %v283_v6 = vld [vmem:[#allocation6 + $0x28] sm:$0xff] }
  0x2d   :  { %73 = vst [vmem:[#allocation2 + $0x48] sm:$0xff] %v3668_v0  ;;  %74 = vst [vmem:[#allocation2 + $0x50] sm:$0xff] %v3668_v0  ;;  %s3676_s20 = smov 37   ;;  %s3677_s21 = smov 27   ;;  %v79_v7 = vld [vmem:[#allocation6 + $0x30] sm:$0xff]  ;;  %v284_v8 = vld [vmem:[#allocation6 + $0x38] sm:$0xff] }
  0x2e   :  { %109 = vrot.lane.b32.xlu1 %v256_v1, %s3671_s2  ;;  %66 = vst.msk [vmem:[#allocation2 + $0x10] sm:$0xff] %vm4975_vm0, %v3668_v0  ;;  %69 = vst.msk [vmem:[#allocation2 + $0x28] sm:$0xff] %vm4975_vm0, %v3668_v0  ;;  %s3678_s22 = smov 39   ;;  %s3679_s23 = smov 45   ;;  %vm248_vm1 = vcmask 121856   ;;  %vm276_vm2 = vcmask 269448  }
  0x2f   :  { %84 = vrot.lane.b32.xlu0 %v256_v1, %s3672_s16  ;;  %72 = vst.msk [vmem:[#allocation2 + $0x40] sm:$0xff] %vm4975_vm0, %v3668_v0  ;;  %75 = vst.msk [vmem:[#allocation2 + $0x58] sm:$0xff] %vm4975_vm0, %v3668_v0  ;;  %s3680_s24 = smov 41   ;;  %s3681_s25 = smov 43   ;;  %vm96_vm3 = vcmask 285848   ;;  %vm121_vm4 = vcmask 433448  }
  0x30   :  { %s3682_s26 = smov 29   ;;  %s3683_s27 = smov 49   ;;  %vm4979_vm5 = vcmask 581048   ;;  %vm4978_vm6 = vcmask 417048   ;;  %vm171_vm7 = vcmask 728648   ;;  %vm326_vm8 = vcmask 564648  }
  0x31   :  { %s3684_s28 = smov 47   ;;  %vm4977_vm9 = vcmask 876248   ;;  %vm4976_vm10 = vcmask 712248   ;;  %vm428_vm11 = vcmask 105472   ;;  %vm376_vm12 = vcmask 859848   ;;  %s3685_s29 = smov 126  }
  0x32   :  { %134 = vrot.lane.b32.xlu1 %v256_v1, %s3673_s17  ;;  %vm401_vm13 = vcmask 1007448   ;;  %vm221_vm14 = vcmask 1023848   ;;  %vm426_vm15 = vcmask 1048552   ;;  %vm246_vm0 = vcmask 1048568   ;;  %s3686_s30 = smov 127   ;;  %s3687_s9 = smov 125  }
  0x33   :  { %289 = vrot.lane.b32.xlu0 %v281_v2, %s3674_s18  ;;  %s3688_s10 = smov 124   ;;  %s3689_s1 = smov 92  }
  0x34   :  { %s3690_s11 = smov 110   ;;  %s3691_s12 = smov 56  }
  0x35   :  { %s3692_s13 = smov 74   ;;  %s3693_s14 = smov 90  }
  0x36   :  { %159 = vrot.lane.b32.xlu1 %v256_v1, %s3675_s19 }
  0x37   :  { %314 = vrot.lane.b32.xlu0 %v281_v2, %s3676_s20 }
  0x3a   :  { %184 = vrot.lane.b32.xlu1 %v256_v1, %s3677_s21 }
  0x3b   :  { %339 = vrot.lane.b32.xlu0 %v281_v2, %s3678_s22 }
  0x3e   :  { %414 = vrot.lane.b32.xlu1 %v281_v2, %s3679_s23 }
  0x3f   :  { %364 = vrot.lane.b32.xlu0 %v281_v2, %s3680_s24 }
  0x42   :  { %389 = vrot.lane.b32.xlu1 %v281_v2, %s3681_s25 }
  0x43   :  { %209 = vrot.lane.b32.xlu0 %v256_v1, %s3682_s26 }
  0x46   :  { %469 = vrot.lane.b32.xlu1 %v281_v2, %s3683_s27 }
  0x47   :  { %444 = vrot.lane.b32.xlu0 %v281_v2, %s3684_s28 }
  0x4a   :  { %86 = vrot.lane.b32.xlu1 %v77_v3, %s3672_s16 }
  0x4b   :  { %236 = vrot.lane.b32.xlu0 %v77_v3, %s3670_s15 }
  0x4e   :  { %111 = vrot.lane.b32.xlu1 %v77_v3, %s3671_s2 }
  0x4f   :  { %266 = vrot.lane.b32.xlu0 %v77_v3, %s3669_s0 }
  0x52   :  { %136 = vrot.lane.b32.xlu1 %v77_v3, %s3673_s17 }
  0x53   :  { %291 = vrot.lane.b32.xlu0 %v282_v4, %s3674_s18 }
  0x56   :  { %161 = vrot.lane.b32.xlu1 %v77_v3, %s3675_s19 }
  0x57   :  { %316 = vrot.lane.b32.xlu0 %v282_v4, %s3676_s20 }
  0x5a   :  { %186 = vrot.lane.b32.xlu1 %v77_v3, %s3677_s21 }
  0x5b   :  { %341 = vrot.lane.b32.xlu0 %v282_v4, %s3678_s22 }
  0x5e   :  { %416 = vrot.lane.b32.xlu1 %v282_v4, %s3679_s23 }
  0x5f   :  { %366 = vrot.lane.b32.xlu0 %v282_v4, %s3680_s24 }
  0x62   :  { %391 = vrot.lane.b32.xlu1 %v282_v4, %s3681_s25 }
  0x63   :  { %211 = vrot.lane.b32.xlu0 %v77_v3, %s3682_s26 }
  0x66   :  { %471 = vrot.lane.b32.xlu1 %v282_v4, %s3683_s27 }
  0x67   :  { %446 = vrot.lane.b32.xlu0 %v282_v4, %s3684_s28 }
  0x6a   :  { %88 = vrot.lane.b32.xlu1 %v78_v5, %s3672_s16 }
  0x6b   :  { %238 = vrot.lane.b32.xlu0 %v78_v5, %s3670_s15 }
  0x6e   :  { %113 = vrot.lane.b32.xlu1 %v78_v5, %s3671_s2 }
  0x6f   :  { %268 = vrot.lane.b32.xlu0 %v78_v5, %s3669_s0 }
  0x72   :  { %138 = vrot.lane.b32.xlu1 %v78_v5, %s3673_s17 }
  0x73   :  { %293 = vrot.lane.b32.xlu0 %v283_v6, %s3674_s18 }
  0x76   :  { %163 = vrot.lane.b32.xlu1 %v78_v5, %s3675_s19 }
  0x77   :  { %318 = vrot.lane.b32.xlu0 %v283_v6, %s3676_s20 }
  0x7a   :  { %188 = vrot.lane.b32.xlu1 %v78_v5, %s3677_s21 }
  0x7b   :  { %343 = vrot.lane.b32.xlu0 %v283_v6, %s3678_s22 }
  0x7e   :  { %418 = vrot.lane.b32.xlu1 %v283_v6, %s3679_s23 }
  0x7f   :  { %368 = vrot.lane.b32.xlu0 %v283_v6, %s3680_s24 }
  0x82   :  { %393 = vrot.lane.b32.xlu1 %v283_v6, %s3681_s25 }
  0x83   :  { %213 = vrot.lane.b32.xlu0 %v78_v5, %s3682_s26 }
  0x86   :  { %473 = vrot.lane.b32.xlu1 %v283_v6, %s3683_s27 }
  0x87   :  { %448 = vrot.lane.b32.xlu0 %v283_v6, %s3684_s28 }
  0x8a   :  { %90 = vrot.lane.b32.xlu1 %v79_v7, %s3672_s16 }
  0x8b   :  { %240 = vrot.lane.b32.xlu0 %v79_v7, %s3670_s15  ;;  %s3695_s15 = smov 91  }
  0x8e   :  { %115 = vrot.lane.b32.xlu1 %v79_v7, %s3671_s2  ;;  %s3696_s2 = smov 108  }
  0x8f   :  { %270 = vrot.lane.b32.xlu0 %v79_v7, %s3669_s0  ;;  %s3694_s0 = smov 109  }
  0x92   :  { %140 = vrot.lane.b32.xlu1 %v79_v7, %s3673_s17 }
  0x93   :  { %295 = vrot.lane.b32.xlu0 %v284_v8, %s3674_s18 }
  0x96   :  { %165 = vrot.lane.b32.xlu1 %v79_v7, %s3675_s19  ;;  %s3699_s19 = smov [#allocation12]  }
  0x97   :  { %320 = vrot.lane.b32.xlu0 %v284_v8, %s3676_s20  ;;  %s3386_s20 = sshll.u32 %s3699_s19, 4  ;;  %s3387_s20 = int_to_ptr.vmem [resolvable:$true] %s3386_s20 }
  0x9a   :  { %190 = vrot.lane.b32.xlu1 %v79_v7, %s3677_s21 }
  0x9b   :  { %345 = vrot.lane.b32.xlu0 %v284_v8, %s3678_s22 }
  0x9c   :  { %v265_v9 = vpop.permute.xlu1 %264 }
  0x9d   :  { %v235_v10 = vpop.permute.xlu0 %234 }
  0x9e   :  { %249 = vst.msk [vmem:[#allocation2 + $0x8] sm:$0xff] %vm248_vm1, %v235_v10  ;;  %420 = vrot.lane.b32.xlu1 %v284_v8, %s3679_s23 }
  0x9f   :  { %370 = vrot.lane.b32.xlu0 %v284_v8, %s3680_s24  ;;  %277 = vst.msk [vmem:[#allocation2 + $0x8] sm:$0xff] %vm276_vm2, %v265_v9 }
  0xa0   :  { %v110_v11 = vpop.permute.xlu1 %109 }
  0xa1   :  { %v85_v12 = vpop.permute.xlu0 %84 }
  0xa2   :  { %97 = vst.msk [vmem:[#allocation2] sm:$0xff] %vm96_vm3, %v85_v12  ;;  %395 = vrot.lane.b32.xlu1 %v284_v8, %s3681_s25 }
  0xa3   :  { %215 = vrot.lane.b32.xlu0 %v79_v7, %s3682_s26  ;;  %122 = vst.msk [vmem:[#allocation2] sm:$0xff] %vm121_vm4, %v110_v11 }
  0xa4   :  { %v135_v13 = vpop.permute.xlu1 %134 }
  0xa5   :  { %v290_v14 = vpop.permute.xlu0 %289  ;;  %147 = vst.msk [vmem:[#allocation2] sm:$0xff] %vm4979_vm5, %v135_v13 }
  0xa6   :  { %302 = vst.msk [vmem:[#allocation2 + $0x8] sm:$0xff] %vm4978_vm6, %v290_v14  ;;  %475 = vrot.lane.b32.xlu1 %v284_v8, %s3683_s27 }
  0xa7   :  { %450 = vrot.lane.b32.xlu0 %v284_v8, %s3684_s28 }
  0xa8   :  { %v160_v15 = vpop.permute.xlu1 %159 }
  0xa9   :  { %v315_v16 = vpop.permute.xlu0 %314  ;;  %172 = vst.msk [vmem:[#allocation2] sm:$0xff] %vm171_vm7, %v160_v15 }
  0xaa   :  { %327 = vst.msk [vmem:[#allocation2 + $0x8] sm:$0xff] %vm326_vm8, %v315_v16 }
  0xac   :  { %v185_v17 = vpop.permute.xlu1 %184 }
  0xad   :  { %v340_v18 = vpop.permute.xlu0 %339  ;;  %197 = vst.msk [vmem:[#allocation2] sm:$0xff] %vm4977_vm9, %v185_v17  ;;  %vm481_vm9 = vcmask 400648  }
  0xae   :  { %352 = vst.msk [vmem:[#allocation2 + $0x8] sm:$0xff] %vm4976_vm10, %v340_v18  ;;  %vm456_vm10 = vcmask 253048  }
  0xb0   :  { %v415_v19 = vpop.permute.xlu1 %414 }
  0xb1   :  { %v365_v20 = vpop.permute.xlu0 %364  ;;  %429 = vst.msk [vmem:[#allocation2 + $0x10] sm:$0xff] %vm428_vm11, %v415_v19 }
  0xb2   :  { %377 = vst.msk [vmem:[#allocation2 + $0x8] sm:$0xff] %vm376_vm12, %v365_v20 }
  0xb4   :  { %v390_v21 = vpop.permute.xlu1 %389 }
  0xb5   :  { %v210_v22 = vpop.permute.xlu0 %209  ;;  %402 = vst.msk [vmem:[#allocation2 + $0x8] sm:$0xff] %vm401_vm13, %v390_v21 }
  0xb6   :  { %222 = vst.msk [vmem:[#allocation2] sm:$0xff] %vm221_vm14, %v210_v22 }
  0xb7   :  { %427 = vst.msk [vmem:[#allocation2 + $0x8] sm:$0xff] %vm426_vm15, %v415_v19 }
  0xb8   :  { %247 = vst.msk [vmem:[#allocation2] sm:$0xff] %vm246_vm0, %v235_v10  ;;  %v470_v23 = vpop.permute.xlu1 %469 }
  0xb9   :  { %v445_v24 = vpop.permute.xlu0 %444 }
  0xba   :  { %457 = vst.msk [vmem:[#allocation2 + $0x10] sm:$0xff] %vm456_vm10, %v445_v24 }
  0xbb   :  { %482 = vst.msk [vmem:[#allocation2 + $0x10] sm:$0xff] %vm481_vm9, %v470_v23 }
  0xbc   :  { %v87_v25 = vpop.permute.xlu1 %86 }
  0xbd   :  { %v237_v26 = vpop.permute.xlu0 %236  ;;  %98 = vst.msk [vmem:[#allocation2 + $0x18] sm:$0xff] %vm96_vm3, %v87_v25 }
  0xbe   :  { %251 = vst.msk [vmem:[#allocation2 + $0x20] sm:$0xff] %vm248_vm1, %v237_v26  ;;  %v3857_v35 = vld [vmem:[#allocation2 + $0x8] sm:$0xff] }
  0xbf   :  { %v3849_v32 = vld [vmem:[#allocation2] sm:$0xff] }
  0xc0   :  { %v112_v27 = vpop.permute.xlu1 %111 }
  0xc1   :  { %v267_v28 = vpop.permute.xlu0 %266  ;;  %123 = vst.msk [vmem:[#allocation2 + $0x18] sm:$0xff] %vm121_vm4, %v112_v27 }
  0xc2   :  { %278 = vst.msk [vmem:[#allocation2 + $0x20] sm:$0xff] %vm276_vm2, %v267_v28  ;;  %v3841_v29 = vld [vmem:[#allocation2 + $0x10] sm:$0xff] }
  0xc3   :  { %571 = vrot.lane.b32.xlu1 %v3841_v29, %s3685_s29  ;;  %514 = vrot.lane.b32.xlu0 %v3841_v29, %s3686_s30 }
  0xc4   :  { %v137_v30 = vpop.permute.xlu1 %136 }
  0xc5   :  { %v292_v31 = vpop.permute.xlu0 %291  ;;  %148 = vst.msk [vmem:[#allocation2 + $0x18] sm:$0xff] %vm4979_vm5, %v137_v30  ;;  %vm4981_vm5 = vcmask 712248  }
  0xc6   :  { %303 = vst.msk [vmem:[#allocation2 + $0x20] sm:$0xff] %vm4978_vm6, %v292_v31  ;;  %vm4980_vm6 = vcmask 876248  }
  0xc7   :  { %567 = vrot.lane.b32.xlu1 %v3849_v32, %s3685_s29  ;;  %510 = vrot.lane.b32.xlu0 %v3849_v32, %s3686_s30 }
  0xc8   :  { %v162_v33 = vpop.permute.xlu1 %161 }
  0xc9   :  { %v317_v34 = vpop.permute.xlu0 %316  ;;  %173 = vst.msk [vmem:[#allocation2 + $0x18] sm:$0xff] %vm171_vm7, %v162_v33 }
  0xca   :  { %328 = vst.msk [vmem:[#allocation2 + $0x20] sm:$0xff] %vm326_vm8, %v317_v34 }
  0xcb   :  { %512 = vrot.lane.b32.xlu1 %v3857_v35, %s3686_s30  ;;  %569 = vrot.lane.b32.xlu0 %v3857_v35, %s3685_s29 }
  0xcc   :  { %v187_v36 = vpop.permute.xlu1 %186 }
  0xcd   :  { %v342_v37 = vpop.permute.xlu0 %341  ;;  %198 = vst.msk [vmem:[#allocation2 + $0x18] sm:$0xff] %vm4980_vm6, %v187_v36  ;;  %vm4983_vm6 = vcmask 417048  }
  0xce   :  { %353 = vst.msk [vmem:[#allocation2 + $0x20] sm:$0xff] %vm4981_vm5, %v342_v37  ;;  %vm4982_vm5 = vcmask 581048  }
  0xcf   :  { %626 = vrot.lane.b32.xlu1 %v3857_v35, %s3687_s9  ;;  %624 = vrot.lane.b32.xlu0 %v3849_v32, %s3687_s9 }
  0xd0   :  { %v417_v38 = vpop.permute.xlu1 %416 }
  0xd1   :  { %v367_v39 = vpop.permute.xlu0 %366  ;;  %431 = vst.msk [vmem:[#allocation2 + $0x28] sm:$0xff] %vm428_vm11, %v417_v38 }
  0xd2   :  { %378 = vst.msk [vmem:[#allocation2 + $0x20] sm:$0xff] %vm376_vm12, %v367_v39 }
  0xd3   :  { %681 = vrot.lane.b32.xlu1 %v3849_v32, %s3688_s10  ;;  %628 = vrot.lane.b32.xlu0 %v3841_v29, %s3687_s9 }
  0xd4   :  { %v392_v40 = vpop.permute.xlu1 %391 }
  0xd5   :  { %v212_v41 = vpop.permute.xlu0 %211  ;;  %403 = vst.msk [vmem:[#allocation2 + $0x20] sm:$0xff] %vm401_vm13, %v392_v40 }
  0xd6   :  { %223 = vst.msk [vmem:[#allocation2 + $0x18] sm:$0xff] %vm221_vm14, %v212_v41 }
  0xd7   :  { %430 = vst.msk [vmem:[#allocation2 + $0x20] sm:$0xff] %vm426_vm15, %v417_v38  ;;  %685 = vrot.lane.b32.xlu1 %v3841_v29, %s3688_s10  ;;  %683 = vrot.lane.b32.xlu0 %v3857_v35, %s3688_s10 }
  0xd8   :  { %250 = vst.msk [vmem:[#allocation2 + $0x18] sm:$0xff] %vm246_vm0, %v237_v26  ;;  %v472_v42 = vpop.permute.xlu1 %471 }
  0xd9   :  { %v447_v43 = vpop.permute.xlu0 %446 }
  0xda   :  { %458 = vst.msk [vmem:[#allocation2 + $0x28] sm:$0xff] %vm456_vm10, %v447_v43 }
  0xdb   :  { %483 = vst.msk [vmem:[#allocation2 + $0x28] sm:$0xff] %vm481_vm9, %v472_v42 }
  0xdc   :  { %v89_v44 = vpop.permute.xlu1 %88 }
  0xdd   :  { %v239_v45 = vpop.permute.xlu0 %238  ;;  %99 = vst.msk [vmem:[#allocation2 + $0x30] sm:$0xff] %vm96_vm3, %v89_v44 }
  0xde   :  { %253 = vst.msk [vmem:[#allocation2 + $0x38] sm:$0xff] %vm248_vm1, %v239_v45  ;;  %v3887_v46 = vld [vmem:[#allocation2 + $0x20] sm:$0xff] }
  0xdf   :  { %v3889_v47 = vld [vmem:[#allocation2 + $0x18] sm:$0xff]  ;;  %518 = vrot.lane.b32.xlu1 %v3887_v46, %s3686_s30 }
  0xe0   :  { %516 = vrot.lane.b32.xlu0 %v3889_v47, %s3686_s30  ;;  %v114_v48 = vpop.permute.xlu1 %113 }
  0xe1   :  { %v269_v49 = vpop.permute.xlu0 %268  ;;  %124 = vst.msk [vmem:[#allocation2 + $0x30] sm:$0xff] %vm121_vm4, %v114_v48 }
  0xe2   :  { %279 = vst.msk [vmem:[#allocation2 + $0x38] sm:$0xff] %vm276_vm2, %v269_v49  ;;  %v3897_v50 = vld [vmem:[#allocation2 + $0x28] sm:$0xff] }
  0xe3   :  { %573 = vrot.lane.b32.xlu1 %v3889_v47, %s3685_s29 }
  0xe4   :  { %520 = vrot.lane.b32.xlu0 %v3897_v50, %s3686_s30  ;;  %v139_v51 = vpop.permute.xlu1 %138 }
  0xe5   :  { %v294_v52 = vpop.permute.xlu0 %293  ;;  %149 = vst.msk [vmem:[#allocation2 + $0x30] sm:$0xff] %vm4982_vm5, %v139_v51  ;;  %vm4984_vm5 = vcmask 876248  }
  0xe6   :  { %304 = vst.msk [vmem:[#allocation2 + $0x38] sm:$0xff] %vm4983_vm6, %v294_v52  ;;  %vm4985_vm6 = vcmask 712248  }
  0xe7   :  { %577 = vrot.lane.b32.xlu1 %v3897_v50, %s3685_s29 }
  0xe8   :  { %575 = vrot.lane.b32.xlu0 %v3887_v46, %s3685_s29  ;;  %v164_v53 = vpop.permute.xlu1 %163 }
  0xe9   :  { %v319_v54 = vpop.permute.xlu0 %318  ;;  %174 = vst.msk [vmem:[#allocation2 + $0x30] sm:$0xff] %vm171_vm7, %v164_v53 }
  0xea   :  { %329 = vst.msk [vmem:[#allocation2 + $0x38] sm:$0xff] %vm326_vm8, %v319_v54 }
  0xeb   :  { %632 = vrot.lane.b32.xlu1 %v3887_v46, %s3687_s9 }
  0xec   :  { %630 = vrot.lane.b32.xlu0 %v3889_v47, %s3687_s9  ;;  %v189_v55 = vpop.permute.xlu1 %188 }
  0xed   :  { %v344_v56 = vpop.permute.xlu0 %343  ;;  %199 = vst.msk [vmem:[#allocation2 + $0x30] sm:$0xff] %vm4984_vm5, %v189_v55 }
  0xee   :  { %354 = vst.msk [vmem:[#allocation2 + $0x38] sm:$0xff] %vm4985_vm6, %v344_v56 }
  0xef   :  { %687 = vrot.lane.b32.xlu1 %v3889_v47, %s3688_s10 }
  0xf0   :  { %634 = vrot.lane.b32.xlu0 %v3897_v50, %s3687_s9  ;;  %v419_v57 = vpop.permute.xlu1 %418 }
  0xf1   :  { %v369_v58 = vpop.permute.xlu0 %368  ;;  %433 = vst.msk [vmem:[#allocation2 + $0x40] sm:$0xff] %vm428_vm11, %v419_v57 }
  0xf2   :  { %379 = vst.msk [vmem:[#allocation2 + $0x38] sm:$0xff] %vm376_vm12, %v369_v58 }
  0xf3   :  { %691 = vrot.lane.b32.xlu1 %v3897_v50, %s3688_s10 }
  0xf4   :  { %689 = vrot.lane.b32.xlu0 %v3887_v46, %s3688_s10  ;;  %v394_v59 = vpop.permute.xlu1 %393 }
  0xf5   :  { %v214_v60 = vpop.permute.xlu0 %213  ;;  %404 = vst.msk [vmem:[#allocation2 + $0x38] sm:$0xff] %vm401_vm13, %v394_v59 }
  0xf6   :  { %224 = vst.msk [vmem:[#allocation2 + $0x30] sm:$0xff] %vm221_vm14, %v214_v60 }
  0xf7   :  { %432 = vst.msk [vmem:[#allocation2 + $0x38] sm:$0xff] %vm426_vm15, %v419_v57 }
  0xf8   :  { %252 = vst.msk [vmem:[#allocation2 + $0x30] sm:$0xff] %vm246_vm0, %v239_v45  ;;  %v474_v61 = vpop.permute.xlu1 %473 }
  0xf9   :  { %v449_v62 = vpop.permute.xlu0 %448 }
  0xfa   :  { %459 = vst.msk [vmem:[#allocation2 + $0x40] sm:$0xff] %vm456_vm10, %v449_v62 }
  0xfb   :  { %484 = vst.msk [vmem:[#allocation2 + $0x40] sm:$0xff] %vm481_vm9, %v474_v61 }
  0xfc   :  { %v91_v63 = vpop.permute.xlu1 %90 }
  0xfd   :  { %v241_v0 = vpop.permute.xlu0 %240  ;;  %100 = vst.msk [vmem:[#allocation2 + $0x48] sm:$0xff] %vm96_vm3, %v91_v63  ;;  %vm4987_vm3 = vcmask 417048  }
  0xfe   :  { %255 = vst.msk [vmem:[#allocation2 + $0x50] sm:$0xff] %vm248_vm1, %v241_v0  ;;  %v3935_v1 = vld [vmem:[#allocation2 + $0x38] sm:$0xff]  ;;  %vm4986_vm1 = vcmask 581048  }
  0xff   :  { %v3937_v2 = vld [vmem:[#allocation2 + $0x30] sm:$0xff]  ;;  %524 = vrot.lane.b32.xlu1 %v3935_v1, %s3686_s30 }
 0x100   :  { %522 = vrot.lane.b32.xlu0 %v3937_v2, %s3686_s30  ;;  %v116_v3 = vpop.permute.xlu1 %115 }
 0x101   :  { %v271_v4 = vpop.permute.xlu0 %270  ;;  %125 = vst.msk [vmem:[#allocation2 + $0x48] sm:$0xff] %vm121_vm4, %v116_v3  ;;  %vm4989_vm4 = vmmov %vm4985_vm6 }
 0x102   :  { %280 = vst.msk [vmem:[#allocation2 + $0x50] sm:$0xff] %vm276_vm2, %v271_v4  ;;  %v3945_v5 = vld [vmem:[#allocation2 + $0x40] sm:$0xff]  ;;  %vm4988_vm2 = vmmov %vm4984_vm5  ;;  %vm986_vm5 = vcmask 715776  }
 0x103   :  { %579 = vrot.lane.b32.xlu1 %v3937_v2, %s3685_s29 }
 0x104   :  { %526 = vrot.lane.b32.xlu0 %v3945_v5, %s3686_s30  ;;  %v141_v6 = vpop.permute.xlu1 %140 }
 0x105   :  { %v296_v7 = vpop.permute.xlu0 %295  ;;  %150 = vst.msk [vmem:[#allocation2 + $0x48] sm:$0xff] %vm4986_vm1, %v141_v6 }
 0x106   :  { %305 = vst.msk [vmem:[#allocation2 + $0x50] sm:$0xff] %vm4987_vm3, %v296_v7 }
 0x107   :  { %583 = vrot.lane.b32.xlu1 %v3945_v5, %s3685_s29 }
 0x108   :  { %581 = vrot.lane.b32.xlu0 %v3935_v1, %s3685_s29  ;;  %v166_v8 = vpop.permute.xlu1 %165 }
 0x109   :  { %v321_v9 = vpop.permute.xlu0 %320  ;;  %175 = vst.msk [vmem:[#allocation2 + $0x48] sm:$0xff] %vm171_vm7, %v166_v8  ;;  %vm591_vm7 = vcmask 1031168  }
 0x10a   :  { %330 = vst.msk [vmem:[#allocation2 + $0x50] sm:$0xff] %vm326_vm8, %v321_v9  ;;  %vm648_vm8 = vcmask 1022976  }
 0x10b   :  { %638 = vrot.lane.b32.xlu1 %v3935_v1, %s3687_s9 }
 0x10c   :  { %636 = vrot.lane.b32.xlu0 %v3937_v2, %s3687_s9  ;;  %v191_v10 = vpop.permute.xlu1 %190 }
 0x10d   :  { %v346_v11 = vpop.permute.xlu0 %345  ;;  %200 = vst.msk [vmem:[#allocation2 + $0x48] sm:$0xff] %vm4988_vm2, %v191_v10 }
 0x10e   :  { %355 = vst.msk [vmem:[#allocation2 + $0x50] sm:$0xff] %vm4989_vm4, %v346_v11 }
 0x10f   :  { %693 = vrot.lane.b32.xlu1 %v3937_v2, %s3688_s10 }
 0x110   :  { %640 = vrot.lane.b32.xlu0 %v3945_v5, %s3687_s9  ;;  %v421_v12 = vpop.permute.xlu1 %420 }
 0x111   :  { %v371_v13 = vpop.permute.xlu0 %370  ;;  %435 = vst.msk [vmem:[#allocation2 + $0x58] sm:$0xff] %vm428_vm11, %v421_v12  ;;  %vm799_vm11 = vcmask 900096  }
 0x112   :  { %380 = vst.msk [vmem:[#allocation2 + $0x50] sm:$0xff] %vm376_vm12, %v371_v13  ;;  %vm848_vm12 = vcmask 752640  }
 0x113   :  { %697 = vrot.lane.b32.xlu1 %v3945_v5, %s3688_s10 }
 0x114   :  { %695 = vrot.lane.b32.xlu0 %v3935_v1, %s3688_s10  ;;  %v396_v14 = vpop.permute.xlu1 %395 }
 0x115   :  { %v216_v15 = vpop.permute.xlu0 %215  ;;  %405 = vst.msk [vmem:[#allocation2 + $0x50] sm:$0xff] %vm401_vm13, %v396_v14  ;;  %vm4990_vm13 = vcmask 605184  }
 0x116   :  { %225 = vst.msk [vmem:[#allocation2 + $0x48] sm:$0xff] %vm221_vm14, %v216_v15  ;;  %vm4991_vm14 = vmmov %vm4990_vm13 }
 0x117   :  { %434 = vst.msk [vmem:[#allocation2 + $0x50] sm:$0xff] %vm426_vm15, %v421_v12  ;;  %vm945_vm15 = vcmask 457728   ;;  %vm4992_vm6 = vmmov %vm4990_vm13 }
 0x118   :  { %254 = vst.msk [vmem:[#allocation2 + $0x48] sm:$0xff] %vm246_vm0, %v241_v0  ;;  %v476_v17 = vpop.permute.xlu1 %475  ;;  %vm534_vm0 = vcmask 1039360   ;;  %vm4993_vm1 = vmmov %vm4992_vm6 }
 0x119   :  { %v451_v16 = vpop.permute.xlu0 %450  ;;  %vm4994_vm3 = vmmov %vm4993_vm1 }
 0x11a   :  { %460 = vst.msk [vmem:[#allocation2 + $0x58] sm:$0xff] %vm456_vm10, %v451_v16  ;;  %vm740_vm10 = vcmask 572416   ;;  %vm4995_vm2 = vmmov %vm4993_vm1 }
 0x11b   :  { %485 = vst.msk [vmem:[#allocation2 + $0x58] sm:$0xff] %vm481_vm9, %v476_v17  ;;  %vm705_vm9 = vcmask 1014784   ;;  %vm4996_vm4 = vmmov %vm4993_vm1 }
 0x11e   :  { %v3981_v18 = vld [vmem:[#allocation2 + $0x50] sm:$0xff] }
 0x11f   :  { %v3983_v19 = vld [vmem:[#allocation2 + $0x48] sm:$0xff]  ;;  %530 = vrot.lane.b32.xlu1 %v3981_v18, %s3686_s30 }
 0x120   :  { %528 = vrot.lane.b32.xlu0 %v3983_v19, %s3686_s30 }
 0x122   :  { %v3989_v20 = vld [vmem:[#allocation2 + $0x58] sm:$0xff] }
 0x123   :  { %585 = vrot.lane.b32.xlu1 %v3983_v19, %s3685_s29 }
 0x124   :  { %532 = vrot.lane.b32.xlu0 %v3989_v20, %s3686_s30 }
 0x127   :  { %589 = vrot.lane.b32.xlu1 %v3989_v20, %s3685_s29 }
 0x128   :  { %587 = vrot.lane.b32.xlu0 %v3981_v18, %s3685_s29 }
 0x12b   :  { %644 = vrot.lane.b32.xlu1 %v3981_v18, %s3687_s9 }
 0x12c   :  { %642 = vrot.lane.b32.xlu0 %v3983_v19, %s3687_s9 }
 0x12f   :  { %699 = vrot.lane.b32.xlu1 %v3983_v19, %s3688_s10 }
 0x130   :  { %646 = vrot.lane.b32.xlu0 %v3989_v20, %s3687_s9 }
 0x133   :  { %703 = vrot.lane.b32.xlu1 %v3989_v20, %s3688_s10 }
 0x134   :  { %701 = vrot.lane.b32.xlu0 %v3981_v18, %s3688_s10 }
 0x135   :  { %v572_v21 = vpop.permute.xlu1 %571  ;;  %v515_v22 = vpop.permute.xlu0 %514 }
 0x136   :  { %v557_v34 = vmax.f32 %v3841_v29, %v515_v22 }
 0x138   :  { %v614_v43 = vmax.f32 %v557_v34, %v572_v21 }
 0x139   :  { %v568_v23 = vpop.permute.xlu1 %567  ;;  %v511_v24 = vpop.permute.xlu0 %510 }
 0x13d   :  { %v513_v25 = vpop.permute.xlu1 %512  ;;  %v570_v26 = vpop.permute.xlu0 %569 }
 0x13e   :  { %v535_v27 = vsel %vm534_vm0, %v511_v24, %v513_v25  ;;  %v536_v28 = vsel %vm534_vm0, %v513_v25, %v515_v22  ;;  %v592_v37 = vsel %vm591_vm7, %v568_v23, %v570_v26  ;;  %v593_v41 = vsel %vm591_vm7, %v570_v26, %v572_v21 }
 0x13f   :  { %v555_v30 = vmax.f32 %v3849_v32, %v535_v27  ;;  %v556_v36 = vmax.f32 %v3857_v35, %v536_v28 }
 0x141   :  { %v627_v31 = vpop.permute.xlu1 %626  ;;  %v625_v33 = vpop.permute.xlu0 %624  ;;  %v612_v38 = vmax.f32 %v555_v30, %v592_v37  ;;  %v613_v44 = vmax.f32 %v556_v36, %v593_v41 }
 0x142   :  { %v649_v42 = vsel %vm648_vm8, %v625_v33, %v627_v31 }
 0x143   :  { %v669_v48 = vmax.f32 %v612_v38, %v649_v42 }
 0x145   :  { %v682_v39 = vpop.permute.xlu1 %681  ;;  %v629_v40 = vpop.permute.xlu0 %628 }
 0x146   :  { %v650_v32 = vsel %vm648_vm8, %v627_v31, %v629_v40  ;;  %v671_v45 = vmax.f32 %v614_v43, %v629_v40 }
 0x147   :  { %v670_v29 = vmax.f32 %v613_v44, %v650_v32 }
 0x149   :  { %v686_v35 = vpop.permute.xlu1 %685  ;;  %v684_v49 = vpop.permute.xlu0 %683 }
 0x14a   :  { %v728_v51 = vmax.f32 %v671_v45, %v686_v35  ;;  %v706_v52 = vsel %vm705_vm9, %v682_v39, %v684_v49  ;;  %v707_v53 = vsel %vm705_vm9, %v684_v49, %v686_v35 }
 0x14b   :  { %v4022_v54 = vmax.f32 %v669_v48, %v706_v52  ;;  %v4024_v55 = vmax.f32 %v670_v29, %v707_v53 }
 0x14c   :  { %741 = vst.msk [vmem:[#allocation3 + $0x10] sm:$0xff] %vm740_vm10, %v728_v51 }
 0x151   :  { %v519_v56 = vpop.permute.xlu1 %518 }
 0x152   :  { %v517_v57 = vpop.permute.xlu0 %516 }
 0x153   :  { %v759_v58 = vld [vmem:[#allocation3 + $0x10] sm:$0xff]  ;;  %v537_v3 = vsel %vm534_vm0, %v517_v57, %v519_v56 }
 0x154   :  { %828 = vrot.lane.b32.xlu1 %v759_v58, %s3689_s1  ;;  %779 = vrot.lane.b32.xlu0 %v759_v58, %s3690_s11  ;;  %v558_v9 = vmax.f32 %v3889_v47, %v537_v3 }
 0x155   :  { %v574_v59 = vpop.permute.xlu1 %573 }
 0x156   :  { %v521_v60 = vpop.permute.xlu0 %520 }
 0x157   :  { %v538_v4 = vsel %vm534_vm0, %v519_v56, %v521_v60  ;;  %v560_v6 = vmax.f32 %v3897_v50, %v521_v60 }
 0x158   :  { %925 = vrot.lane.b32.xlu1 %v759_v58, %s3691_s12  ;;  %877 = vrot.lane.b32.xlu0 %v759_v58, %s3692_s13  ;;  %v559_v10 = vmax.f32 %v3887_v46, %v538_v4 }
 0x159   :  { %v578_v61 = vpop.permute.xlu1 %577 }
 0x15a   :  { %v576_v62 = vpop.permute.xlu0 %575  ;;  %v617_v13 = vmax.f32 %v560_v6, %v578_v61 }
 0x15b   :  { %v594_v7 = vsel %vm591_vm7, %v574_v59, %v576_v62  ;;  %v595_v8 = vsel %vm591_vm7, %v576_v62, %v578_v61 }
 0x15c   :  { %v615_v16 = vmax.f32 %v558_v9, %v594_v7  ;;  %v616_v17 = vmax.f32 %v559_v10, %v595_v8 }
 0x15d   :  { %v633_v63 = vpop.permute.xlu1 %632 }
 0x15e   :  { %v631_v0 = vpop.permute.xlu0 %630 }
 0x15f   :  { %v651_v14 = vsel %vm648_vm8, %v631_v0, %v633_v63 }
 0x160   :  { %v672_v22 = vmax.f32 %v615_v16, %v651_v14 }
 0x161   :  { %v688_v11 = vpop.permute.xlu1 %687 }
 0x162   :  { %v635_v12 = vpop.permute.xlu0 %634 }
 0x163   :  { %v652_v15 = vsel %vm648_vm8, %v633_v63, %v635_v12  ;;  %v674_v21 = vmax.f32 %v617_v13, %v635_v12 }
 0x164   :  { %v673_v50 = vmax.f32 %v616_v17, %v652_v15 }
 0x165   :  { %v692_v23 = vpop.permute.xlu1 %691 }
 0x166   :  { %v690_v24 = vpop.permute.xlu0 %689  ;;  %v731_v25 = vmax.f32 %v674_v21, %v692_v23 }
 0x167   :  { %v708_v26 = vsel %vm705_vm9, %v688_v11, %v690_v24  ;;  %v709_v47 = vsel %vm705_vm9, %v690_v24, %v692_v23 }
 0x168   :  { %v4042_v46 = vmax.f32 %v672_v22, %v708_v26  ;;  %v4044_v27 = vmax.f32 %v673_v50, %v709_v47  ;;  %744 = vst.msk [vmem:[#allocation3 + $0x28] sm:$0xff] %vm740_vm10, %v731_v25 }
 0x16f   :  { %v760_v28 = vld [vmem:[#allocation3 + $0x28] sm:$0xff] }
 0x170   :  { %834 = vrot.lane.b32.xlu1 %v760_v28, %s3689_s1  ;;  %785 = vrot.lane.b32.xlu0 %v760_v28, %s3690_s11 }
 0x171   :  { %v525_v30 = vpop.permute.xlu1 %524 }
 0x172   :  { %v523_v31 = vpop.permute.xlu0 %522 }
 0x173   :  { %v539_v40 = vsel %vm534_vm0, %v523_v31, %v525_v30 }
 0x174   :  { %931 = vrot.lane.b32.xlu1 %v760_v28, %s3691_s12  ;;  %883 = vrot.lane.b32.xlu0 %v760_v28, %s3692_s13  ;;  %v561_v44 = vmax.f32 %v3937_v2, %v539_v40 }
 0x175   :  { %v580_v33 = vpop.permute.xlu1 %579 }
 0x176   :  { %v527_v34 = vpop.permute.xlu0 %526 }
 0x177   :  { %v540_v41 = vsel %vm534_vm0, %v525_v30, %v527_v34  ;;  %v563_v42 = vmax.f32 %v3945_v5, %v527_v34 }
 0x178   :  { %777 = vrot.lane.b32.xlu1 %v4024_v55, %s3690_s11  ;;  %775 = vrot.lane.b32.xlu0 %v4022_v54, %s3690_s11  ;;  %v562_v45 = vmax.f32 %v3935_v1, %v540_v41 }
 0x179   :  { %v584_v36 = vpop.permute.xlu1 %583 }
 0x17a   :  { %v582_v37 = vpop.permute.xlu0 %581  ;;  %v620_v35 = vmax.f32 %v563_v42, %v584_v36 }
 0x17b   :  { %v596_v43 = vsel %vm591_vm7, %v580_v33, %v582_v37  ;;  %v597_v32 = vsel %vm591_vm7, %v582_v37, %v584_v36 }
 0x17c   :  { %824 = vrot.lane.b32.xlu1 %v4022_v54, %s3689_s1  ;;  %826 = vrot.lane.b32.xlu0 %v4024_v55, %s3689_s1  ;;  %v618_v51 = vmax.f32 %v561_v44, %v596_v43  ;;  %v619_v52 = vmax.f32 %v562_v45, %v597_v32 }
 0x17d   :  { %v639_v38 = vpop.permute.xlu1 %638 }
 0x17e   :  { %v637_v39 = vpop.permute.xlu0 %636 }
 0x17f   :  { %v653_v49 = vsel %vm648_vm8, %v637_v39, %v639_v38 }
 0x180   :  { %875 = vrot.lane.b32.xlu1 %v4024_v55, %s3692_s13  ;;  %873 = vrot.lane.b32.xlu0 %v4022_v54, %s3692_s13  ;;  %v675_v56 = vmax.f32 %v618_v51, %v653_v49 }
 0x181   :  { %v694_v48 = vpop.permute.xlu1 %693 }
 0x182   :  { %v641_v29 = vpop.permute.xlu0 %640 }
 0x183   :  { %v654_v5 = vsel %vm648_vm8, %v639_v38, %v641_v29  ;;  %v677_v53 = vmax.f32 %v620_v35, %v641_v29 }
 0x184   :  { %921 = vrot.lane.b32.xlu1 %v4022_v54, %s3691_s12  ;;  %923 = vrot.lane.b32.xlu0 %v4024_v55, %s3691_s12  ;;  %v676_v2 = vmax.f32 %v619_v52, %v654_v5 }
 0x185   :  { %v698_v57 = vpop.permute.xlu1 %697 }
 0x186   :  { %v696_v1 = vpop.permute.xlu0 %695  ;;  %v734_v58 = vmax.f32 %v677_v53, %v698_v57 }
 0x187   :  { %v710_v59 = vsel %vm705_vm9, %v694_v48, %v696_v1  ;;  %v711_v60 = vsel %vm705_vm9, %v696_v1, %v698_v57 }
 0x188   :  { %v4078_v61 = vmax.f32 %v675_v56, %v710_v59  ;;  %v4080_v62 = vmax.f32 %v676_v2, %v711_v60  ;;  %747 = vst.msk [vmem:[#allocation3 + $0x40] sm:$0xff] %vm740_vm10, %v734_v58  ;;  %783 = vrot.lane.b32.xlu1 %v4044_v27, %s3690_s11  ;;  %781 = vrot.lane.b32.xlu0 %v4042_v46, %s3690_s11 }
 0x18c   :  { %830 = vrot.lane.b32.xlu1 %v4042_v46, %s3689_s1  ;;  %832 = vrot.lane.b32.xlu0 %v4044_v27, %s3689_s1 }
 0x18f   :  { %v761_v8 = vld [vmem:[#allocation3 + $0x40] sm:$0xff] }
 0x190   :  { %881 = vrot.lane.b32.xlu1 %v4044_v27, %s3692_s13  ;;  %879 = vrot.lane.b32.xlu0 %v4042_v46, %s3692_s13 }
 0x191   :  { %v531_v63 = vpop.permute.xlu1 %530 }
 0x192   :  { %v529_v0 = vpop.permute.xlu0 %528 }
 0x193   :  { %v541_v11 = vsel %vm534_vm0, %v529_v0, %v531_v63 }
 0x194   :  { %927 = vrot.lane.b32.xlu1 %v4042_v46, %s3691_s12  ;;  %929 = vrot.lane.b32.xlu0 %v4044_v27, %s3691_s12  ;;  %v564_v16 = vmax.f32 %v3983_v19, %v541_v11 }
 0x195   :  { %v586_v3 = vpop.permute.xlu1 %585 }
 0x196   :  { %v533_v4 = vpop.permute.xlu0 %532 }
 0x197   :  { %v542_v12 = vsel %vm534_vm0, %v531_v63, %v533_v4  ;;  %v566_v13 = vmax.f32 %v3989_v20, %v533_v4 }
 0x198   :  { %789 = vrot.lane.b32.xlu1 %v4080_v62, %s3690_s11  ;;  %787 = vrot.lane.b32.xlu0 %v4078_v61, %s3690_s11  ;;  %v565_v17 = vmax.f32 %v3981_v18, %v542_v12 }
 0x199   :  { %v590_v6 = vpop.permute.xlu1 %589 }
 0x19a   :  { %v588_v7 = vpop.permute.xlu0 %587  ;;  %v623_v50 = vmax.f32 %v566_v13, %v590_v6 }
 0x19b   :  { %v598_v14 = vsel %vm591_vm7, %v586_v3, %v588_v7  ;;  %v599_v15 = vsel %vm591_vm7, %v588_v7, %v590_v6 }
 0x19c   :  { %836 = vrot.lane.b32.xlu1 %v4078_v61, %s3689_s1  ;;  %791 = vrot.lane.b32.xlu0 %v761_v8, %s3690_s11  ;;  %v621_v24 = vmax.f32 %v564_v16, %v598_v14  ;;  %v622_v25 = vmax.f32 %v565_v17, %v599_v15 }
 0x19d   :  { %v645_v9 = vpop.permute.xlu1 %644 }
 0x19e   :  { %v643_v10 = vpop.permute.xlu0 %642 }
 0x19f   :  { %v655_v23 = vsel %vm648_vm8, %v643_v10, %v645_v9 }
 0x1a0   :  { %840 = vrot.lane.b32.xlu1 %v761_v8, %s3689_s1  ;;  %838 = vrot.lane.b32.xlu0 %v4080_v62, %s3689_s1  ;;  %v678_v47 = vmax.f32 %v621_v24, %v655_v23 }
 0x1a1   :  { %v700_v21 = vpop.permute.xlu1 %699 }
 0x1a2   :  { %v647_v22 = vpop.permute.xlu0 %646 }
 0x1a3   :  { %v656_v20 = vsel %vm648_vm8, %v645_v9, %v647_v22  ;;  %v680_v26 = vmax.f32 %v623_v50, %v647_v22  ;;  %vm4997_vm8 = vmmov %vm4993_vm1 }
 0x1a4   :  { %887 = vrot.lane.b32.xlu1 %v4080_v62, %s3692_s13  ;;  %885 = vrot.lane.b32.xlu0 %v4078_v61, %s3692_s13  ;;  %v679_v19 = vmax.f32 %v622_v25, %v656_v20 }
 0x1a5   :  { %v704_v28 = vpop.permute.xlu1 %703 }
 0x1a6   :  { %v702_v18 = vpop.permute.xlu0 %701  ;;  %v737_v30 = vmax.f32 %v680_v26, %v704_v28 }
 0x1a7   :  { %v712_v31 = vsel %vm705_vm9, %v700_v21, %v702_v18  ;;  %v713_v33 = vsel %vm705_vm9, %v702_v18, %v704_v28  ;;  %vm1099_vm9 = vcmask 736256  }
 0x1a8   :  { %v4124_v34 = vmax.f32 %v678_v47, %v712_v31  ;;  %v4126_v36 = vmax.f32 %v679_v19, %v713_v33  ;;  %750 = vst.msk [vmem:[#allocation3 + $0x58] sm:$0xff] %vm740_vm10, %v737_v30  ;;  %933 = vrot.lane.b32.xlu1 %v4078_v61, %s3691_s12  ;;  %889 = vrot.lane.b32.xlu0 %v761_v8, %s3692_s13  ;;  %vm1124_vm10 = vcmask 1043456  }
 0x1ac   :  { %937 = vrot.lane.b32.xlu1 %v761_v8, %s3691_s12  ;;  %935 = vrot.lane.b32.xlu0 %v4080_v62, %s3691_s12 }
 0x1af   :  { %v762_v37 = vld [vmem:[#allocation3 + $0x58] sm:$0xff] }
 0x1b0   :  { %795 = vrot.lane.b32.xlu1 %v4126_v36, %s3690_s11  ;;  %793 = vrot.lane.b32.xlu0 %v4124_v34, %s3690_s11 }
 0x1b4   :  { %842 = vrot.lane.b32.xlu1 %v4124_v34, %s3689_s1  ;;  %797 = vrot.lane.b32.xlu0 %v762_v37, %s3690_s11 }
 0x1b8   :  { %846 = vrot.lane.b32.xlu1 %v762_v37, %s3689_s1  ;;  %844 = vrot.lane.b32.xlu0 %v4126_v36, %s3689_s1 }
 0x1bc   :  { %893 = vrot.lane.b32.xlu1 %v4126_v36, %s3692_s13  ;;  %891 = vrot.lane.b32.xlu0 %v4124_v34, %s3692_s13 }
 0x1c0   :  { %939 = vrot.lane.b32.xlu1 %v4124_v34, %s3691_s12  ;;  %895 = vrot.lane.b32.xlu0 %v762_v37, %s3692_s13 }
 0x1c4   :  { %943 = vrot.lane.b32.xlu1 %v762_v37, %s3691_s12  ;;  %941 = vrot.lane.b32.xlu0 %v4126_v36, %s3691_s12 }
 0x1c6   :  { %v829_v38 = vpop.permute.xlu1 %828  ;;  %v780_v39 = vpop.permute.xlu0 %779 }
 0x1ca   :  { %v926_v40 = vpop.permute.xlu1 %925  ;;  %v878_v41 = vpop.permute.xlu0 %877 }
 0x1e2   :  { %v835_v42 = vpop.permute.xlu1 %834  ;;  %v786_v43 = vpop.permute.xlu0 %785 }
 0x1e6   :  { %v4155_v32 = vpop.permute.xlu1 %931  ;;  %v884_v44 = vpop.permute.xlu0 %883 }
 0x1ea   :  { %v778_v45 = vpop.permute.xlu1 %777  ;;  %v776_v48 = vpop.permute.xlu0 %775 }
 0x1eb   :  { %v801_v49 = vsel %vm799_vm11, %v778_v45, %v780_v39  ;;  %v800_v5 = vsel %vm799_vm11, %v776_v48, %v778_v45 }
 0x1ec   :  { %v817_v53 = vmax.f32 %v4024_v55, %v801_v49  ;;  %v816_v56 = vmax.f32 %v4022_v54, %v800_v5 }
 0x1ee   :  { %v825_v29 = vpop.permute.xlu1 %824  ;;  %v827_v35 = vpop.permute.xlu0 %826 }
 0x1ef   :  { %v849_v51 = vsel %vm848_vm12, %v825_v29, %v827_v35  ;;  %v850_v52 = vsel %vm848_vm12, %v827_v35, %v829_v38 }
 0x1f0   :  { %v865_v59 = vmax.f32 %v816_v56, %v849_v51  ;;  %v866_v60 = vmax.f32 %v817_v53, %v850_v52 }
 0x1f2   :  { %v876_v2 = vpop.permute.xlu1 %875  ;;  %v874_v57 = vpop.permute.xlu0 %873 }
 0x1f3   :  { %v898_v1 = vsel %vm4990_vm13, %v876_v2, %v878_v41  ;;  %v897_v58 = vsel %vm4991_vm14, %v874_v57, %v876_v2  ;;  %vm1040_vm13 = vcmask 891904   ;;  %vm1002_vm14 = vcmask 719876  }
 0x1f4   :  { %v914_v63 = vmax.f32 %v866_v60, %v898_v1  ;;  %v913_v0 = vmax.f32 %v865_v59, %v897_v58 }
 0x1f6   :  { %v922_v3 = vpop.permute.xlu1 %921  ;;  %v924_v4 = vpop.permute.xlu0 %923 }
 0x1f7   :  { %v946_v6 = vsel %vm945_vm15, %v922_v3, %v924_v4  ;;  %v947_v7 = vsel %vm945_vm15, %v924_v4, %v926_v40 }
 0x1f8   :  { %v962_v55 = vmax.f32 %v913_v0, %v946_v6  ;;  %v963_v8 = vmax.f32 %v914_v63, %v947_v7 }
 0x1fa   :  { %970 = vst [vmem:[#allocation4] sm:$0xff] %v962_v55  ;;  %971 = vst.msk [vmem:[#allocation4 + $0x8] sm:$0xff] %vm591_vm7, %v963_v8  ;;  %v784_v54 = vpop.permute.xlu1 %783  ;;  %v782_v9 = vpop.permute.xlu0 %781 }
 0x1fb   :  { %v803_v12 = vsel %vm799_vm11, %v784_v54, %v786_v43  ;;  %v802_v13 = vsel %vm799_vm11, %v782_v9, %v784_v54 }
 0x1fc   :  { %v819_v21 = vmax.f32 %v4044_v27, %v803_v12  ;;  %v818_v22 = vmax.f32 %v4042_v46, %v802_v13 }
 0x1fe   :  { %v831_v10 = vpop.permute.xlu1 %830  ;;  %v833_v11 = vpop.permute.xlu0 %832 }
 0x1ff   :  { %v851_v16 = vsel %vm848_vm12, %v831_v10, %v833_v11  ;;  %v852_v17 = vsel %vm848_vm12, %v833_v11, %v835_v42 }
 0x200   :  { %v867_v47 = vmax.f32 %v818_v22, %v851_v16  ;;  %v868_v19 = vmax.f32 %v819_v21, %v852_v17 }
 0x201   :  { %v983_v14 = vld [vmem:[#allocation4] sm:$0xf]  ;;  %v984_v15 = vld [vmem:[#allocation4 + $0x8] sm:$0xf]  ;;  %v1360_v35 = vld [vmem:[#allocation4 + $0x8] sm:$0xf0] }
 0x202   :  { %985 = vst [vmem:[#allocation5] sm:$0xf] %v983_v14  ;;  %987 = vst.msk [vmem:[#allocation5 + $0x8] sm:$0xf] %vm986_vm5, %v984_v15  ;;  %v882_v50 = vpop.permute.xlu1 %881  ;;  %v1092_v23 = vld [vmem:[#allocation4 + $0x8] sm:$0xf]  ;;  %v880_v20 = vpop.permute.xlu0 %879 }
 0x203   :  { %v900_v24 = vsel %vm4992_vm6, %v882_v50, %v884_v44  ;;  %1097 = vrot.lane.b32.xlu1 %v1092_v23, %s3693_s14  ;;  %v1091_v25 = vld [vmem:[#allocation4] sm:$0xf]  ;;  %v899_v26 = vsel %vm4993_vm1, %v880_v20, %v882_v50  ;;  %v1063_v30 = vld [vmem:[#allocation4 + $0x8] sm:$0xf]  ;;  %v1359_v5 = vld [vmem:[#allocation4] sm:$0xf0] }
 0x204   :  { %1095 = vrot.lane.b32.xlu0 %v1091_v25, %s3693_s14  ;;  %v916_v28 = vmax.f32 %v868_v19, %v900_v24  ;;  %v915_v18 = vmax.f32 %v867_v47, %v899_v26  ;;  %v1062_v31 = vld [vmem:[#allocation4] sm:$0xf]  ;;  %v1033_v41 = vld [vmem:[#allocation4 + $0x8] sm:$0xf]  ;;  %v1332_v52 = vld [vmem:[#allocation4 + $0x8] sm:$0xf0] }
 0x205   :  { %v1032_v43 = vld [vmem:[#allocation4] sm:$0xf]  ;;  %v1005_v45 = vld [vmem:[#allocation4 + $0x8] sm:$0xf]  ;;  %v1331_v57 = vld [vmem:[#allocation4] sm:$0xf0] }
 0x206   :  { %v928_v27 = vpop.permute.xlu1 %927  ;;  %v930_v46 = vpop.permute.xlu0 %929  ;;  %v1304_v0 = vld [vmem:[#allocation4 + $0x8] sm:$0xf0]  ;;  %v1303_v6 = vld [vmem:[#allocation4] sm:$0xf0]  ;;  %vm1056_vm6 = vcmask 883712   ;;  %vm1117_vm1 = vcmask 293888  }
 0x207   :  { %1068 = vrot.lane.b32.xlu1 %v1063_v30, %s3689_s1  ;;  %v948_v33 = vsel %vm945_vm15, %v928_v27, %v930_v46  ;;  %v949_v37 = vsel %vm945_vm15, %v930_v46, %v4155_v32  ;;  %v1004_v32 = vld [vmem:[#allocation4] sm:$0xf]  ;;  %v1076_v30 = vld [vmem:[#allocation4 + $0x8] sm:$0xf] }
 0x208   :  { %1066 = vrot.lane.b32.xlu0 %v1062_v31, %s3689_s1  ;;  %v964_v38 = vmax.f32 %v915_v18, %v948_v33  ;;  %v965_v39 = vmax.f32 %v916_v28, %v949_v37  ;;  %v1075_v37 = vld [vmem:[#allocation4] sm:$0xf] }
 0x20a   :  { %972 = vst [vmem:[#allocation4 + $0x10] sm:$0xff] %v964_v38  ;;  %973 = vst.msk [vmem:[#allocation4 + $0x18] sm:$0xff] %vm591_vm7, %v965_v39  ;;  %v790_v40 = vpop.permute.xlu1 %789  ;;  %v788_v42 = vpop.permute.xlu0 %787 }
 0x20b   :  { %1038 = vrot.lane.b32.xlu1 %v1033_v41, %s3694_s0  ;;  %v804_v56 = vsel %vm799_vm11, %v788_v42, %v790_v40 }
 0x20c   :  { %1036 = vrot.lane.b32.xlu0 %v1032_v43, %s3694_s0  ;;  %v820_v59 = vmax.f32 %v4078_v61, %v804_v56  ;;  %v1276_v61 = vld [vmem:[#allocation4 + $0x8] sm:$0xf0]  ;;  %v1079_v43 = vrot.slane %v1075_v37, 4 }
 0x20e   :  { %v837_v44 = vpop.permute.xlu1 %836  ;;  %v792_v48 = vpop.permute.xlu0 %791 }
 0x20f   :  { %1010 = vrot.lane.b32.xlu1 %v1005_v45, %s3685_s29  ;;  %v805_v2 = vsel %vm799_vm11, %v790_v40, %v792_v48  ;;  %v1080_v40 = vrot.slane %v1076_v30, 4  ;;  %v1047_v48 = vld [vmem:[#allocation4 + $0x8] sm:$0xf] }
 0x210   :  { %1008 = vrot.lane.b32.xlu0 %v1004_v32, %s3685_s29  ;;  %v821_v60 = vmax.f32 %v4080_v62, %v805_v2  ;;  %v1275_v62 = vld [vmem:[#allocation4] sm:$0xf0]  ;;  %v1018_v2 = vld [vmem:[#allocation4 + $0x8] sm:$0xf] }
 0x211   :  { %v1668_v16 = vld [vmem:[#allocation4 + $0x18] sm:$0xf]  ;;  %v1667_v22 = vld [vmem:[#allocation4 + $0x10] sm:$0xf] }
 0x212   :  { %v841_v29 = vpop.permute.xlu1 %840  ;;  %v839_v49 = vpop.permute.xlu0 %838  ;;  %v1640_v50 = vld [vmem:[#allocation4 + $0x18] sm:$0xf]  ;;  %v1639_v24 = vld [vmem:[#allocation4 + $0x10] sm:$0xf] }
 0x213   :  { %1365 = vrot.lane.b32.xlu1 %v1360_v35, %s3695_s15  ;;  %v853_v1 = vsel %vm848_vm12, %v837_v44, %v839_v49  ;;  %v854_v58 = vsel %vm848_vm12, %v839_v49, %v841_v29  ;;  %v1612_v25 = vld [vmem:[#allocation4 + $0x18] sm:$0xf]  ;;  %v1611_v19 = vld [vmem:[#allocation4 + $0x10] sm:$0xf]  ;;  %v1046_v35 = vld [vmem:[#allocation4] sm:$0xf] }
 0x214   :  { %1363 = vrot.lane.b32.xlu0 %v1359_v5, %s3695_s15  ;;  %v869_v55 = vmax.f32 %v820_v59, %v853_v1  ;;  %v870_v8 = vmax.f32 %v821_v60, %v854_v58  ;;  %v1584_v28 = vld [vmem:[#allocation4 + $0x18] sm:$0xf]  ;;  %v1583_v33 = vld [vmem:[#allocation4 + $0x10] sm:$0xf]  ;;  %v1017_v58 = vld [vmem:[#allocation4] sm:$0xf] }
 0x216   :  { %v888_v51 = vpop.permute.xlu1 %887  ;;  %v886_v53 = vpop.permute.xlu0 %885 }
 0x217   :  { %1337 = vrot.lane.b32.xlu1 %v1332_v52, %s3696_s2  ;;  %v901_v4 = vsel %vm4994_vm3, %v886_v53, %v888_v51  ;;  %v1050_v53 = vrot.slane %v1046_v35, 4  ;;  %v1923_v35 = vld [vmem:[#allocation4 + $0x10] sm:$0xf0] }
 0x218   :  { %1335 = vrot.lane.b32.xlu0 %v1331_v57, %s3696_s2  ;;  %v917_v54 = vmax.f32 %v869_v55, %v901_v4  ;;  %v988_v4 = vld [vmem:[#allocation4] sm:$0xf]  ;;  %v1373_v55 = vld [vmem:[#allocation4 + $0x8] sm:$0xf0] }
 0x21a   :  { %v934_v63 = vpop.permute.xlu1 %933  ;;  %v890_v3 = vpop.permute.xlu0 %889 }
 0x21b   :  { %1309 = vrot.lane.b32.xlu1 %v1304_v0, %s3690_s11  ;;  %v902_v7 = vsel %vm4995_vm2, %v888_v51, %v890_v3  ;;  %v1051_v51 = vrot.slane %v1047_v48, 4  ;;  %v1021_v0 = vrot.slane %v1017_v58, 4  ;;  %v989_v3 = vld [vmem:[#allocation4 + $0x8] sm:$0xf] }
 0x21c   :  { %1307 = vrot.lane.b32.xlu0 %v1303_v6, %s3690_s11  ;;  %v918_v9 = vmax.f32 %v870_v8, %v902_v7  ;;  %v993_v6 = vrot.slane %v989_v3, 4  ;;  %v992_v7 = vrot.slane %v988_v4, 4  ;;  %v1372_v8 = vld [vmem:[#allocation4] sm:$0xf0]  ;;  %v1867_v3 = vld [vmem:[#allocation4 + $0x10] sm:$0xf0] }
 0x21e   :  { %v938_v10 = vpop.permute.xlu1 %937  ;;  %v936_v11 = vpop.permute.xlu0 %935 }
 0x21f   :  { %1281 = vrot.lane.b32.xlu1 %v1276_v61, %s3686_s30  ;;  %v950_v12 = vsel %vm945_vm15, %v934_v63, %v936_v11  ;;  %v951_v13 = vsel %vm945_vm15, %v936_v11, %v938_v10  ;;  %v1022_v63 = vrot.slane %v1018_v2, 4  ;;  %v1345_v10 = vld [vmem:[#allocation4 + $0x8] sm:$0xf0]  ;;  %v1344_v61 = vld [vmem:[#allocation4] sm:$0xf0] }
 0x220   :  { %1279 = vrot.lane.b32.xlu0 %v1275_v62, %s3686_s30  ;;  %v966_v14 = vmax.f32 %v917_v54, %v950_v12  ;;  %v967_v15 = vmax.f32 %v918_v9, %v951_v13  ;;  %v1377_v54 = vrot.slane %v1373_v55, 4  ;;  %v1376_v9 = vrot.slane %v1372_v8, 4  ;;  %v1317_v12 = vld [vmem:[#allocation4 + $0x8] sm:$0xf0]  ;;  %v1316_v13 = vld [vmem:[#allocation4] sm:$0xf0] }
 0x221   :  { %v1349_v11 = vrot.slane %v1345_v10, 4  ;;  %v1348_v62 = vrot.slane %v1344_v61, 4  ;;  %v1840_v55 = vld [vmem:[#allocation4 + $0x18] sm:$0xf0] }
 0x222   :  { %974 = vst [vmem:[#allocation4 + $0x20] sm:$0xff] %v966_v14  ;;  %975 = vst.msk [vmem:[#allocation4 + $0x28] sm:$0xff] %vm591_vm7, %v967_v15  ;;  %v796_v17 = vpop.permute.xlu1 %795  ;;  %v794_v21 = vpop.permute.xlu0 %793  ;;  %v1321_v14 = vrot.slane %v1317_v12, 4  ;;  %v1320_v15 = vrot.slane %v1316_v13, 4 }
 0x223   :  { %1673 = vrot.lane.b32.xlu1 %v1668_v16, %s3693_s14  ;;  %v806_v46 = vsel %vm799_vm11, %v794_v21, %v796_v17  ;;  %v1289_v16 = vld [vmem:[#allocation4 + $0x8] sm:$0xf0] }
 0x224   :  { %1671 = vrot.lane.b32.xlu0 %v1667_v22, %s3693_s14  ;;  %v822_v41 = vmax.f32 %v4124_v34, %v806_v46  ;;  %v1293_v21 = vrot.slane %v1289_v16, 4  ;;  %v3697_v22 = vmov 0.0  }
 0x225   :  { %1195 = vmatprep.mubr.f32.mxu0 %v3697_v22  ;;  %1475 = vmatprep.mubr.f32.mxu1 %v3697_v22 }
 0x226   :  { %v843_v23 = vpop.permute.xlu1 %842  ;;  %v798_v20 = vpop.permute.xlu0 %797 }
 0x227   :  { %1645 = vrot.lane.b32.xlu1 %v1640_v50, %s3689_s1  ;;  %v807_v31 = vsel %vm799_vm11, %v796_v17, %v798_v20  ;;  %v1288_v17 = vld [vmem:[#allocation4] sm:$0xf0]  ;;  %v1652_v20 = vld [vmem:[#allocation4 + $0x10] sm:$0xf] }
 0x228   :  { %1643 = vrot.lane.b32.xlu0 %v1639_v24, %s3689_s1  ;;  %v823_v42 = vmax.f32 %v4126_v36, %v807_v31  ;;  %v1292_v50 = vrot.slane %v1288_v17, 4  ;;  %v1569_v31 = vld [vmem:[#allocation4 + $0x18] sm:$0xf] }
 0x229   :  { %v1573_v37 = vrot.slane %v1569_v31, 4  ;;  %v2231_v12 = vld [vmem:[#allocation4 + $0x20] sm:$0xf]  ;;  %v2217_v16 = vld [vmem:[#allocation4 + $0x28] sm:$0xf] }
 0x22a   :  { %v847_v26 = vpop.permute.xlu1 %846  ;;  %v845_v47 = vpop.permute.xlu0 %844  ;;  %v2203_v17 = vld [vmem:[#allocation4 + $0x20] sm:$0xf] }
 0x22b   :  { %1617 = vrot.lane.b32.xlu1 %v1612_v25, %s3694_s0  ;;  %v855_v38 = vsel %vm848_vm12, %v843_v23, %v845_v47  ;;  %v856_v39 = vsel %vm848_vm12, %v845_v47, %v847_v26  ;;  %v1653_v23 = vld [vmem:[#allocation4 + $0x18] sm:$0xf]  ;;  %v1656_v25 = vrot.slane %v1652_v20, 4  ;;  %v1624_v47 = vld [vmem:[#allocation4 + $0x10] sm:$0xf] }
 0x22c   :  { %1615 = vrot.lane.b32.xlu0 %v1611_v19, %s3694_s0  ;;  %v871_v49 = vmax.f32 %v822_v41, %v855_v38  ;;  %v872_v5 = vmax.f32 %v823_v42, %v856_v39  ;;  %v1657_v24 = vrot.slane %v1653_v23, 4  ;;  %v1625_v26 = vld [vmem:[#allocation4 + $0x18] sm:$0xf]  ;;  %v1937_v39 = vld [vmem:[#allocation4 + $0x18] sm:$0xf0]  ;;  %v2221_v23 = vrot.slane %v2217_v16, 4 }
 0x22d   :  { %v1629_v19 = vrot.slane %v1625_v26, 4  ;;  %v1941_v41 = vrot.slane %v1937_v39, 4  ;;  %v2161_v39 = vld [vmem:[#allocation4 + $0x28] sm:$0xf] }
 0x22e   :  { %v894_v18 = vpop.permute.xlu1 %893  ;;  %v892_v27 = vpop.permute.xlu0 %891 }
 0x22f   :  { %1589 = vrot.lane.b32.xlu1 %v1584_v28, %s3685_s29  ;;  %v903_v32 = vsel %vm4996_vm4, %v892_v27, %v894_v18  ;;  %v1628_v28 = vrot.slane %v1624_v47, 4  ;;  %v1596_v27 = vld [vmem:[#allocation4 + $0x10] sm:$0xf]  ;;  %v2176_v47 = vld [vmem:[#allocation4 + $0x28] sm:$0xf] }
 0x230   :  { %1587 = vrot.lane.b32.xlu0 %v1583_v33, %s3685_s29  ;;  %v919_v52 = vmax.f32 %v871_v49, %v903_v32  ;;  %v1600_v46 = vrot.slane %v1596_v27, 4  ;;  %v1568_v33 = vld [vmem:[#allocation4 + $0x10] sm:$0xf]  ;;  %v1924_v32 = vld [vmem:[#allocation4 + $0x18] sm:$0xf0] }
 0x231   :  { %v1572_v38 = vrot.slane %v1568_v33, 4  ;;  %v1880_v49 = vld [vmem:[#allocation4 + $0x10] sm:$0xf0] }
 0x232   :  { %v940_v44 = vpop.permute.xlu1 %939  ;;  %v896_v45 = vpop.permute.xlu0 %895 }
 0x233   :  { %1083 = vrot.lane.b32.xlu1 %v1080_v40, %s3695_s15  ;;  %v904_v29 = vsel %vm4997_vm8, %v894_v18, %v896_v45  ;;  %v1597_v18 = vld [vmem:[#allocation4 + $0x18] sm:$0xf]  ;;  %v1936_v40 = vld [vmem:[#allocation4 + $0x10] sm:$0xf0] }
 0x234   :  { %1081 = vrot.lane.b32.xlu0 %v1079_v43, %s3695_s15  ;;  %v920_v34 = vmax.f32 %v872_v5, %v904_v29  ;;  %v1601_v30 = vrot.slane %v1597_v18, 4  ;;  %v1940_v42 = vrot.slane %v1936_v40, 4  ;;  %v1909_v43 = vld [vmem:[#allocation4 + $0x18] sm:$0xf0]  ;;  %v2188_v18 = vld [vmem:[#allocation4 + $0x20] sm:$0xf] }
 0x235   :  { %v1913_v45 = vrot.slane %v1909_v43, 4  ;;  %v1881_v29 = vld [vmem:[#allocation4 + $0x18] sm:$0xf0]  ;;  %v2192_v31 = vrot.slane %v2188_v18, 4  ;;  %v2147_v40 = vld [vmem:[#allocation4 + $0x20] sm:$0xf] }
 0x236   :  { %v944_v36 = vpop.permute.xlu1 %943  ;;  %v942_v56 = vpop.permute.xlu0 %941  ;;  %v1885_v5 = vrot.slane %v1881_v29, 4  ;;  %v2165_v43 = vrot.slane %v2161_v39, 4  ;;  %v1266_v18 = vld [vmem:[#allocation4 + $0x8] sm:$0xf0]  ;;  %v1265_v39 = vld [vmem:[#allocation4] sm:$0xf0] }
 0x237   :  { %1054 = vrot.lane.b32.xlu1 %v1051_v51, %s3696_s2  ;;  %v952_v57 = vsel %vm945_vm15, %v940_v44, %v942_v56  ;;  %v953_v1 = vsel %vm945_vm15, %v942_v56, %v944_v36  ;;  %v1908_v44 = vld [vmem:[#allocation4 + $0x10] sm:$0xf0]  ;;  %v1884_v51 = vrot.slane %v1880_v49, 4  ;;  %vm1085_vm15 = vcmask 744448  }
 0x238   :  { %1052 = vrot.lane.b32.xlu0 %v1050_v53, %s3696_s2  ;;  %v968_v59 = vmax.f32 %v919_v52, %v952_v57  ;;  %v969_v60 = vmax.f32 %v920_v34, %v953_v1  ;;  %v1912_v48 = vrot.slane %v1908_v44, 4  ;;  %v1896_v52 = vld [vmem:[#allocation4 + $0x18] sm:$0xf0]  ;;  %v1895_v53 = vld [vmem:[#allocation4 + $0x10] sm:$0xf0] }
 0x239   :  { %v1853_v34 = vld [vmem:[#allocation4 + $0x18] sm:$0xf0]  ;;  %v1852_v36 = vld [vmem:[#allocation4 + $0x10] sm:$0xf0] }
 0x23a   :  { %976 = vst [vmem:[#allocation4 + $0x30] sm:$0xff] %v968_v59  ;;  %977 = vst.msk [vmem:[#allocation4 + $0x38] sm:$0xff] %vm591_vm7, %v969_v60  ;;  %v1857_v2 = vrot.slane %v1853_v34, 4  ;;  %v1856_v1 = vrot.slane %v1852_v36, 4 }
 0x23b   :  { %1025 = vrot.lane.b32.xlu1 %v1022_v63, %s3690_s11  ;;  %v1868_v63 = vld [vmem:[#allocation4 + $0x18] sm:$0xf0] }
 0x23c   :  { %1023 = vrot.lane.b32.xlu0 %v1021_v0, %s3690_s11 }
 0x23f   :  { %996 = vrot.lane.b32.xlu1 %v993_v6, %s3686_s30 }
 0x240   :  { %994 = vrot.lane.b32.xlu0 %v992_v7, %s3686_s30 }
 0x243   :  { %1380 = vrot.lane.b32.xlu1 %v1377_v54, %s3693_s14  ;;  %v1839_v54 = vld [vmem:[#allocation4 + $0x10] sm:$0xf0] }
 0x244   :  { %1378 = vrot.lane.b32.xlu0 %v1376_v9, %s3693_s14 }
 0x247   :  { %1352 = vrot.lane.b32.xlu1 %v1349_v11, %s3689_s1  ;;  %v2232_v11 = vld [vmem:[#allocation4 + $0x28] sm:$0xf] }
 0x248   :  { %1350 = vrot.lane.b32.xlu0 %v1348_v62, %s3689_s1 }
 0x24b   :  { %1324 = vrot.lane.b32.xlu1 %v1321_v14, %s3694_s0 }
 0x24c   :  { %1322 = vrot.lane.b32.xlu0 %v1320_v15, %s3694_s0  ;;  %v2204_v15 = vld [vmem:[#allocation4 + $0x28] sm:$0xf] }
 0x24f   :  { %1296 = vrot.lane.b32.xlu1 %v1293_v21, %s3685_s29  ;;  %v2216_v21 = vld [vmem:[#allocation4 + $0x20] sm:$0xf] }
 0x250   :  { %1294 = vrot.lane.b32.xlu0 %v1292_v50, %s3685_s29 }
 0x253   :  { %1660 = vrot.lane.b32.xlu1 %v1657_v24, %s3695_s15  ;;  %v2220_v24 = vrot.slane %v2216_v21, 4 }
 0x254   :  { %1658 = vrot.lane.b32.xlu0 %v1656_v25, %s3695_s15 }
 0x257   :  { %1632 = vrot.lane.b32.xlu1 %v1629_v19, %s3696_s2  ;;  %v2189_v19 = vld [vmem:[#allocation4 + $0x28] sm:$0xf] }
 0x258   :  { %1630 = vrot.lane.b32.xlu0 %v1628_v28, %s3696_s2  ;;  %v2175_v28 = vld [vmem:[#allocation4 + $0x20] sm:$0xf] }
 0x25b   :  { %1604 = vrot.lane.b32.xlu1 %v1601_v30, %s3690_s11  ;;  %v2193_v30 = vrot.slane %v2189_v19, 4  ;;  %v2459_v19 = vld [vmem:[#allocation4 + $0x20] sm:$0xf0] }
 0x25c   :  { %1602 = vrot.lane.b32.xlu0 %v1600_v46, %s3690_s11 }
 0x25f   :  { %1576 = vrot.lane.b32.xlu1 %v1573_v37, %s3686_s30 }
 0x260   :  { %1574 = vrot.lane.b32.xlu0 %v1572_v38, %s3686_s30  ;;  %v2148_v38 = vld [vmem:[#allocation4 + $0x28] sm:$0xf] }
 0x263   :  { %1944 = vrot.lane.b32.xlu1 %v1941_v41, %s3693_s14  ;;  %v2160_v41 = vld [vmem:[#allocation4 + $0x20] sm:$0xf] }
 0x264   :  { %1942 = vrot.lane.b32.xlu0 %v1940_v42, %s3693_s14 }
 0x267   :  { %1916 = vrot.lane.b32.xlu1 %v1913_v45, %s3689_s1  ;;  %v2164_v45 = vrot.slane %v2160_v41, 4 }
 0x268   :  { %1914 = vrot.lane.b32.xlu0 %v1912_v48, %s3689_s1  ;;  %v2133_v48 = vld [vmem:[#allocation4 + $0x28] sm:$0xf] }
 0x26b   :  { %1929 = vrot.lane.b32.xlu1 %v1924_v32, %s3695_s15  ;;  %v2132_v32 = vld [vmem:[#allocation4 + $0x20] sm:$0xf] }
 0x26c   :  { %1927 = vrot.lane.b32.xlu0 %v1923_v35, %s3695_s15  ;;  %v2137_v35 = vrot.slane %v2133_v48, 4 }
 0x26f   :  { %1888 = vrot.lane.b32.xlu1 %v1885_v5, %s3694_s0  ;;  %v2136_v5 = vrot.slane %v2132_v32, 4 }
 0x270   :  { %1886 = vrot.lane.b32.xlu0 %v1884_v51, %s3694_s0  ;;  %v2501_v51 = vld [vmem:[#allocation4 + $0x28] sm:$0xf0] }
 0x273   :  { %1901 = vrot.lane.b32.xlu1 %v1896_v52, %s3696_s2  ;;  %v2500_v52 = vld [vmem:[#allocation4 + $0x20] sm:$0xf0] }
 0x274   :  { %1899 = vrot.lane.b32.xlu0 %v1895_v53, %s3696_s2  ;;  %v2505_v53 = vrot.slane %v2501_v51, 4 }
 0x275   :  { %v1098_v56 = vpop.permute.xlu1 %1097 }
 0x276   :  { %1104 = vst.msk [vmem:[#allocation5 + $0x48] sm:$0xf] %vm986_vm5, %v1098_v56  ;;  %v1096_v57 = vpop.permute.xlu0 %1095 }
 0x277   :  { %v1100_v58 = vsel %vm1099_vm9, %v1096_v57, %v1098_v56  ;;  %1860 = vrot.lane.b32.xlu1 %v1857_v2, %s3685_s29  ;;  %v2504_v56 = vrot.slane %v2500_v52, 4  ;;  %v2473_v2 = vld [vmem:[#allocation4 + $0x28] sm:$0xf0]  ;;  %v2472_v57 = vld [vmem:[#allocation4 + $0x20] sm:$0xf0] }
 0x278   :  { %1103 = vst [vmem:[#allocation5 + $0x40] sm:$0xf] %v1100_v58  ;;  %1858 = vrot.lane.b32.xlu0 %v1856_v1, %s3685_s29  ;;  %v2477_v58 = vrot.slane %v2473_v2, 4 }
 0x279   :  { %v1069_v59 = vpop.permute.xlu1 %1068 }
 0x27a   :  { %1074 = vst.msk [vmem:[#allocation5 + $0x38] sm:$0xf] %vm986_vm5, %v1069_v59  ;;  %v1067_v60 = vpop.permute.xlu0 %1066 }
 0x27b   :  { %v1070_v0 = vsel %vm848_vm12, %v1067_v60, %v1069_v59  ;;  %1873 = vrot.lane.b32.xlu1 %v1868_v63, %s3690_s11  ;;  %v2476_v60 = vrot.slane %v2472_v57, 4 }
 0x27c   :  { %1073 = vst [vmem:[#allocation5 + $0x30] sm:$0xf] %v1070_v0  ;;  %1871 = vrot.lane.b32.xlu0 %v1867_v3, %s3690_s11 }
 0x27d   :  { %v1039_v4 = vpop.permute.xlu1 %1038  ;;  %v1116_v6 = vld [vmem:[#allocation5 + $0x48] sm:$0xf] }
 0x27e   :  { %1045 = vst.msk [vmem:[#allocation5 + $0x28] sm:$0xf] %vm986_vm5, %v1039_v4  ;;  %v1037_v7 = vpop.permute.xlu0 %1036  ;;  %3428 = vmatprep.subr.msk.mxu0 %vm1124_vm10, %v1116_v6  ;;  %v2445_v6 = vld [vmem:[#allocation4 + $0x28] sm:$0xf0] }
 0x27f   :  { %v1041_v8 = vsel %vm1040_vm13, %v1037_v7, %v1039_v4  ;;  %1845 = vrot.lane.b32.xlu1 %v1840_v55, %s3686_s30  ;;  %v1115_v9 = vld [vmem:[#allocation5 + $0x40] sm:$0xf]  ;;  %v2488_v4 = vld [vmem:[#allocation4 + $0x28] sm:$0xf0]  ;;  %v2487_v55 = vld [vmem:[#allocation4 + $0x20] sm:$0xf0] }
 0x280   :  { %1044 = vst [vmem:[#allocation5 + $0x20] sm:$0xf] %v1041_v8  ;;  %1843 = vrot.lane.b32.xlu0 %v1839_v54, %s3686_s30  ;;  %3429 = vmatpush1.msk.msra.mxu0 %vm1124_vm10, %v1115_v9  ;;  %v2444_v8 = vld [vmem:[#allocation4 + $0x20] sm:$0xf0] }
 0x281   :  { %v1011_v10 = vpop.permute.xlu1 %1010 }
 0x282   :  { %1016 = vst.msk [vmem:[#allocation5 + $0x18] sm:$0xf] %vm986_vm5, %v1011_v10  ;;  %v1009_v61 = vpop.permute.xlu0 %1008 }
 0x283   :  { %v1012_v62 = vsel %vm591_vm7, %v1009_v61, %v1011_v10  ;;  %2237 = vrot.lane.b32.xlu1 %v2232_v11, %s3693_s14  ;;  %v2449_v10 = vrot.slane %v2445_v6, 4  ;;  %v2448_v11 = vrot.slane %v2444_v8, 4 }
 0x284   :  { %1015 = vst [vmem:[#allocation5 + $0x10] sm:$0xf] %v1012_v62  ;;  %2235 = vrot.lane.b32.xlu0 %v2231_v12, %s3693_s14 }
 0x285   :  { %v4281_v13 = vpop.permute.xlu1 %1365 }
 0x286   :  { %v4283_v14 = vpop.permute.xlu0 %1363 }
 0x287   :  { %2209 = vrot.lane.b32.xlu1 %v2204_v15, %s3689_s1  ;;  %v1367_v62 = vsel %vm1085_vm15, %v4283_v14, %v4281_v13  ;;  %v2417_v14 = vld [vmem:[#allocation4 + $0x28] sm:$0xf0] }
 0x288   :  { %2207 = vrot.lane.b32.xlu0 %v2203_v17, %s3689_s1 }
 0x289   :  { %v4287_v50 = vpop.permute.xlu1 %1337 }
 0x28a   :  { %v4289_v20 = vpop.permute.xlu0 %1335 }
 0x28b   :  { %2224 = vrot.lane.b32.xlu1 %v2221_v23, %s3695_s15  ;;  %v1339_v23 = vsel %vm1056_vm6, %v4289_v20, %v4287_v50 }
 0x28c   :  { %2222 = vrot.lane.b32.xlu0 %v2220_v24, %s3695_s15 }
 0x28d   :  { %v4293_v25 = vpop.permute.xlu1 %1309 }
 0x28e   :  { %v4295_v26 = vpop.permute.xlu0 %1307 }
 0x28f   :  { %2181 = vrot.lane.b32.xlu1 %v2176_v47, %s3694_s0 }
 0x290   :  { %2179 = vrot.lane.b32.xlu0 %v2175_v28, %s3694_s0  ;;  %v2416_v28 = vld [vmem:[#allocation4 + $0x20] sm:$0xf0] }
 0x291   :  { %v4299_v27 = vpop.permute.xlu1 %1281  ;;  %v2420_v20 = vrot.slane %v2416_v28, 4 }
 0x292   :  { %v4301_v46 = vpop.permute.xlu0 %1279 }
 0x293   :  { %2196 = vrot.lane.b32.xlu1 %v2193_v30, %s3696_s2  ;;  %v1283_v51 = vsel %vm534_vm0, %v4301_v46, %v4299_v27  ;;  %v2404_v46 = vld [vmem:[#allocation4 + $0x28] sm:$0xf0] }
 0x294   :  { %2194 = vrot.lane.b32.xlu0 %v2192_v31, %s3696_s2 }
 0x295   :  { %v4305_v33 = vpop.permute.xlu1 %1673 }
 0x296   :  { %v4307_v37 = vpop.permute.xlu0 %1671 }
 0x297   :  { %2153 = vrot.lane.b32.xlu1 %v2148_v38, %s3685_s29  ;;  %v2421_v38 = vrot.slane %v2417_v14, 4  ;;  %v2780_v14 = vld [vmem:[#allocation4 + $0x30] sm:$0xf] }
 0x298   :  { %2151 = vrot.lane.b32.xlu0 %v2147_v40, %s3685_s29  ;;  %v1311_v40 = vsel %vm799_vm11, %v4295_v26, %v4293_v25  ;;  %v2432_v26 = vld [vmem:[#allocation4 + $0x28] sm:$0xf0] }
 0x299   :  { %v4311_v42 = vpop.permute.xlu1 %1645 }
 0x29a   :  { %v4313_v44 = vpop.permute.xlu0 %1643 }
 0x29b   :  { %2168 = vrot.lane.b32.xlu1 %v2165_v43, %s3690_s11 }
 0x29c   :  { %2166 = vrot.lane.b32.xlu0 %v2164_v45, %s3690_s11  ;;  %v1270_v45 = vrot.slane %v1266_v18, 4 }
 0x29d   :  { %v4317_v29 = vpop.permute.xlu1 %1617 }
 0x29e   :  { %v4319_v49 = vpop.permute.xlu0 %1615 }
 0x29f   :  { %2140 = vrot.lane.b32.xlu1 %v2137_v35, %s3686_s30  ;;  %v1269_v35 = vrot.slane %v1265_v39, 4 }
 0x2a0   :  { %2138 = vrot.lane.b32.xlu0 %v2136_v5, %s3686_s30  ;;  %v4368_v5 = vld [vmem:[#allocation9] sm:$0xff] }
 0x2a1   :  { %v4323_v34 = vpop.permute.xlu1 %1589 }
 0x2a2   :  { %v4325_v36 = vpop.permute.xlu0 %1587 }
 0x2a3   :  { %2508 = vrot.lane.b32.xlu1 %v2505_v53, %s3693_s14 }
 0x2a4   :  { %2506 = vrot.lane.b32.xlu0 %v2504_v56, %s3693_s14  ;;  %v2431_v56 = vld [vmem:[#allocation4 + $0x20] sm:$0xf0] }
 0x2a5   :  { %v1084_v1 = vpop.permute.xlu1 %1083 }
 0x2a6   :  { %1090 = vst.msk [vmem:[#allocation5 + $0x38] sm:$0xf0] %vm1002_vm14, %v1084_v1  ;;  %v1082_v59 = vpop.permute.xlu0 %1081 }
 0x2a7   :  { %v1086_v63 = vsel %vm1085_vm15, %v1082_v59, %v1084_v1  ;;  %2480 = vrot.lane.b32.xlu1 %v2477_v58, %s3689_s1  ;;  %v1106_v1 = vld [vmem:[#allocation9 + $0x8] sm:$0xf]  ;;  %v1675_v58 = vsel %vm1099_vm9, %v4307_v37, %v4305_v33 }
 0x2a8   :  { %1089 = vst [vmem:[#allocation5 + $0x30] sm:$0xf0] %v1086_v63  ;;  %2478 = vrot.lane.b32.xlu0 %v2476_v60, %s3689_s1  ;;  %v2403_v60 = vld [vmem:[#allocation4 + $0x20] sm:$0xf0]  ;;  %v2796_v37 = vld [vmem:[#allocation4 + $0x38] sm:$0xf] }
 0x2a9   :  { %v1055_v0 = vpop.permute.xlu1 %1054 }
 0x2aa   :  { %1061 = vst.msk [vmem:[#allocation5 + $0x28] sm:$0xf0] %vm1002_vm14, %v1055_v0  ;;  %v1053_v3 = vpop.permute.xlu0 %1052 }
 0x2ab   :  { %v1057_v7 = vsel %vm1056_vm6, %v1053_v3, %v1055_v0  ;;  %2493 = vrot.lane.b32.xlu1 %v2488_v4, %s3695_s15  ;;  %v1565_v0 = vld [vmem:[#allocation4 + $0x18] sm:$0xf] }
 0x2ac   :  { %1060 = vst [vmem:[#allocation5 + $0x20] sm:$0xf0] %v1057_v7  ;;  %2491 = vrot.lane.b32.xlu0 %v2487_v55, %s3695_s15  ;;  %v1564_v7 = vld [vmem:[#allocation4 + $0x10] sm:$0xf]  ;;  %v1647_v55 = vsel %vm848_vm12, %v4313_v44, %v4311_v42  ;;  %v2768_v44 = vld [vmem:[#allocation4 + $0x38] sm:$0xf] }
 0x2ad   :  { %v1114_v54 = vld [vmem:[#allocation5 + $0x38] sm:$0xff]  ;;  %v1026_v9 = vpop.permute.xlu1 %1025 }
 0x2ae   :  { %1371 = vst.msk [vmem:[#allocation5 + $0x38] sm:$0xf0] %vm1002_vm14, %v4281_v13  ;;  %1031 = vst.msk [vmem:[#allocation5 + $0x18] sm:$0xf0] %vm1002_vm14, %v1026_v9  ;;  %v1024_v61 = vpop.permute.xlu0 %1023  ;;  %1155 = vmatprep.subr.mxu0 %v1114_v54  ;;  %v2460_v13 = vld [vmem:[#allocation4 + $0x28] sm:$0xf0] }
 0x2af   :  { %v1113_v12 = vld [vmem:[#allocation5 + $0x30] sm:$0xff]  ;;  %v1027_v15 = vsel %vm799_vm11, %v1024_v61, %v1026_v9  ;;  %2452 = vrot.lane.b32.xlu1 %v2449_v10, %s3694_s0 }
 0x2b0   :  { %1370 = vst [vmem:[#allocation5 + $0x30] sm:$0xf0] %v1367_v62  ;;  %1030 = vst [vmem:[#allocation5 + $0x10] sm:$0xf0] %v1027_v15  ;;  %2450 = vrot.lane.b32.xlu0 %v2448_v11, %s3694_s0  ;;  %1156 = vmatpush1.msra.mxu0 %v1113_v12  ;;  %v2795_v10 = vld [vmem:[#allocation4 + $0x30] sm:$0xf] }
 0x2b1   :  { %v1112_v16 = vld [vmem:[#allocation5 + $0x28] sm:$0xff]  ;;  %v997_v17 = vpop.permute.xlu1 %996  ;;  %v2767_v12 = vld [vmem:[#allocation4 + $0x30] sm:$0xf]  ;;  %v2781_v15 = vld [vmem:[#allocation4 + $0x38] sm:$0xf] }
 0x2b2   :  { %1343 = vst.msk [vmem:[#allocation5 + $0x28] sm:$0xf0] %vm1002_vm14, %v4287_v50  ;;  %1003 = vst.msk [vmem:[#allocation5 + $0x8] sm:$0xf0] %vm1002_vm14, %v997_v17  ;;  %v995_v21 = vpop.permute.xlu0 %994  ;;  %1157 = vmatprep.subr.mxu0 %v1112_v16  ;;  %v1619_v16 = vsel %vm1040_vm13, %v4319_v49, %v4317_v29  ;;  %v2784_v49 = vrot.slane %v2780_v14, 4 }
 0x2b3   :  { %v1111_v24 = vld [vmem:[#allocation5 + $0x20] sm:$0xff]  ;;  %v998_v47 = vsel %vm534_vm0, %v995_v21, %v997_v17  ;;  %2465 = vrot.lane.b32.xlu1 %v2460_v13, %s3696_s2  ;;  %v3037_v14 = vld [vmem:[#allocation4 + $0x38] sm:$0xf0] }
 0x2b4   :  { %1342 = vst [vmem:[#allocation5 + $0x20] sm:$0xf0] %v1339_v23  ;;  %1001 = vst [vmem:[#allocation5] sm:$0xf0] %v998_v47  ;;  %2463 = vrot.lane.b32.xlu0 %v2459_v19, %s3696_s2  ;;  %1158 = vmatpush1.msra.mxu0 %v1111_v24  ;;  %v2785_v47 = vrot.slane %v2781_v15, 4  ;;  %v1591_v19 = vsel %vm591_vm7, %v4325_v36, %v4323_v34 }
 0x2b5   :  { %v1110_v30 = vld [vmem:[#allocation5 + $0x18] sm:$0xff]  ;;  %v1381_v31 = vpop.permute.xlu1 %1380  ;;  %v3064_v15 = vld [vmem:[#allocation4 + $0x30] sm:$0xf0] }
 0x2b6   :  { %1315 = vst.msk [vmem:[#allocation5 + $0x18] sm:$0xf0] %vm1002_vm14, %v4293_v25  ;;  %v1379_v50 = vpop.permute.xlu0 %1378  ;;  %1159 = vmatprep.subr.mxu0 %v1110_v30 }
 0x2b7   :  { %1386 = vst.msk [vmem:[#allocation5 + $0x48] sm:$0xf] %vm986_vm5, %v1381_v31  ;;  %v1109_v41 = vld [vmem:[#allocation5 + $0x10] sm:$0xff]  ;;  %v1382_v43 = vsel %vm1099_vm9, %v1379_v50, %v1381_v31  ;;  %2424 = vrot.lane.b32.xlu1 %v2421_v38, %s3685_s29  ;;  %v2740_v50 = vld [vmem:[#allocation4 + $0x38] sm:$0xf] }
 0x2b8   :  { %1314 = vst [vmem:[#allocation5 + $0x10] sm:$0xf0] %v1311_v40  ;;  %1385 = vst [vmem:[#allocation5 + $0x40] sm:$0xf] %v1382_v43  ;;  %2422 = vrot.lane.b32.xlu0 %v2420_v20, %s3685_s29  ;;  %1160 = vmatpush1.msra.mxu0 %v1109_v41  ;;  %v2739_v20 = vld [vmem:[#allocation4 + $0x30] sm:$0xf] }
 0x2b9   :  { %v1108_v48 = vld [vmem:[#allocation5 + $0x8] sm:$0xff]  ;;  %v1353_v32 = vpop.permute.xlu1 %1352  ;;  %v2752_v40 = vld [vmem:[#allocation4 + $0x30] sm:$0xf]  ;;  %v1388_v41 = vld [vmem:[#allocation9 + $0x8] sm:$0xf] }
 0x2ba   :  { %1287 = vst.msk [vmem:[#allocation5 + $0x8] sm:$0xf0] %vm1002_vm14, %v4299_v27  ;;  %v1351_v25 = vpop.permute.xlu0 %1350  ;;  %1161 = vmatprep.subr.mxu0 %v1108_v48 }
 0x2bb   :  { %1274 = vst.msk [vmem:[#allocation5 + $0x8] sm:$0xf] %vm986_vm5, %v1270_v45  ;;  %1358 = vst.msk [vmem:[#allocation5 + $0x38] sm:$0xf] %vm986_vm5, %v1353_v32  ;;  %v1107_v52 = vld [vmem:[#allocation5] sm:$0xff]  ;;  %v1354_v53 = vsel %vm848_vm12, %v1351_v25, %v1353_v32  ;;  %2437 = vrot.lane.b32.xlu1 %v2432_v26, %s3690_s11 }
 0x2bc   :  { %1273 = vst [vmem:[#allocation5] sm:$0xf] %v1269_v35  ;;  %1286 = vst [vmem:[#allocation5] sm:$0xf0] %v1283_v51  ;;  %2435 = vrot.lane.b32.xlu0 %v2431_v56, %s3690_s11  ;;  %1162 = vmatpush1.msra.mxu0 %v1107_v52  ;;  %v2756_v35 = vrot.slane %v2752_v40, 4 }
 0x2bd   :  { %1357 = vst [vmem:[#allocation5 + $0x30] sm:$0xf] %v1354_v53  ;;  %v1325_v2 = vpop.permute.xlu1 %1324  ;;  %3430 = vmatmul.mubr.msk.f32.vlgmr.msra.gmra.mxu0 %vm1117_vm1, %v4368_v5  ;;  %v1830_v51 = vld [vmem:[#allocation4 + $0x18] sm:$0xf0]  ;;  %v1829_v56 = vld [vmem:[#allocation4 + $0x10] sm:$0xf0] }
 0x2be   :  { %v1398_v57 = vld [vmem:[#allocation5 + $0x48] sm:$0xf]  ;;  %1330 = vst.msk [vmem:[#allocation5 + $0x28] sm:$0xf] %vm986_vm5, %v1325_v2  ;;  %v1323_v27 = vpop.permute.xlu0 %1322  ;;  %1201 = vmatprep.mubr.f32.mxu0 %v3697_v22 }
 0x2bf   :  { %3436 = vmatprep.subr.msk.mxu1 %vm1124_vm10, %v1398_v57  ;;  %1679 = vst.msk [vmem:[#allocation5 + $0x48] sm:$0xf] %vm986_vm5, %v4305_v33  ;;  %v1326_v59 = vsel %vm1040_vm13, %v1323_v27, %v1325_v2  ;;  %2409 = vrot.lane.b32.xlu1 %v2404_v46, %s3686_s30  ;;  %v1397_v63 = vld [vmem:[#allocation5 + $0x40] sm:$0xf]  ;;  %v2712_v57 = vld [vmem:[#allocation4 + $0x38] sm:$0xf] }
 0x2c0   :  { %1329 = vst [vmem:[#allocation5 + $0x20] sm:$0xf] %v1326_v59  ;;  %2407 = vrot.lane.b32.xlu0 %v2403_v60, %s3686_s30  ;;  %3437 = vmatpush1.msk.msra.mxu1 %vm1124_vm10, %v1397_v63  ;;  %1678 = vst [vmem:[#allocation5 + $0x40] sm:$0xf] %v1675_v58  ;;  %v2725_v27 = vld [vmem:[#allocation4 + $0x38] sm:$0xf] }
 0x2c1   :  { %v1297_v4 = vpop.permute.xlu1 %1296  ;;  %3431 = vmatmul.mubr.msk.f32.gmra.mxu0 %vm1117_vm1, %v1106_v1  ;;  %v2711_v1 = vld [vmem:[#allocation4 + $0x30] sm:$0xf]  ;;  %v1834_v60 = vrot.slane %v1830_v51, 4  ;;  %v3024_v51 = vld [vmem:[#allocation4 + $0x38] sm:$0xf0] }
 0x2c2   :  { %v1396_v3 = vld [vmem:[#allocation5 + $0x38] sm:$0xff]  ;;  %v1390_v6 = vld [vmem:[#allocation5 + $0x8] sm:$0xff]  ;;  %1302 = vst.msk [vmem:[#allocation5 + $0x18] sm:$0xf] %vm986_vm5, %v1297_v4  ;;  %v1295_v33 = vpop.permute.xlu0 %1294  ;;  %1768 = vmatprep.mubr.f32.mxu0 %v3697_v22  ;;  %v2724_v59 = vld [vmem:[#allocation4 + $0x30] sm:$0xf] }
 0x2c3   :  { %1651 = vst.msk [vmem:[#allocation5 + $0x38] sm:$0xf] %vm986_vm5, %v4311_v42  ;;  %1435 = vmatprep.subr.mxu1 %v1396_v3  ;;  %1567 = vst.msk [vmem:[#allocation5 + $0x8] sm:$0xf] %vm986_vm5, %v1565_v0  ;;  %v1389_v8 = vld [vmem:[#allocation5] sm:$0xff]  ;;  %v1298_v9 = vsel %vm591_vm7, %v1295_v33, %v1297_v4  ;;  %2801 = vrot.lane.b32.xlu1 %v2796_v37, %s3693_s14  ;;  %v2729_v3 = vrot.slane %v2725_v27, 4 }
 0x2c4   :  { %v1395_v54 = vld [vmem:[#allocation5 + $0x30] sm:$0xff]  ;;  %1566 = vst [vmem:[#allocation5] sm:$0xf] %v1564_v7  ;;  %1301 = vst [vmem:[#allocation5 + $0x10] sm:$0xf] %v1298_v9  ;;  %2799 = vrot.lane.b32.xlu0 %v2795_v10, %s3693_s14  ;;  %v1833_v4 = vrot.slane %v1829_v56, 4 }
 0x2c5   :  { %1650 = vst [vmem:[#allocation5 + $0x30] sm:$0xf] %v1647_v55  ;;  %1436 = vmatpush1.msra.mxu1 %v1395_v54  ;;  %v1394_v61 = vld [vmem:[#allocation5 + $0x28] sm:$0xff]  ;;  %v1661_v11 = vpop.permute.xlu1 %1660  ;;  %v2728_v7 = vrot.slane %v2724_v59, 4  ;;  %v2697_v33 = vld [vmem:[#allocation4 + $0x38] sm:$0xf] }
 0x2c6   :  { %v1691_v62 = vld [vmem:[#allocation5 + $0x48] sm:$0xf]  ;;  %1623 = vst.msk [vmem:[#allocation5 + $0x28] sm:$0xf] %vm986_vm5, %v4317_v29  ;;  %v1659_v42 = vpop.permute.xlu0 %1658  ;;  %1437 = vmatprep.subr.mxu1 %v1394_v61  ;;  %v2701_v10 = vrot.slane %v2697_v33, 4 }
 0x2c7   :  { %1666 = vst.msk [vmem:[#allocation5 + $0x38] sm:$0xf0] %vm1002_vm14, %v1661_v11  ;;  %3444 = vmatprep.subr.msk.mxu0 %vm1124_vm10, %v1691_v62  ;;  %v1393_v17 = vld [vmem:[#allocation5 + $0x20] sm:$0xff]  ;;  %v1662_v21 = vsel %vm1085_vm15, %v1659_v42, %v1661_v11  ;;  %2773 = vrot.lane.b32.xlu1 %v2768_v44, %s3689_s1  ;;  %v3065_v62 = vld [vmem:[#allocation4 + $0x38] sm:$0xf0] }
 0x2c8   :  { %v1690_v13 = vld [vmem:[#allocation5 + $0x40] sm:$0xf]  ;;  %1622 = vst [vmem:[#allocation5 + $0x20] sm:$0xf] %v1619_v16  ;;  %1665 = vst [vmem:[#allocation5 + $0x30] sm:$0xf0] %v1662_v21  ;;  %2771 = vrot.lane.b32.xlu0 %v2767_v12, %s3689_s1  ;;  %1438 = vmatpush1.msra.mxu1 %v1393_v17 }
 0x2c9   :  { %v1392_v23 = vld [vmem:[#allocation5 + $0x18] sm:$0xff]  ;;  %3445 = vmatpush1.msk.msra.mxu0 %vm1124_vm10, %v1690_v13  ;;  %v1633_v24 = vpop.permute.xlu1 %1632  ;;  %v3069_v17 = vrot.slane %v3065_v62, 4  ;;  %v3068_v13 = vrot.slane %v3064_v15, 4  ;;  %v3023_v56 = vld [vmem:[#allocation4 + $0x30] sm:$0xf0] }
 0x2ca   :  { %1595 = vst.msk [vmem:[#allocation5 + $0x18] sm:$0xf] %vm986_vm5, %v4323_v34  ;;  %v1631_v29 = vpop.permute.xlu0 %1630  ;;  %1439 = vmatprep.subr.mxu1 %v1392_v23  ;;  %v2753_v34 = vld [vmem:[#allocation4 + $0x38] sm:$0xf]  ;;  %v2967_v62 = vld [vmem:[#allocation4 + $0x30] sm:$0xf0] }
 0x2cb   :  { %1638 = vst.msk [vmem:[#allocation5 + $0x28] sm:$0xf0] %vm1002_vm14, %v1633_v24  ;;  %v1391_v28 = vld [vmem:[#allocation5 + $0x10] sm:$0xff]  ;;  %v1634_v18 = vsel %vm1056_vm6, %v1631_v29, %v1633_v24  ;;  %2788 = vrot.lane.b32.xlu1 %v2785_v47, %s3695_s15  ;;  %v2757_v48 = vrot.slane %v2753_v34, 4  ;;  %v1681_v42 = vld [vmem:[#allocation9 + $0x8] sm:$0xf] }
 0x2cc   :  { %1594 = vst [vmem:[#allocation5 + $0x10] sm:$0xf] %v1591_v19  ;;  %1637 = vst [vmem:[#allocation5 + $0x20] sm:$0xf0] %v1634_v18  ;;  %2786 = vrot.lane.b32.xlu0 %v2784_v49, %s3695_s15  ;;  %1440 = vmatpush1.msra.mxu1 %v1391_v28  ;;  %v3036_v24 = vld [vmem:[#allocation4 + $0x30] sm:$0xf0] }
 0x2cd   :  { %1441 = vmatprep.subr.mxu1 %v1390_v6  ;;  %v1605_v30 = vpop.permute.xlu1 %1604  ;;  %v3041_v49 = vrot.slane %v3037_v14, 4  ;;  %v3040_v28 = vrot.slane %v3036_v24, 4  ;;  %v3009_v34 = vld [vmem:[#allocation4 + $0x38] sm:$0xf0] }
 0x2ce   :  { %v1689_v31 = vld [vmem:[#allocation5 + $0x38] sm:$0xff]  ;;  %1610 = vst.msk [vmem:[#allocation5 + $0x18] sm:$0xf0] %vm1002_vm14, %v1605_v30  ;;  %1442 = vmatpush1.msra.mxu1 %v1389_v8  ;;  %v1603_v38 = vpop.permute.xlu0 %1602  ;;  %v2696_v8 = vld [vmem:[#allocation4 + $0x30] sm:$0xf] }
 0x2cf   :  { %1728 = vmatprep.subr.mxu0 %v1689_v31  ;;  %v1606_v36 = vsel %vm799_vm11, %v1603_v38, %v1605_v30  ;;  %2745 = vrot.lane.b32.xlu1 %v2740_v50, %s3694_s0  ;;  %v1688_v39 = vld [vmem:[#allocation5 + $0x30] sm:$0xff]  ;;  %v2700_v11 = vrot.slane %v2696_v8, 4  ;;  %v3052_v50 = vld [vmem:[#allocation4 + $0x38] sm:$0xf0] }
 0x2d0   :  { %3438 = vmatmul.mubr.msk.f32.vlgmr.msra.gmra.mxu1 %vm1117_vm1, %v4368_v5  ;;  %1609 = vst [vmem:[#allocation5 + $0x10] sm:$0xf0] %v1606_v36  ;;  %2743 = vrot.lane.b32.xlu0 %v2739_v20, %s3694_s0  ;;  %v3051_v20 = vld [vmem:[#allocation4 + $0x30] sm:$0xf0] }
 0x2d1   :  { %1729 = vmatpush1.msra.mxu0 %v1688_v39  ;;  %v1577_v43 = vpop.permute.xlu1 %1576  ;;  %1481 = vmatprep.mubr.f32.mxu1 %v3697_v22  ;;  %v3008_v39 = vld [vmem:[#allocation4 + $0x30] sm:$0xf0] }
 0x2d2   :  { %v1687_v45 = vld [vmem:[#allocation5 + $0x28] sm:$0xff]  ;;  %1582 = vst.msk [vmem:[#allocation5 + $0x8] sm:$0xf0] %vm1002_vm14, %v1577_v43  ;;  %v1575_v32 = vpop.permute.xlu0 %1574 }
 0x2d3   :  { %1730 = vmatprep.subr.mxu0 %v1687_v45  ;;  %v1578_v25 = vsel %vm534_vm0, %v1575_v32, %v1577_v43  ;;  %2760 = vrot.lane.b32.xlu1 %v2757_v48, %s3696_s2  ;;  %v1686_v26 = vld [vmem:[#allocation5 + $0x20] sm:$0xff]  ;;  %v3013_v43 = vrot.slane %v3009_v34, 4  ;;  %v3012_v48 = vrot.slane %v3008_v39, 4 }
 0x2d4   :  { %3439 = vmatmul.mubr.msk.f32.gmra.mxu1 %vm1117_vm1, %v1388_v41  ;;  %1581 = vst [vmem:[#allocation5] sm:$0xf0] %v1578_v25  ;;  %2758 = vrot.lane.b32.xlu0 %v2756_v35, %s3696_s2  ;;  %v2393_v39 = vld [vmem:[#allocation4 + $0x20] sm:$0xf0] }
 0x2d5   :  { %1731 = vmatpush1.msra.mxu0 %v1686_v26  ;;  %v1945_v52 = vpop.permute.xlu1 %1944  ;;  %v1685_v53 = vld [vmem:[#allocation5 + $0x18] sm:$0xff]  ;;  %2039 = vmatprep.mubr.f32.mxu1 %v3697_v22 }
 0x2d6   :  { %1950 = vst.msk [vmem:[#allocation5 + $0x48] sm:$0xf] %vm986_vm5, %v1945_v52  ;;  %v1943_v2 = vpop.permute.xlu0 %1942  ;;  %1732 = vmatprep.subr.mxu0 %v1685_v53 }
 0x2d7   :  { %v1946_v46 = vsel %vm1099_vm9, %v1943_v2, %v1945_v52  ;;  %2717 = vrot.lane.b32.xlu1 %v2712_v57, %s3685_s29  ;;  %v1684_v58 = vld [vmem:[#allocation5 + $0x10] sm:$0xff]  ;;  %v2981_v52 = vld [vmem:[#allocation4 + $0x38] sm:$0xf0] }
 0x2d8   :  { %1949 = vst [vmem:[#allocation5 + $0x40] sm:$0xf] %v1946_v46  ;;  %2715 = vrot.lane.b32.xlu0 %v2711_v1, %s3685_s29  ;;  %1733 = vmatpush1.msra.mxu0 %v1684_v58  ;;  %v2980_v2 = vld [vmem:[#allocation4 + $0x30] sm:$0xf0]  ;;  %v2985_v46 = vrot.slane %v2981_v52, 4 }
 0x2d9   :  { %v1917_v63 = vpop.permute.xlu1 %1916  ;;  %v1683_v0 = vld [vmem:[#allocation5 + $0x8] sm:$0xff]  ;;  %v2984_v58 = vrot.slane %v2980_v2, 4 }
 0x2da   :  { %1922 = vst.msk [vmem:[#allocation5 + $0x38] sm:$0xf] %vm986_vm5, %v1917_v63  ;;  %v1915_v6 = vpop.permute.xlu0 %1914  ;;  %1734 = vmatprep.subr.mxu0 %v1683_v0  ;;  %1838 = vst.msk [vmem:[#allocation5 + $0x8] sm:$0xf] %vm986_vm5, %v1834_v60 }
 0x2db   :  { %v1918_v37 = vsel %vm848_vm12, %v1915_v6, %v1917_v63  ;;  %2732 = vrot.lane.b32.xlu1 %v2729_v3, %s3690_s11  ;;  %v1682_v55 = vld [vmem:[#allocation5] sm:$0xff]  ;;  %v2129_v63 = vld [vmem:[#allocation4 + $0x28] sm:$0xf]  ;;  %v2996_v6 = vld [vmem:[#allocation4 + $0x38] sm:$0xf0] }
 0x2dc   :  { %1921 = vst [vmem:[#allocation5 + $0x30] sm:$0xf] %v1918_v37  ;;  %2730 = vrot.lane.b32.xlu0 %v2728_v7, %s3690_s11  ;;  %1735 = vmatpush1.msra.mxu0 %v1682_v55  ;;  %1837 = vst [vmem:[#allocation5] sm:$0xf] %v1833_v4  ;;  %v2128_v7 = vld [vmem:[#allocation4 + $0x20] sm:$0xf] }
 0x2dd   :  { %v1930_v54 = vpop.permute.xlu1 %1929  ;;  %v1962_v9 = vld [vmem:[#allocation5 + $0x48] sm:$0xf]  ;;  %3446 = vmatmul.mubr.msk.f32.vlgmr.msra.gmra.mxu0 %vm1117_vm1, %v4368_v5  ;;  %v2995_v37 = vld [vmem:[#allocation4 + $0x30] sm:$0xf0] }
 0x2de   :  { %1935 = vst.msk [vmem:[#allocation5 + $0x38] sm:$0xf0] %vm1002_vm14, %v1930_v54  ;;  %v1928_v61 = vpop.permute.xlu0 %1927  ;;  %3452 = vmatprep.subr.msk.mxu1 %vm1124_vm10, %v1962_v9  ;;  %1774 = vmatprep.mubr.f32.mxu0 %v3697_v22 }
 0x2df   :  { %v1931_v44 = vsel %vm1085_vm15, %v1928_v61, %v1930_v54  ;;  %2704 = vrot.lane.b32.xlu1 %v2701_v10, %s3686_s30  ;;  %v1961_v12 = vld [vmem:[#allocation5 + $0x40] sm:$0xf]  ;;  %v2968_v10 = vld [vmem:[#allocation4 + $0x38] sm:$0xf0]  ;;  %v1952_v61 = vld [vmem:[#allocation9 + $0x8] sm:$0xf] }
 0x2e0   :  { %1934 = vst [vmem:[#allocation5 + $0x30] sm:$0xf0] %v1931_v44  ;;  %2702 = vrot.lane.b32.xlu0 %v2700_v11, %s3686_s30  ;;  %3453 = vmatpush1.msk.msra.mxu1 %vm1124_vm10, %v1961_v12 }
 0x2e1   :  { %v1889_v16 = vpop.permute.xlu1 %1888  ;;  %3447 = vmatmul.mubr.msk.f32.gmra.mxu0 %vm1117_vm1, %v1681_v42 }
 0x2e2   :  { %1894 = vst.msk [vmem:[#allocation5 + $0x28] sm:$0xf] %vm986_vm5, %v1889_v16  ;;  %v1887_v21 = vpop.permute.xlu0 %1886  ;;  %2332 = vmatprep.mubr.f32.mxu0 %v3697_v22 }
 0x2e3   :  { %v1890_v23 = vsel %vm1040_vm13, %v1887_v21, %v1889_v16  ;;  %3072 = vrot.lane.b32.xlu1 %v3069_v17, %s3693_s14 }
 0x2e4   :  { %1893 = vst [vmem:[#allocation5 + $0x20] sm:$0xf] %v1890_v23  ;;  %3070 = vrot.lane.b32.xlu0 %v3068_v13, %s3693_s14 }
 0x2e5   :  { %v1902_v47 = vpop.permute.xlu1 %1901  ;;  %v1960_v29 = vld [vmem:[#allocation5 + $0x38] sm:$0xff] }
 0x2e6   :  { %1907 = vst.msk [vmem:[#allocation5 + $0x28] sm:$0xf0] %vm1002_vm14, %v1902_v47  ;;  %v1900_v19 = vpop.permute.xlu0 %1899  ;;  %1999 = vmatprep.subr.mxu1 %v1960_v29 }
 0x2e7   :  { %v1903_v18 = vsel %vm1056_vm6, %v1900_v19, %v1902_v47  ;;  %3044 = vrot.lane.b32.xlu1 %v3041_v49, %s3689_s1  ;;  %v1959_v30 = vld [vmem:[#allocation5 + $0x30] sm:$0xff] }
 0x2e8   :  { %1906 = vst [vmem:[#allocation5 + $0x20] sm:$0xf0] %v1903_v18  ;;  %3042 = vrot.lane.b32.xlu0 %v3040_v28, %s3689_s1  ;;  %2000 = vmatpush1.msra.mxu1 %v1959_v30 }
 0x2e9   :  { %v1861_v31 = vpop.permute.xlu1 %1860 }
 0x2ea   :  { %1866 = vst.msk [vmem:[#allocation5 + $0x18] sm:$0xf] %vm986_vm5, %v1861_v31  ;;  %v1859_v38 = vpop.permute.xlu0 %1858 }
 0x2eb   :  { %v1862_v36 = vsel %vm591_vm7, %v1859_v38, %v1861_v31  ;;  %3057 = vrot.lane.b32.xlu1 %v3052_v50, %s3695_s15  ;;  %v2394_v50 = vld [vmem:[#allocation4 + $0x28] sm:$0xf0] }
 0x2ec   :  { %1865 = vst [vmem:[#allocation5 + $0x10] sm:$0xf] %v1862_v36  ;;  %3055 = vrot.lane.b32.xlu0 %v3051_v20, %s3695_s15 }
 0x2ed   :  { %v1874_v40 = vpop.permute.xlu1 %1873  ;;  %v1958_v41 = vld [vmem:[#allocation5 + $0x28] sm:$0xff] }
 0x2ee   :  { %1879 = vst.msk [vmem:[#allocation5 + $0x18] sm:$0xf0] %vm1002_vm14, %v1874_v40  ;;  %v1872_v45 = vpop.permute.xlu0 %1871  ;;  %2001 = vmatprep.subr.mxu1 %v1958_v41 }
 0x2ef   :  { %v1875_v32 = vsel %vm799_vm11, %v1872_v45, %v1874_v40  ;;  %3016 = vrot.lane.b32.xlu1 %v3013_v43, %s3694_s0  ;;  %v1957_v35 = vld [vmem:[#allocation5 + $0x20] sm:$0xff]  ;;  %v2398_v43 = vrot.slane %v2394_v50, 4 }
 0x2f0   :  { %1878 = vst [vmem:[#allocation5 + $0x10] sm:$0xf0] %v1875_v32  ;;  %3014 = vrot.lane.b32.xlu0 %v3012_v48, %s3694_s0  ;;  %2002 = vmatpush1.msra.mxu1 %v1957_v35  ;;  %v2397_v32 = vrot.slane %v2393_v39, 4 }
 0x2f1   :  { %v1846_v25 = vpop.permute.xlu1 %1845 }
 0x2f2   :  { %1851 = vst.msk [vmem:[#allocation5 + $0x8] sm:$0xf0] %vm1002_vm14, %v1846_v25  ;;  %v1844_v26 = vpop.permute.xlu0 %1843 }
 0x2f3   :  { %v1847_v53 = vsel %vm534_vm0, %v1844_v26, %v1846_v25  ;;  %3029 = vrot.lane.b32.xlu1 %v3024_v51, %s3696_s2 }
 0x2f4   :  { %1850 = vst [vmem:[#allocation5] sm:$0xf0] %v1847_v53  ;;  %3027 = vrot.lane.b32.xlu0 %v3023_v56, %s3696_s2  ;;  %v2245_v56 = vld [vmem:[#allocation9 + $0x8] sm:$0xf] }
 0x2f5   :  { %v2238_v57 = vpop.permute.xlu1 %2237  ;;  %v1956_v27 = vld [vmem:[#allocation5 + $0x18] sm:$0xff] }
 0x2f6   :  { %2243 = vst.msk [vmem:[#allocation5 + $0x48] sm:$0xf] %vm986_vm5, %v2238_v57  ;;  %v2236_v1 = vpop.permute.xlu0 %2235  ;;  %2003 = vmatprep.subr.mxu1 %v1956_v27 }
 0x2f7   :  { %v2239_v59 = vsel %vm1099_vm9, %v2236_v1, %v2238_v57  ;;  %2988 = vrot.lane.b32.xlu1 %v2985_v46, %s3685_s29  ;;  %v1955_v60 = vld [vmem:[#allocation5 + $0x10] sm:$0xff] }
 0x2f8   :  { %2242 = vst [vmem:[#allocation5 + $0x40] sm:$0xf] %v2239_v59  ;;  %2986 = vrot.lane.b32.xlu0 %v2984_v58, %s3685_s29  ;;  %2004 = vmatpush1.msra.mxu1 %v1955_v60 }
 0x2f9   :  { %v2210_v0 = vpop.permute.xlu1 %2209  ;;  %v1954_v3 = vld [vmem:[#allocation5 + $0x8] sm:$0xff] }
 0x2fa   :  { %2215 = vst.msk [vmem:[#allocation5 + $0x38] sm:$0xf] %vm986_vm5, %v2210_v0  ;;  %v2208_v4 = vpop.permute.xlu0 %2207  ;;  %2005 = vmatprep.subr.mxu1 %v1954_v3  ;;  %2131 = vst.msk [vmem:[#allocation5 + $0x8] sm:$0xf] %vm986_vm5, %v2129_v63 }
 0x2fb   :  { %v2211_v33 = vsel %vm848_vm12, %v2208_v4, %v2210_v0  ;;  %3001 = vrot.lane.b32.xlu1 %v2996_v6, %s3690_s11  ;;  %v1953_v55 = vld [vmem:[#allocation5] sm:$0xff] }
 0x2fc   :  { %2214 = vst [vmem:[#allocation5 + $0x30] sm:$0xf] %v2211_v33  ;;  %2999 = vrot.lane.b32.xlu0 %v2995_v37, %s3690_s11  ;;  %2006 = vmatpush1.msra.mxu1 %v1953_v55  ;;  %2130 = vst [vmem:[#allocation5] sm:$0xf] %v2128_v7 }
 0x2fd   :  { %v2225_v8 = vpop.permute.xlu1 %2224  ;;  %v2255_v54 = vld [vmem:[#allocation5 + $0x48] sm:$0xf]  ;;  %3454 = vmatmul.mubr.msk.f32.vlgmr.msra.gmra.mxu1 %vm1117_vm1, %v4368_v5 }
 0x2fe   :  { %2230 = vst.msk [vmem:[#allocation5 + $0x38] sm:$0xf0] %vm1002_vm14, %v2225_v8  ;;  %v2223_v9 = vpop.permute.xlu0 %2222  ;;  %3460 = vmatprep.subr.msk.mxu0 %vm1124_vm10, %v2255_v54  ;;  %2045 = vmatprep.mubr.f32.mxu1 %v3697_v22 }
 0x2ff   :  { %v2226_v11 = vsel %vm1085_vm15, %v2223_v9, %v2225_v8  ;;  %2973 = vrot.lane.b32.xlu1 %v2968_v10, %s3686_s30  ;;  %v2254_v42 = vld [vmem:[#allocation5 + $0x40] sm:$0xf] }
 0x300   :  { %2229 = vst [vmem:[#allocation5 + $0x30] sm:$0xf0] %v2226_v11  ;;  %2971 = vrot.lane.b32.xlu0 %v2967_v62, %s3686_s30  ;;  %3461 = vmatpush1.msk.msra.mxu0 %vm1124_vm10, %v2254_v42 }
 0x301   :  { %v2182_v44 = vpop.permute.xlu1 %2181  ;;  %3455 = vmatmul.mubr.msk.f32.gmra.mxu1 %vm1117_vm1, %v1952_v61 }
 0x302   :  { %2187 = vst.msk [vmem:[#allocation5 + $0x28] sm:$0xf] %vm986_vm5, %v2182_v44  ;;  %v2180_v12 = vpop.permute.xlu0 %2179  ;;  %2603 = vmatprep.mubr.f32.mxu1 %v3697_v22 }
 0x303   :  { %v2183_v15 = vsel %vm1040_vm13, %v2180_v12, %v2182_v44  ;;  %v2693_v12 = vld [vmem:[#allocation4 + $0x38] sm:$0xf] }
 0x304   :  { %2186 = vst [vmem:[#allocation5 + $0x20] sm:$0xf] %v2183_v15 }
 0x305   :  { %v2197_v16 = vpop.permute.xlu1 %2196  ;;  %v2253_v17 = vld [vmem:[#allocation5 + $0x38] sm:$0xff] }
 0x306   :  { %2202 = vst.msk [vmem:[#allocation5 + $0x28] sm:$0xf0] %vm1002_vm14, %v2197_v16  ;;  %v2195_v21 = vpop.permute.xlu0 %2194  ;;  %2292 = vmatprep.subr.mxu0 %v2253_v17 }
 0x307   :  { %v2198_v13 = vsel %vm1056_vm6, %v2195_v21, %v2197_v16  ;;  %v2252_v14 = vld [vmem:[#allocation5 + $0x30] sm:$0xff] }
 0x308   :  { %2201 = vst [vmem:[#allocation5 + $0x20] sm:$0xf0] %v2198_v13  ;;  %2293 = vmatpush1.msra.mxu0 %v2252_v14  ;;  %v2692_v21 = vld [vmem:[#allocation4 + $0x30] sm:$0xf] }
 0x309   :  { %v2154_v23 = vpop.permute.xlu1 %2153 }
 0x30a   :  { %2159 = vst.msk [vmem:[#allocation5 + $0x18] sm:$0xf] %vm986_vm5, %v2154_v23  ;;  %v2152_v24 = vpop.permute.xlu0 %2151 }
 0x30b   :  { %v2155_v47 = vsel %vm591_vm7, %v2152_v24, %v2154_v23 }
 0x30c   :  { %2158 = vst [vmem:[#allocation5 + $0x10] sm:$0xf] %v2155_v47 }
 0x30d   :  { %v2169_v29 = vpop.permute.xlu1 %2168  ;;  %v2251_v49 = vld [vmem:[#allocation5 + $0x28] sm:$0xff] }
 0x30e   :  { %2174 = vst.msk [vmem:[#allocation5 + $0x18] sm:$0xf0] %vm1002_vm14, %v2169_v29  ;;  %v2167_v19 = vpop.permute.xlu0 %2166  ;;  %2294 = vmatprep.subr.mxu0 %v2251_v49 }
 0x30f   :  { %v2170_v28 = vsel %vm799_vm11, %v2167_v19, %v2169_v29  ;;  %v2250_v18 = vld [vmem:[#allocation5 + $0x20] sm:$0xff]  ;;  %v2516_v29 = vld [vmem:[#allocation9 + $0x8] sm:$0xf] }
 0x310   :  { %2173 = vst [vmem:[#allocation5 + $0x10] sm:$0xf0] %v2170_v28  ;;  %2295 = vmatpush1.msra.mxu0 %v2250_v18 }
 0x311   :  { %v2141_v30 = vpop.permute.xlu1 %2140 }
 0x312   :  { %2146 = vst.msk [vmem:[#allocation5 + $0x8] sm:$0xf0] %vm1002_vm14, %v2141_v30  ;;  %v2139_v31 = vpop.permute.xlu0 %2138 }
 0x313   :  { %v2142_v38 = vsel %vm534_vm0, %v2139_v31, %v2141_v30 }
 0x314   :  { %2145 = vst [vmem:[#allocation5] sm:$0xf0] %v2142_v38 }
 0x315   :  { %v2509_v34 = vpop.permute.xlu1 %2508  ;;  %v2249_v36 = vld [vmem:[#allocation5 + $0x18] sm:$0xff] }
 0x316   :  { %2514 = vst.msk [vmem:[#allocation5 + $0x48] sm:$0xf] %vm986_vm5, %v2509_v34  ;;  %v2507_v20 = vpop.permute.xlu0 %2506  ;;  %2296 = vmatprep.subr.mxu0 %v2249_v36 }
 0x317   :  { %v2510_v40 = vsel %vm1099_vm9, %v2507_v20, %v2509_v34  ;;  %v2248_v41 = vld [vmem:[#allocation5 + $0x10] sm:$0xff] }
 0x318   :  { %2513 = vst [vmem:[#allocation5 + $0x40] sm:$0xf] %v2510_v40  ;;  %2297 = vmatpush1.msra.mxu0 %v2248_v41 }
 0x319   :  { %v2481_v45 = vpop.permute.xlu1 %2480  ;;  %v2247_v48 = vld [vmem:[#allocation5 + $0x8] sm:$0xff] }
 0x31a   :  { %2486 = vst.msk [vmem:[#allocation5 + $0x38] sm:$0xf] %vm986_vm5, %v2481_v45  ;;  %v2479_v35 = vpop.permute.xlu0 %2478  ;;  %2298 = vmatprep.subr.mxu0 %v2247_v48  ;;  %2402 = vst.msk [vmem:[#allocation5 + $0x8] sm:$0xf] %vm986_vm5, %v2398_v43 }
 0x31b   :  { %v2482_v25 = vsel %vm848_vm12, %v2479_v35, %v2481_v45  ;;  %v2246_v26 = vld [vmem:[#allocation5] sm:$0xff] }
 0x31c   :  { %2485 = vst [vmem:[#allocation5 + $0x30] sm:$0xf] %v2482_v25  ;;  %2299 = vmatpush1.msra.mxu0 %v2246_v26  ;;  %2401 = vst [vmem:[#allocation5] sm:$0xf] %v2397_v32 }
 0x31d   :  { %v2494_v51 = vpop.permute.xlu1 %2493  ;;  %v2526_v52 = vld [vmem:[#allocation5 + $0x48] sm:$0xf]  ;;  %3462 = vmatmul.mubr.msk.f32.vlgmr.msra.gmra.mxu0 %vm1117_vm1, %v4368_v5 }
 0x31e   :  { %2499 = vst.msk [vmem:[#allocation5 + $0x38] sm:$0xf0] %vm1002_vm14, %v2494_v51  ;;  %v2492_v53 = vpop.permute.xlu0 %2491  ;;  %3468 = vmatprep.subr.msk.mxu1 %vm1124_vm10, %v2526_v52  ;;  %2338 = vmatprep.mubr.f32.mxu0 %v3697_v22 }
 0x31f   :  { %v2495_v2 = vsel %vm1085_vm15, %v2492_v53, %v2494_v51  ;;  %v2525_v57 = vld [vmem:[#allocation5 + $0x40] sm:$0xf]  ;;  %v2958_v51 = vld [vmem:[#allocation4 + $0x38] sm:$0xf0] }
 0x320   :  { %2498 = vst [vmem:[#allocation5 + $0x30] sm:$0xf0] %v2495_v2  ;;  %3469 = vmatpush1.msk.msra.mxu1 %vm1124_vm10, %v2525_v57  ;;  %v2957_v2 = vld [vmem:[#allocation4 + $0x30] sm:$0xf0] }
 0x321   :  { %v2453_v27 = vpop.permute.xlu1 %2452  ;;  %3463 = vmatmul.mubr.msk.f32.gmra.mxu0 %vm1117_vm1, %v2245_v56 }
 0x322   :  { %2458 = vst.msk [vmem:[#allocation5 + $0x28] sm:$0xf] %vm986_vm5, %v2453_v27  ;;  %v2451_v46 = vpop.permute.xlu0 %2450  ;;  %2896 = vmatprep.mubr.f32.mxu0 %v3697_v22 }
 0x323   :  { %v2454_v1 = vsel %vm1040_vm13, %v2451_v46, %v2453_v27  ;;  %v2962_v46 = vrot.slane %v2958_v51, 4 }
 0x324   :  { %2457 = vst [vmem:[#allocation5 + $0x20] sm:$0xf] %v2454_v1 }
 0x325   :  { %v2466_v58 = vpop.permute.xlu1 %2465  ;;  %v2524_v59 = vld [vmem:[#allocation5 + $0x38] sm:$0xff] }
 0x326   :  { %2471 = vst.msk [vmem:[#allocation5 + $0x28] sm:$0xf0] %vm1002_vm14, %v2466_v58  ;;  %v2464_v60 = vpop.permute.xlu0 %2463  ;;  %2563 = vmatprep.subr.mxu1 %v2524_v59  ;;  %v2961_v59 = vrot.slane %v2957_v2, 4 }
 0x327   :  { %v2467_v63 = vsel %vm1056_vm6, %v2464_v60, %v2466_v58  ;;  %v2523_v0 = vld [vmem:[#allocation5 + $0x30] sm:$0xff] }
 0x328   :  { %2470 = vst [vmem:[#allocation5 + $0x20] sm:$0xf0] %v2467_v63  ;;  %2564 = vmatpush1.msra.mxu1 %v2523_v0 }
 0x329   :  { %v2425_v3 = vpop.permute.xlu1 %2424 }
 0x32a   :  { %2430 = vst.msk [vmem:[#allocation5 + $0x18] sm:$0xf] %vm986_vm5, %v2425_v3  ;;  %v2423_v4 = vpop.permute.xlu0 %2422 }
 0x32b   :  { %v2426_v6 = vsel %vm591_vm7, %v2423_v4, %v2425_v3 }
 0x32c   :  { %2429 = vst [vmem:[#allocation5 + $0x10] sm:$0xf] %v2426_v6 }
 0x32d   :  { %v2438_v7 = vpop.permute.xlu1 %2437  ;;  %v2522_v33 = vld [vmem:[#allocation5 + $0x28] sm:$0xff] }
 0x32e   :  { %2443 = vst.msk [vmem:[#allocation5 + $0x18] sm:$0xf0] %vm1002_vm14, %v2438_v7  ;;  %v2436_v37 = vpop.permute.xlu0 %2435  ;;  %2565 = vmatprep.subr.mxu1 %v2522_v33 }
 0x32f   :  { %v2439_v55 = vsel %vm799_vm11, %v2436_v37, %v2438_v7  ;;  %v2521_v8 = vld [vmem:[#allocation5 + $0x20] sm:$0xff]  ;;  %v2809_v7 = vld [vmem:[#allocation9 + $0x8] sm:$0xf] }
 0x330   :  { %2442 = vst [vmem:[#allocation5 + $0x10] sm:$0xf0] %v2439_v55  ;;  %2566 = vmatpush1.msra.mxu1 %v2521_v8 }
 0x331   :  { %v2410_v54 = vpop.permute.xlu1 %2409 }
 0x332   :  { %2415 = vst.msk [vmem:[#allocation5 + $0x8] sm:$0xf0] %vm1002_vm14, %v2410_v54  ;;  %v2408_v9 = vpop.permute.xlu0 %2407 }
 0x333   :  { %v2411_v10 = vsel %vm534_vm0, %v2408_v9, %v2410_v54 }
 0x334   :  { %2414 = vst [vmem:[#allocation5] sm:$0xf0] %v2411_v10 }
 0x335   :  { %v2802_v61 = vpop.permute.xlu1 %2801  ;;  %v2520_v11 = vld [vmem:[#allocation5 + $0x18] sm:$0xff] }
 0x336   :  { %2807 = vst.msk [vmem:[#allocation5 + $0x48] sm:$0xf] %vm986_vm5, %v2802_v61  ;;  %v2800_v62 = vpop.permute.xlu0 %2799  ;;  %2567 = vmatprep.subr.mxu1 %v2520_v11 }
 0x337   :  { %v2803_v42 = vsel %vm1099_vm9, %v2800_v62, %v2802_v61  ;;  %v2519_v44 = vld [vmem:[#allocation5 + $0x10] sm:$0xff] }
 0x338   :  { %2806 = vst [vmem:[#allocation5 + $0x40] sm:$0xf] %v2803_v42  ;;  %2568 = vmatpush1.msra.mxu1 %v2519_v44 }
 0x339   :  { %v2774_v15 = vpop.permute.xlu1 %2773  ;;  %v2518_v16 = vld [vmem:[#allocation5 + $0x8] sm:$0xff] }
 0x33a   :  { %2779 = vst.msk [vmem:[#allocation5 + $0x38] sm:$0xf] %vm986_vm5, %v2774_v15  ;;  %v2772_v17 = vpop.permute.xlu0 %2771  ;;  %2569 = vmatprep.subr.mxu1 %v2518_v16  ;;  %2695 = vst.msk [vmem:[#allocation5 + $0x8] sm:$0xf] %vm986_vm5, %v2693_v12 }
 0x33b   :  { %v2775_v13 = vsel %vm848_vm12, %v2772_v17, %v2774_v15  ;;  %v2517_v14 = vld [vmem:[#allocation5] sm:$0xff] }
 0x33c   :  { %2778 = vst [vmem:[#allocation5 + $0x30] sm:$0xf] %v2775_v13  ;;  %2570 = vmatpush1.msra.mxu1 %v2517_v14  ;;  %2694 = vst [vmem:[#allocation5] sm:$0xf] %v2692_v21  ;;  %v1234_v13 = vlaneseq }
 0x33d   :  { %v2789_v23 = vpop.permute.xlu1 %2788  ;;  %v2819_v24 = vld [vmem:[#allocation5 + $0x48] sm:$0xf]  ;;  %3470 = vmatmul.mubr.msk.f32.vlgmr.msra.gmra.mxu1 %vm1117_vm1, %v4368_v5 }
 0x33e   :  { %2794 = vst.msk [vmem:[#allocation5 + $0x38] sm:$0xf0] %vm1002_vm14, %v2789_v23  ;;  %v2787_v47 = vpop.permute.xlu0 %2786  ;;  %3476 = vmatprep.subr.msk.mxu0 %vm1124_vm10, %v2819_v24  ;;  %2609 = vmatprep.mubr.f32.mxu1 %v3697_v22 }
 0x33f   :  { %v2790_v49 = vsel %vm1085_vm15, %v2787_v47, %v2789_v23  ;;  %v2818_v19 = vld [vmem:[#allocation5 + $0x40] sm:$0xf]  ;;  %v1235_v47 = vshrl.u32 %v1234_v13, 7 }
 0x340   :  { %2793 = vst [vmem:[#allocation5 + $0x30] sm:$0xf0] %v2790_v49  ;;  %3477 = vmatpush1.msk.msra.mxu0 %vm1124_vm10, %v2818_v19 }
 0x341   :  { %v2746_v28 = vpop.permute.xlu1 %2745  ;;  %3471 = vmatmul.mubr.msk.f32.gmra.mxu1 %vm1117_vm1, %v2516_v29  ;;  %v1236_v19 = vsub.s32 0, %v1235_v47 }
 0x342   :  { %2751 = vst.msk [vmem:[#allocation5 + $0x28] sm:$0xf] %vm986_vm5, %v2746_v28  ;;  %v2744_v18 = vpop.permute.xlu0 %2743  ;;  %3167 = vmatprep.mubr.f32.mxu1 %v3697_v22 }
 0x343   :  { %v2747_v30 = vsel %vm1040_vm13, %v2744_v18, %v2746_v28  ;;  %v978_v18 = vld [vmem:[%s4971_s3] sm:$0x3]  ;;  %s3698_s3 = smov [#allocation13]  }
 0x344   :  { %2750 = vst [vmem:[#allocation5 + $0x20] sm:$0xf] %v2747_v30  ;;  %v1240_v30 = vsub.s32 1, %v1235_v47  ;;  %s3398_s18 = sshll.u32 %s3698_s3, 4  ;;  %s3399_s18 = int_to_ptr.vmem [resolvable:$true] %s3398_s18 }
 0x345   :  { %v2761_v31 = vpop.permute.xlu1 %2760  ;;  %v2817_v38 = vld [vmem:[#allocation5 + $0x38] sm:$0xff]  ;;  %s3593_s21 = scalar_lea.vmem %s3399_s18, 3072  ;;  %p3598_p2 = scmp.lt.s32.totalorder %s3399_s18, %s3399_s18 }
 0x346   :  { %2766 = vst.msk [vmem:[#allocation5 + $0x28] sm:$0xf0] %vm1002_vm14, %v2761_v31  ;;  %v2759_v50 = vpop.permute.xlu0 %2758  ;;  %2856 = vmatprep.subr.mxu0 %v2817_v38  ;;  %v4579_v38 = vrot.slane %v978_v18, %v1236_v19  ;;  %p3594_p1 = scmp.ne.s32.totalorder %s3399_s18, %s3593_s21  ;;  %p3599_p3 = scmp.lt.s32.totalorder %s3593_s21, %s3593_s21 }
 0x347   :  { %v2762_v34 = vsel %vm1056_vm6, %v2759_v50, %v2761_v31  ;;  %v2816_v36 = vld [vmem:[#allocation5 + $0x30] sm:$0xff] }
 0x348   :  { %2765 = vst [vmem:[#allocation5 + $0x20] sm:$0xf0] %v2762_v34  ;;  %2857 = vmatpush1.msra.mxu0 %v2816_v36  ;;  %v3532_v50 = vld [vmem:[#allocation9] sm:$0xff]  ;;  %v3080_v36 = vld [vmem:[#allocation9 + $0x8] sm:$0xf]  ;;  %p3600_p4 = por %p3599_p3, %p3598_p2 }
 0x349   :  { %v2718_v20 = vpop.permute.xlu1 %2717 }
 0x34a   :  { %2723 = vst.msk [vmem:[#allocation5 + $0x18] sm:$0xf] %vm986_vm5, %v2718_v20  ;;  %v2716_v39 = vpop.permute.xlu0 %2715  ;;  %p3601_p5 = pnand %p3600_p4, %p3594_p1 }
 0x34b   :  { %v2719_v40 = vsel %vm591_vm7, %v2716_v39, %v2718_v20  ;;  %v4583_v20 = vrot.slane %v978_v18, %v1240_v30 }
 0x34c   :  { %2722 = vst [vmem:[#allocation5 + $0x10] sm:$0xf] %v2719_v40 }
 0x34d   :  { %v2733_v41 = vpop.permute.xlu1 %2732  ;;  %v2815_v43 = vld [vmem:[#allocation5 + $0x28] sm:$0xff] }
 0x34e   :  { %2738 = vst.msk [vmem:[#allocation5 + $0x18] sm:$0xf0] %vm1002_vm14, %v2733_v41  ;;  %v2731_v45 = vpop.permute.xlu0 %2730  ;;  %2858 = vmatprep.subr.mxu0 %v2815_v43 }
 0x34f   :  { %v2734_v48 = vsel %vm799_vm11, %v2731_v45, %v2733_v41  ;;  %v2814_v32 = vld [vmem:[#allocation5 + $0x20] sm:$0xff] }
 0x350   :  { %2737 = vst [vmem:[#allocation5 + $0x10] sm:$0xf0] %v2734_v48  ;;  %2859 = vmatpush1.msra.mxu0 %v2814_v32 }
 0x351   :  { %v2705_v35 = vpop.permute.xlu1 %2704 }
 0x352   :  { %2710 = vst.msk [vmem:[#allocation5 + $0x8] sm:$0xf0] %vm1002_vm14, %v2705_v35  ;;  %v2703_v25 = vpop.permute.xlu0 %2702 }
 0x353   :  { %v2706_v26 = vsel %vm534_vm0, %v2703_v25, %v2705_v35 }
 0x354   :  { %2709 = vst [vmem:[#allocation5] sm:$0xf0] %v2706_v26 }
 0x355   :  { %v3073_v52 = vpop.permute.xlu1 %3072  ;;  %v2813_v53 = vld [vmem:[#allocation5 + $0x18] sm:$0xff] }
 0x356   :  { %3078 = vst.msk [vmem:[#allocation5 + $0x48] sm:$0xf] %vm986_vm5, %v3073_v52  ;;  %v3071_v56 = vpop.permute.xlu0 %3070  ;;  %2860 = vmatprep.subr.mxu0 %v2813_v53 }
 0x357   :  { %v3074_v57 = vsel %vm1099_vm9, %v3071_v56, %v3073_v52  ;;  %v2812_v27 = vld [vmem:[#allocation5 + $0x10] sm:$0xff] }
 0x358   :  { %3077 = vst [vmem:[#allocation5 + $0x40] sm:$0xf] %v3074_v57  ;;  %2861 = vmatpush1.msra.mxu0 %v2812_v27 }
 0x359   :  { %v3045_v1 = vpop.permute.xlu1 %3044  ;;  %v2811_v58 = vld [vmem:[#allocation5 + $0x8] sm:$0xff] }
 0x35a   :  { %3050 = vst.msk [vmem:[#allocation5 + $0x38] sm:$0xf] %vm986_vm5, %v3045_v1  ;;  %v3043_v60 = vpop.permute.xlu0 %3042  ;;  %2862 = vmatprep.subr.mxu0 %v2811_v58  ;;  %2966 = vst.msk [vmem:[#allocation5 + $0x8] sm:$0xf] %vm986_vm5, %v2962_v46 }
 0x35b   :  { %v3046_v63 = vsel %vm848_vm12, %v3043_v60, %v3045_v1  ;;  %v2810_v0 = vld [vmem:[#allocation5] sm:$0xff] }
 0x35c   :  { %3049 = vst [vmem:[#allocation5 + $0x30] sm:$0xf] %v3046_v63  ;;  %2863 = vmatpush1.msra.mxu0 %v2810_v0  ;;  %2965 = vst [vmem:[#allocation5] sm:$0xf] %v2961_v59 }
 0x35d   :  { %3478 = vmatmul.mubr.msk.f32.vlgmr.msra.gmra.mxu0 %vm1117_vm1, %v4368_v5  ;;  %v3058_v3 = vpop.permute.xlu1 %3057  ;;  %v3090_v4 = vld [vmem:[#allocation5 + $0x48] sm:$0xf] }
 0x35e   :  { %3063 = vst.msk [vmem:[#allocation5 + $0x38] sm:$0xf0] %vm1002_vm14, %v3058_v3  ;;  %v3056_v6 = vpop.permute.xlu0 %3055  ;;  %3484 = vmatprep.subr.msk.mxu1 %vm1124_vm10, %v3090_v4  ;;  %2902 = vmatprep.mubr.f32.mxu0 %v3697_v22 }
 0x35f   :  { %v3059_v33 = vsel %vm1085_vm15, %v3056_v6, %v3058_v3  ;;  %v3089_v37 = vld [vmem:[#allocation5 + $0x40] sm:$0xf] }
 0x360   :  { %3062 = vst [vmem:[#allocation5 + $0x30] sm:$0xf0] %v3059_v33  ;;  %3485 = vmatpush1.msk.msra.mxu1 %vm1124_vm10, %v3089_v37 }
 0x361   :  { %v3017_v55 = vpop.permute.xlu1 %3016  ;;  %3479 = vmatmul.mubr.msk.f32.gmra.mxu0 %vm1117_vm1, %v2809_v7 }
 0x362   :  { %3022 = vst.msk [vmem:[#allocation5 + $0x28] sm:$0xf] %vm986_vm5, %v3017_v55  ;;  %v3015_v5 = vpop.permute.xlu0 %3014 }
 0x363   :  { %v3018_v8 = vsel %vm1040_vm13, %v3015_v5, %v3017_v55 }
 0x364   :  { %3021 = vst [vmem:[#allocation5 + $0x20] sm:$0xf] %v3018_v8 }
 0x365   :  { %v3030_v54 = vpop.permute.xlu1 %3029  ;;  %v3088_v9 = vld [vmem:[#allocation5 + $0x38] sm:$0xff] }
 0x366   :  { %3035 = vst.msk [vmem:[#allocation5 + $0x28] sm:$0xf0] %vm1002_vm14, %v3030_v54  ;;  %v3028_v10 = vpop.permute.xlu0 %3027  ;;  %3127 = vmatprep.subr.mxu1 %v3088_v9 }
 0x367   :  { %v3031_v61 = vsel %vm1056_vm6, %v3028_v10, %v3030_v54  ;;  %v3087_v11 = vld [vmem:[#allocation5 + $0x30] sm:$0xff] }
 0x368   :  { %3034 = vst [vmem:[#allocation5 + $0x20] sm:$0xf0] %v3031_v61  ;;  %3128 = vmatpush1.msra.mxu1 %v3087_v11 }
 0x369   :  { %v2989_v62 = vpop.permute.xlu1 %2988 }
 0x36a   :  { %2994 = vst.msk [vmem:[#allocation5 + $0x18] sm:$0xf] %vm986_vm5, %v2989_v62  ;;  %v2987_v42 = vpop.permute.xlu0 %2986 }
 0x36b   :  { %v2990_v44 = vsel %vm591_vm7, %v2987_v42, %v2989_v62  ;;  %vm1225_vm7 = vcmask 719872  }
 0x36c   :  { %2993 = vst [vmem:[#allocation5 + $0x10] sm:$0xf] %v2990_v44 }
 0x36d   :  { %v3002_v12 = vpop.permute.xlu1 %3001  ;;  %v3086_v15 = vld [vmem:[#allocation5 + $0x28] sm:$0xff] }
 0x36e   :  { %3007 = vst.msk [vmem:[#allocation5 + $0x18] sm:$0xf0] %vm1002_vm14, %v3002_v12  ;;  %v3000_v16 = vpop.permute.xlu0 %2999  ;;  %3129 = vmatprep.subr.mxu1 %v3086_v15 }
 0x36f   :  { %v3003_v17 = vsel %vm799_vm11, %v3000_v16, %v3002_v12  ;;  %v3085_v21 = vld [vmem:[#allocation5 + $0x20] sm:$0xff] }
 0x370   :  { %3006 = vst [vmem:[#allocation5 + $0x10] sm:$0xf0] %v3003_v17  ;;  %3130 = vmatpush1.msra.mxu1 %v3085_v21 }
 0x371   :  { %v2974_v14 = vpop.permute.xlu1 %2973 }
 0x372   :  { %2979 = vst.msk [vmem:[#allocation5 + $0x8] sm:$0xf0] %vm1002_vm14, %v2974_v14  ;;  %v2972_v23 = vpop.permute.xlu0 %2971 }
 0x373   :  { %v2975_v24 = vsel %vm534_vm0, %v2972_v23, %v2974_v14 }
 0x374   :  { %2978 = vst [vmem:[#allocation5] sm:$0xf0] %v2975_v24 }
 0x375   :  { %v3084_v29 = vld [vmem:[#allocation5 + $0x18] sm:$0xff] }
 0x376   :  { %3131 = vmatprep.subr.mxu1 %v3084_v29 }
 0x377   :  { %v3083_v49 = vld [vmem:[#allocation5 + $0x10] sm:$0xff] }
 0x378   :  { %3132 = vmatpush1.msra.mxu1 %v3083_v49 }
 0x379   :  { %v3082_v28 = vld [vmem:[#allocation5 + $0x8] sm:$0xff] }
 0x37a   :  { %3133 = vmatprep.subr.mxu1 %v3082_v28 }
 0x37b   :  { %v3081_v31 = vld [vmem:[#allocation5] sm:$0xff] }
 0x37c   :  { %3134 = vmatpush1.msra.mxu1 %v3081_v31 }
 0x37d   :  { %3486 = vmatmul.mubr.msk.f32.vlgmr.msra.gmra.mxu1 %vm1117_vm1, %v3532_v50  ;;  %v1197_v34 = vpop.f32.mrf.mxu0 }
 0x37e   :  { %3173 = vmatprep.mubr.f32.mxu1 %v3697_v22  ;;  %vm1208_vm0 = vcmp.ge.f32.partialorder %v1197_v34, 20.0 }
 0x37f   :  { %v1212_v39 = vsel %vm1208_vm0, %v1197_v34, 0.0  ;;  %v3432_v40 = vsel %vm1208_vm0, 1.0, %v3697_v22  ;;  %v1199_v41 = vpop.f32.mrf.mxu0 }
 0x380   :  { %1224 = vst [vmem:[#allocation12] sm:$0xff] %v1212_v39  ;;  %1229 = vst [vmem:[#allocation13] sm:$0xff] %v3432_v40  ;;  %v1244_v43 = vmul.f32 %v3432_v40, %v4579_v38  ;;  %vm1209_vm11 = vcmp.ge.f32.partialorder %v1199_v41, 20.0 }
 0x381   :  { %3487 = vmatmul.mubr.msk.f32.gmra.mxu1 %vm1117_vm1, %v3080_v36  ;;  %v1213_v45 = vsel %vm1209_vm11, %v1199_v41, 0.0  ;;  %v3433_v48 = vsel %vm1209_vm11, 1.0, %v3697_v22  ;;  %v1203_v32 = vpop.f32.mrf.mxu0 }
 0x382   :  { %vm1248_vm12 = vcmp.gt.f32.partialorder %v1244_v43, 0.0  ;;  %1226 = vst.msk [vmem:[#allocation12 + $0x8] sm:$0xff] %vm1225_vm7, %v1213_v45  ;;  %1230 = vst.msk [vmem:[#allocation13 + $0x8] sm:$0xff] %vm1225_vm7, %v3433_v48  ;;  %v1245_v35 = vmul.f32 %v3433_v48, %v4583_v20  ;;  %vm1210_vm3 = vcmp.ge.f32.partialorder %v1203_v32, 20.0  ;;  %vm1548_vm15 = vcmp.eq.f32.partialorder %v1244_v43, 0.0 }
 0x383   :  { %v4592_v25 = vsel %vm1248_vm12, %v1197_v34, 0.0  ;;  %v1214_v26 = vsel %vm1210_vm3, %v1203_v32, 0.0  ;;  %v3434_v51 = vsel %vm1210_vm3, 1.0, %v3697_v22  ;;  %v1205_v52 = vpop.f32.mrf.mxu0 }
 0x384   :  { %vm1249_vm2 = vcmp.gt.f32.partialorder %v1245_v35, 0.0  ;;  %1227 = vst [vmem:[#allocation12 + $0x10] sm:$0xf] %v1214_v26  ;;  %1231 = vst [vmem:[#allocation13 + $0x10] sm:$0xf] %v3434_v51  ;;  %v1246_v53 = vmul.f32 %v3434_v51, %v4579_v38  ;;  %vm1211_vm4 = vcmp.ge.f32.partialorder %v1205_v52, 20.0 }
 0x385   :  { %v4596_v56 = vsel %vm1249_vm2, %v1199_v41, 0.0  ;;  %v1215_v2 = vsel %vm1211_vm4, %v1205_v52, 0.0  ;;  %v3435_v57 = vsel %vm1211_vm4, 1.0, %v3697_v22  ;;  %vm1549_vm11 = vcmp.eq.f32.partialorder %v1245_v35, 0.0 }
 0x386   :  { %vm1250_vm8 = vcmp.gt.f32.partialorder %v1246_v53, 0.0  ;;  %1228 = vst.msk [vmem:[#allocation12 + $0x18] sm:$0xf] %vm986_vm5, %v1215_v2  ;;  %1232 = vst.msk [vmem:[#allocation13 + $0x18] sm:$0xf] %vm986_vm5, %v3435_v57  ;;  %v4602_v27 = vmul.f32 %v3435_v57, %v4583_v20  ;;  %vm1550_vm4 = vcmp.eq.f32.partialorder %v1246_v53, 0.0 }
 0x387   :  { %v4604_v46 = vsel %vm1250_vm8, %v1203_v32, 0.0 }
 0x388   :  { %vm1251_vm9 = vcmp.gt.f32.partialorder %v4602_v27, 0.0 }
 0x389   :  { %v4607_v1 = vsel %vm1251_vm9, %v1205_v52, 0.0 }
 0x390   :  { %v4609_v58 = vpop.f32.mrf.mxu1 }
 0x391   :  { %vm1488_vm13 = vcmp.ge.f32.partialorder %v4609_v58, 20.0 }
 0x392   :  { %v1492_v59 = vsel %vm1488_vm13, %v4609_v58, 0.0  ;;  %v3440_v60 = vsel %vm1488_vm13, 1.0, %v3697_v22  ;;  %v4614_v63 = vpop.f32.mrf.mxu1 }
 0x393   :  { %v1508_v0 = vrot.slane %v1492_v59, 4  ;;  %v1526_v3 = vrot.slane %v3440_v60, 4  ;;  %v1540_v4 = vmul.f32 %v3440_v60, %v4579_v38  ;;  %vm1489_vm6 = vcmp.ge.f32.partialorder %v4614_v63, 20.0 }
 0x394   :  { %v1493_v6 = vsel %vm1489_vm6, %v4614_v63, 0.0  ;;  %v3441_v7 = vsel %vm1489_vm6, 1.0, %v3697_v22  ;;  %v4620_v33 = vpop.f32.mrf.mxu1 }
 0x395   :  { %1518 = vst [vmem:[#allocation12 + $0x10] sm:$0xf0] %v1508_v0  ;;  %1536 = vst [vmem:[#allocation13 + $0x10] sm:$0xf0] %v1526_v3  ;;  %vm1544_vm1 = vcmp.gt.f32.partialorder %v1540_v4, 0.0  ;;  %v4622_v37 = vadd.f32 %v1540_v4, %v1244_v43  ;;  %v1509_v55 = vrot.slane %v1493_v6, 4  ;;  %v1541_v54 = vmul.f32 %v3441_v7, %v4583_v20 }
 0x396   :  { %v1527_v5 = vrot.slane %v3441_v7, 4  ;;  %vm4625_vm0 = vmand %vm1544_vm1, %vm1548_vm15  ;;  %vm1490_vm12 = vcmp.ge.f32.partialorder %v4620_v33, 20.0  ;;  %v4639_v44 = vpop.f32.mrf.mxu1  ;;  %vm1551_vm15 = vcmp.eq.f32.partialorder %v4602_v27, 0.0 }
 0x397   :  { %v1556_v9 = vsel %vm4625_vm0, %v4609_v58, %v4592_v25  ;;  %1519 = vst.msk [vmem:[#allocation12 + $0x18] sm:$0xf0] %vm1002_vm14, %v1509_v55  ;;  %v1494_v10 = vsel %vm1490_vm12, %v4620_v33, 0.0  ;;  %v3442_v61 = vsel %vm1490_vm12, 1.0, %v3697_v22  ;;  %vm1545_vm3 = vcmp.gt.f32.partialorder %v1541_v54, 0.0 }
 0x398   :  { %1537 = vst.msk [vmem:[#allocation13 + $0x18] sm:$0xf0] %vm1002_vm14, %v1527_v5  ;;  %v1561_v11 = vadd.f32 %v1541_v54, %v1245_v35  ;;  %v1510_v62 = vrot.slane %v1494_v10, 4  ;;  %v1528_v42 = vrot.slane %v3442_v61, 4  ;;  %vm4641_vm2 = vmand %vm1545_vm3, %vm1549_vm11  ;;  %v1542_v15 = vmul.f32 %v3442_v61, %v4579_v38 }
 0x399   :  { %vm1491_vm8 = vcmp.ge.f32.partialorder %v4639_v44, 20.0  ;;  %v1557_v16 = vsel %vm4641_vm2, %v4614_v63, %v4596_v56  ;;  %vm1813_vm11 = vcmp.eq.f32.partialorder %v4622_v37, 0.0 }
 0x39a   :  { %v1511_v17 = vsel %vm1124_vm10, %v1508_v0, %v1510_v62  ;;  %v1529_v21 = vsel %vm1124_vm10, %v1526_v3, %v1528_v42  ;;  %vm1546_vm9 = vcmp.gt.f32.partialorder %v1542_v15, 0.0  ;;  %v1562_v13 = vadd.f32 %v1542_v15, %v1246_v53 }
 0x39b   :  { %1520 = vst [vmem:[#allocation12 + $0x20] sm:$0xff] %v1511_v17  ;;  %1538 = vst [vmem:[#allocation13 + $0x20] sm:$0xff] %v1529_v21  ;;  %v1495_v14 = vsel %vm1491_vm8, %v4639_v44, 0.0  ;;  %v3443_v23 = vsel %vm1491_vm8, 1.0, %v3697_v22  ;;  %vm1814_vm3 = vcmp.eq.f32.partialorder %v1561_v11, 0.0 }
 0x39c   :  { %vm4655_vm13 = vmand %vm1546_vm9, %vm1550_vm4  ;;  %v1512_v47 = vrot.slane %v1495_v14, 4  ;;  %v1530_v29 = vrot.slane %v3443_v23, 4  ;;  %v1543_v49 = vmul.f32 %v3443_v23, %v4583_v20  ;;  %vm1815_vm9 = vcmp.eq.f32.partialorder %v1562_v13, 0.0 }
 0x39d   :  { %v1558_v19 = vsel %vm4655_vm13, %v4620_v33, %v4604_v46  ;;  %v1770_v28 = vpop.f32.mrf.mxu0 }
 0x39e   :  { %v1513_v18 = vsel %vm1124_vm10, %v1509_v55, %v1512_v47  ;;  %v1531_v30 = vsel %vm1124_vm10, %v1527_v5, %v1530_v29  ;;  %vm1547_vm6 = vcmp.gt.f32.partialorder %v1543_v49, 0.0  ;;  %v1563_v31 = vadd.f32 %v1543_v49, %v4602_v27 }
 0x39f   :  { %vm1781_vm1 = vcmp.ge.f32.partialorder %v1770_v28, 20.0  ;;  %1521 = vst.msk [vmem:[#allocation12 + $0x28] sm:$0xff] %vm1225_vm7, %v1513_v18  ;;  %1539 = vst.msk [vmem:[#allocation13 + $0x28] sm:$0xff] %vm1225_vm7, %v1531_v30  ;;  %v1772_v39 = vpop.f32.mrf.mxu0 }
 0x3a0   :  { %vm4670_vm0 = vmand %vm1547_vm6, %vm1551_vm15  ;;  %v1785_v34 = vsel %vm1781_vm1, %v1770_v28, 0.0  ;;  %v3448_v36 = vsel %vm1781_vm1, 1.0, %v3697_v22  ;;  %vm1782_vm12 = vcmp.ge.f32.partialorder %v1772_v39, 20.0 }
 0x3a1   :  { %v1559_v40 = vsel %vm4670_vm0, %v4639_v44, %v4607_v1  ;;  %1797 = vst [vmem:[#allocation12 + $0x30] sm:$0xff] %v1785_v34  ;;  %1801 = vst [vmem:[#allocation13 + $0x30] sm:$0xff] %v3448_v36  ;;  %v1805_v41 = vmul.f32 %v3448_v36, %v4579_v38  ;;  %v1786_v43 = vsel %vm1782_vm12, %v1772_v39, 0.0  ;;  %v3449_v45 = vsel %vm1782_vm12, 1.0, %v3697_v22  ;;  %v1776_v48 = vpop.f32.mrf.mxu0 }
 0x3a2   :  { %1798 = vst.msk [vmem:[#allocation12 + $0x38] sm:$0xff] %vm1225_vm7, %v1786_v43  ;;  %1802 = vst.msk [vmem:[#allocation13 + $0x38] sm:$0xff] %vm1225_vm7, %v3449_v45  ;;  %v1806_v35 = vmul.f32 %v3449_v45, %v4583_v20  ;;  %vm1783_vm4 = vcmp.ge.f32.partialorder %v1776_v48, 20.0 }
 0x3a3   :  { %vm1809_vm2 = vcmp.gt.f32.partialorder %v1805_v41, 0.0  ;;  %v1825_v32 = vadd.f32 %v1805_v41, %v4622_v37  ;;  %v1787_v25 = vsel %vm1783_vm4, %v1776_v48, 0.0  ;;  %v3450_v26 = vsel %vm1783_vm4, 1.0, %v3697_v22  ;;  %v1778_v56 = vpop.f32.mrf.mxu0 }
 0x3a4   :  { %vm1817_vm8 = vmand %vm1809_vm2, %vm1813_vm11  ;;  %vm1810_vm13 = vcmp.gt.f32.partialorder %v1806_v35, 0.0  ;;  %v1826_v52 = vadd.f32 %v1806_v35, %v1561_v11  ;;  %1799 = vst [vmem:[#allocation12 + $0x40] sm:$0xf] %v1787_v25  ;;  %v1807_v53 = vmul.f32 %v3450_v26, %v4579_v38  ;;  %vm1784_vm6 = vcmp.ge.f32.partialorder %v1778_v56, 20.0 }
 0x3a5   :  { %v4687_v51 = vsel %vm1817_vm8, %v1770_v28, %v1556_v9  ;;  %1803 = vst [vmem:[#allocation13 + $0x40] sm:$0xf] %v3450_v26  ;;  %vm1818_vm15 = vmand %vm1810_vm13, %vm1814_vm3  ;;  %v1788_v27 = vsel %vm1784_vm6, %v1778_v56, 0.0  ;;  %v3451_v46 = vsel %vm1784_vm6, 1.0, %v3697_v22  ;;  %vm1816_vm11 = vcmp.eq.f32.partialorder %v1563_v31, 0.0 }
 0x3a6   :  { %v4691_v2 = vsel %vm1818_vm15, %v1772_v39, %v1557_v16  ;;  %vm1811_vm1 = vcmp.gt.f32.partialorder %v1807_v53, 0.0  ;;  %v1827_v57 = vadd.f32 %v1807_v53, %v1562_v13  ;;  %1800 = vst.msk [vmem:[#allocation12 + $0x48] sm:$0xf] %vm986_vm5, %v1788_v27  ;;  %1804 = vst.msk [vmem:[#allocation13 + $0x48] sm:$0xf] %vm986_vm5, %v3451_v46  ;;  %v1808_v58 = vmul.f32 %v3451_v46, %v4583_v20 }
 0x3a7   :  { %vm1819_vm0 = vmand %vm1811_vm1, %vm1815_vm9  ;;  %vm2112_vm4 = vcmp.eq.f32.partialorder %v1825_v32, 0.0  ;;  %vm2113_vm15 = vcmp.eq.f32.partialorder %v1826_v52, 0.0 }
 0x3a8   :  { %v4695_v1 = vsel %vm1819_vm0, %v1776_v48, %v1558_v19  ;;  %vm1812_vm12 = vcmp.gt.f32.partialorder %v1808_v58, 0.0  ;;  %v1828_v59 = vadd.f32 %v1808_v58, %v1563_v31 }
 0x3a9   :  { %vm1820_vm3 = vmand %vm1812_vm12, %vm1816_vm11  ;;  %vm2114_vm11 = vcmp.eq.f32.partialorder %v1827_v57, 0.0 }
 0x3aa   :  { %v4699_v60 = vsel %vm1820_vm3, %v1778_v56, %v1559_v40 }
 0x3bd   :  { %v4701_v63 = vpop.f32.mrf.mxu1 }
 0x3be   :  { %vm2052_vm2 = vcmp.ge.f32.partialorder %v4701_v63, 20.0 }
 0x3bf   :  { %v2056_v0 = vsel %vm2052_vm2, %v4701_v63, 0.0  ;;  %v3456_v3 = vsel %vm2052_vm2, 1.0, %v3697_v22  ;;  %v4706_v4 = vpop.f32.mrf.mxu1 }
 0x3c0   :  { %v2072_v6 = vrot.slane %v2056_v0, 4  ;;  %v2090_v7 = vrot.slane %v3456_v3, 4  ;;  %v2104_v33 = vmul.f32 %v3456_v3, %v4579_v38  ;;  %vm2053_vm8 = vcmp.ge.f32.partialorder %v4706_v4, 20.0 }
 0x3c1   :  { %v2057_v37 = vsel %vm2053_vm8, %v4706_v4, 0.0  ;;  %v3457_v55 = vsel %vm2053_vm8, 1.0, %v3697_v22  ;;  %v4712_v5 = vpop.f32.mrf.mxu1 }
 0x3c2   :  { %2082 = vst [vmem:[#allocation12 + $0x40] sm:$0xf0] %v2072_v6  ;;  %2100 = vst [vmem:[#allocation13 + $0x40] sm:$0xf0] %v2090_v7  ;;  %vm2108_vm9 = vcmp.gt.f32.partialorder %v2104_v33, 0.0  ;;  %v4714_v8 = vadd.f32 %v2104_v33, %v1825_v32  ;;  %v2073_v54 = vrot.slane %v2057_v37, 4  ;;  %v2105_v61 = vmul.f32 %v3457_v55, %v4583_v20 }
 0x3c3   :  { %v2091_v9 = vrot.slane %v3457_v55, 4  ;;  %vm4717_vm13 = vmand %vm2108_vm9, %vm2112_vm4  ;;  %vm2054_vm6 = vcmp.ge.f32.partialorder %v4712_v5, 20.0  ;;  %v4731_v16 = vpop.f32.mrf.mxu1  ;;  %vm2115_vm4 = vcmp.eq.f32.partialorder %v1828_v59, 0.0 }
 0x3c4   :  { %v2120_v11 = vsel %vm4717_vm13, %v4701_v63, %v4687_v51  ;;  %2083 = vst.msk [vmem:[#allocation12 + $0x48] sm:$0xf0] %vm1002_vm14, %v2073_v54  ;;  %v2058_v62 = vsel %vm2054_vm6, %v4712_v5, 0.0  ;;  %v3458_v42 = vsel %vm2054_vm6, 1.0, %v3697_v22  ;;  %vm2109_vm1 = vcmp.gt.f32.partialorder %v2105_v61, 0.0 }
 0x3c5   :  { %2101 = vst.msk [vmem:[#allocation13 + $0x48] sm:$0xf0] %vm1002_vm14, %v2091_v9  ;;  %v2125_v44 = vadd.f32 %v2105_v61, %v1826_v52  ;;  %v2074_v12 = vrot.slane %v2058_v62, 4  ;;  %v2092_v15 = vrot.slane %v3458_v42, 4  ;;  %vm4733_vm0 = vmand %vm2109_vm1, %vm2113_vm15  ;;  %v2106_v21 = vmul.f32 %v3458_v42, %v4579_v38 }
 0x3c6   :  { %vm2055_vm12 = vcmp.ge.f32.partialorder %v4731_v16, 20.0  ;;  %v2121_v13 = vsel %vm4733_vm0, %v4706_v4, %v4691_v2  ;;  %vm2377_vm15 = vcmp.eq.f32.partialorder %v4714_v8, 0.0 }
 0x3c7   :  { %v2075_v14 = vsel %vm1124_vm10, %v2072_v6, %v2074_v12  ;;  %v2093_v23 = vsel %vm1124_vm10, %v2090_v7, %v2092_v15  ;;  %vm2110_vm3 = vcmp.gt.f32.partialorder %v2106_v21, 0.0  ;;  %v2126_v24 = vadd.f32 %v2106_v21, %v1827_v57 }
 0x3c8   :  { %2084 = vst [vmem:[#allocation12 + $0x50] sm:$0xff] %v2075_v14  ;;  %2102 = vst [vmem:[#allocation13 + $0x50] sm:$0xff] %v2093_v23  ;;  %v2059_v47 = vsel %vm2055_vm12, %v4731_v16, 0.0  ;;  %v3459_v29 = vsel %vm2055_vm12, 1.0, %v3697_v22  ;;  %vm2378_vm1 = vcmp.eq.f32.partialorder %v2125_v44, 0.0 }
 0x3c9   :  { %vm4747_vm2 = vmand %vm2110_vm3, %vm2114_vm11  ;;  %v2076_v19 = vrot.slane %v2059_v47, 4  ;;  %v2094_v28 = vrot.slane %v3459_v29, 4  ;;  %v2107_v18 = vmul.f32 %v3459_v29, %v4583_v20  ;;  %vm2379_vm3 = vcmp.eq.f32.partialorder %v2126_v24, 0.0 }
 0x3ca   :  { %v2122_v30 = vsel %vm4747_vm2, %v4712_v5, %v4695_v1 }
 0x3cb   :  { %v2077_v31 = vsel %vm1124_vm10, %v2073_v54, %v2076_v19  ;;  %v2095_v50 = vsel %vm1124_vm10, %v2091_v9, %v2094_v28  ;;  %vm2111_vm8 = vcmp.gt.f32.partialorder %v2107_v18, 0.0  ;;  %v2127_v34 = vadd.f32 %v2107_v18, %v1828_v59 }
 0x3cc   :  { %2085 = vst.msk [vmem:[#allocation12 + $0x58] sm:$0xff] %vm1225_vm7, %v2077_v31  ;;  %2103 = vst.msk [vmem:[#allocation13 + $0x58] sm:$0xff] %vm1225_vm7, %v2095_v50 }
 0x3cd   :  { %vm4760_vm9 = vmand %vm2111_vm8, %vm2115_vm4 }
 0x3ce   :  { %v2123_v39 = vsel %vm4760_vm9, %v4731_v16, %v4699_v60 }
 0x3dd   :  { %v2334_v40 = vpop.f32.mrf.mxu0 }
 0x3de   :  { %vm2345_vm13 = vcmp.ge.f32.partialorder %v2334_v40, 20.0 }
 0x3df   :  { %v2349_v41 = vsel %vm2345_vm13, %v2334_v40, 0.0  ;;  %v3464_v43 = vsel %vm2345_vm13, 1.0, %v3697_v22  ;;  %v2336_v45 = vpop.f32.mrf.mxu0 }
 0x3e0   :  { %2361 = vst [vmem:[#allocation12 + $0x60] sm:$0xff] %v2349_v41  ;;  %2365 = vst [vmem:[#allocation13 + $0x60] sm:$0xff] %v3464_v43  ;;  %v2369_v48 = vmul.f32 %v3464_v43, %v4579_v38  ;;  %vm2346_vm6 = vcmp.ge.f32.partialorder %v2336_v45, 20.0 }
 0x3e1   :  { %v2350_v32 = vsel %vm2346_vm6, %v2336_v45, 0.0  ;;  %v3465_v35 = vsel %vm2346_vm6, 1.0, %v3697_v22  ;;  %v2340_v25 = vpop.f32.mrf.mxu0 }
 0x3e2   :  { %vm2373_vm0 = vcmp.gt.f32.partialorder %v2369_v48, 0.0  ;;  %v2389_v26 = vadd.f32 %v2369_v48, %v4714_v8  ;;  %2362 = vst.msk [vmem:[#allocation12 + $0x68] sm:$0xff] %vm1225_vm7, %v2350_v32  ;;  %2366 = vst.msk [vmem:[#allocation13 + $0x68] sm:$0xff] %vm1225_vm7, %v3465_v35  ;;  %v2370_v51 = vmul.f32 %v3465_v35, %v4583_v20  ;;  %vm2347_vm11 = vcmp.ge.f32.partialorder %v2340_v25, 20.0 }
 0x3e3   :  { %vm2381_vm12 = vmand %vm2373_vm0, %vm2377_vm15  ;;  %v2351_v52 = vsel %vm2347_vm11, %v2340_v25, 0.0  ;;  %v3466_v53 = vsel %vm2347_vm11, 1.0, %v3697_v22  ;;  %v2342_v27 = vpop.f32.mrf.mxu0  ;;  %vm2380_vm15 = vcmp.eq.f32.partialorder %v2127_v34, 0.0 }
 0x3e4   :  { %v4777_v56 = vsel %vm2381_vm12, %v2334_v40, %v2120_v11  ;;  %vm2374_vm2 = vcmp.gt.f32.partialorder %v2370_v51, 0.0  ;;  %v4779_v2 = vadd.f32 %v2370_v51, %v2125_v44  ;;  %2363 = vst [vmem:[#allocation12 + $0x70] sm:$0xf] %v2351_v52  ;;  %2367 = vst [vmem:[#allocation13 + $0x70] sm:$0xf] %v3466_v53  ;;  %v2371_v57 = vmul.f32 %v3466_v53, %v4579_v38 }
 0x3e5   :  { %vm2382_vm4 = vmand %vm2374_vm2, %vm2378_vm1  ;;  %vm2348_vm8 = vcmp.ge.f32.partialorder %v2342_v27, 20.0  ;;  %vm2676_vm11 = vcmp.eq.f32.partialorder %v2389_v26, 0.0 }
 0x3e6   :  { %v4783_v46 = vsel %vm2382_vm4, %v2336_v45, %v2121_v13  ;;  %vm2375_vm9 = vcmp.gt.f32.partialorder %v2371_v57, 0.0  ;;  %v2391_v1 = vadd.f32 %v2371_v57, %v2126_v24  ;;  %v2352_v58 = vsel %vm2348_vm8, %v2342_v27, 0.0 }
 0x3e7   :  { %vm2383_vm13 = vmand %vm2375_vm9, %vm2379_vm3  ;;  %v3467_v59 = vsel %vm2348_vm8, 1.0, %v3697_v22  ;;  %2364 = vst.msk [vmem:[#allocation12 + $0x78] sm:$0xf] %vm986_vm5, %v2352_v58  ;;  %vm2677_vm4 = vcmp.eq.f32.partialorder %v4779_v2, 0.0 }
 0x3e8   :  { %v4787_v60 = vsel %vm2383_vm13, %v2340_v25, %v2122_v30  ;;  %2368 = vst.msk [vmem:[#allocation13 + $0x78] sm:$0xf] %vm986_vm5, %v3467_v59  ;;  %v2372_v63 = vmul.f32 %v3467_v59, %v4583_v20 }
 0x3ea   :  { %vm2376_vm6 = vcmp.gt.f32.partialorder %v2372_v63, 0.0  ;;  %v4791_v0 = vadd.f32 %v2372_v63, %v2127_v34 }
 0x3eb   :  { %vm2384_vm1 = vmand %vm2376_vm6, %vm2380_vm15  ;;  %vm2678_vm15 = vcmp.eq.f32.partialorder %v2391_v1, 0.0 }
 0x3ec   :  { %v4793_v3 = vsel %vm2384_vm1, %v2342_v27, %v2123_v39 }
 0x3fd   :  { %v4795_v4 = vpop.f32.mrf.mxu1 }
 0x3fe   :  { %vm2616_vm0 = vcmp.ge.f32.partialorder %v4795_v4, 20.0 }
 0x3ff   :  { %v2620_v6 = vsel %vm2616_vm0, %v4795_v4, 0.0  ;;  %v3472_v7 = vsel %vm2616_vm0, 1.0, %v3697_v22  ;;  %v4800_v33 = vpop.f32.mrf.mxu1 }
 0x400   :  { %v2636_v37 = vrot.slane %v2620_v6, 4  ;;  %v2654_v55 = vrot.slane %v3472_v7, 4  ;;  %v2668_v5 = vmul.f32 %v3472_v7, %v4579_v38  ;;  %vm2617_vm12 = vcmp.ge.f32.partialorder %v4800_v33, 20.0 }
 0x401   :  { %v2621_v8 = vsel %vm2617_vm12, %v4800_v33, 0.0  ;;  %v3473_v54 = vsel %vm2617_vm12, 1.0, %v3697_v22  ;;  %v4806_v9 = vpop.f32.mrf.mxu1 }
 0x402   :  { %2646 = vst [vmem:[#allocation12 + $0x70] sm:$0xf0] %v2636_v37  ;;  %2664 = vst [vmem:[#allocation13 + $0x70] sm:$0xf0] %v2654_v55  ;;  %vm2672_vm3 = vcmp.gt.f32.partialorder %v2668_v5, 0.0  ;;  %v4808_v10 = vadd.f32 %v2668_v5, %v2389_v26  ;;  %v2637_v61 = vrot.slane %v2621_v8, 4  ;;  %v2669_v42 = vmul.f32 %v3473_v54, %v4583_v20 }
 0x403   :  { %v2655_v11 = vrot.slane %v3473_v54, 4  ;;  %vm4811_vm2 = vmand %vm2672_vm3, %vm2676_vm11  ;;  %vm2618_vm8 = vcmp.ge.f32.partialorder %v4806_v9, 20.0  ;;  %v4818_v44 = vpop.f32.mrf.mxu1  ;;  %vm2679_vm11 = vcmp.eq.f32.partialorder %v4791_v0, 0.0 }
 0x404   :  { %v2684_v12 = vsel %vm4811_vm2, %v4795_v4, %v4777_v56  ;;  %2647 = vst.msk [vmem:[#allocation12 + $0x78] sm:$0xf0] %vm1002_vm14, %v2637_v61  ;;  %v2622_v15 = vsel %vm2618_vm8, %v4806_v9, 0.0  ;;  %v3474_v16 = vsel %vm2618_vm8, 1.0, %v3697_v22  ;;  %vm2673_vm9 = vcmp.gt.f32.partialorder %v2669_v42, 0.0 }
 0x405   :  { %2665 = vst.msk [vmem:[#allocation13 + $0x78] sm:$0xf0] %vm1002_vm14, %v2655_v11  ;;  %v2638_v17 = vrot.slane %v2622_v15, 4  ;;  %v2656_v21 = vrot.slane %v3474_v16, 4  ;;  %vm4828_vm13 = vmand %vm2673_vm9, %vm2677_vm4  ;;  %v2670_v14 = vmul.f32 %v3474_v16, %v4579_v38  ;;  %vm2619_vm6 = vcmp.ge.f32.partialorder %v4818_v44, 20.0 }
 0x406   :  { %v2685_v23 = vsel %vm4828_vm13, %v4800_v33, %v4783_v46  ;;  %v2623_v49 = vsel %vm2619_vm6, %v4818_v44, 0.0  ;;  %v3475_v19 = vsel %vm2619_vm6, 1.0, %v3697_v22  ;;  %v2689_v43 = vadd.f32 %v2669_v42, %v4779_v2 }
 0x407   :  { %v2639_v24 = vsel %vm1124_vm10, %v2636_v37, %v2638_v17  ;;  %v2657_v47 = vsel %vm1124_vm10, %v2654_v55, %v2656_v21  ;;  %vm2674_vm1 = vcmp.gt.f32.partialorder %v2670_v14, 0.0  ;;  %v4840_v29 = vadd.f32 %v2670_v14, %v2391_v1 }
 0x408   :  { %2648 = vst [vmem:[#allocation12 + $0x80] sm:$0xff] %v2639_v24  ;;  %2666 = vst [vmem:[#allocation13 + $0x80] sm:$0xff] %v2657_v47  ;;  %v2640_v18 = vrot.slane %v2623_v49, 4  ;;  %v2658_v30 = vrot.slane %v3475_v19, 4  ;;  %v2671_v31 = vmul.f32 %v3475_v19, %v4583_v20  ;;  %vm2941_vm4 = vcmp.eq.f32.partialorder %v4808_v10, 0.0 }
 0x409   :  { %vm4844_vm0 = vmand %vm2674_vm1, %vm2678_vm15  ;;  %vm2942_vm13 = vcmp.eq.f32.partialorder %v2689_v43, 0.0  ;;  %vm2943_vm1 = vcmp.eq.f32.partialorder %v4840_v29, 0.0 }
 0x40a   :  { %v2686_v50 = vsel %vm4844_vm0, %v4806_v9, %v4787_v60  ;;  %v2641_v34 = vsel %vm1124_vm10, %v2637_v61, %v2640_v18  ;;  %v2659_v36 = vsel %vm1124_vm10, %v2655_v11, %v2658_v30  ;;  %vm2675_vm12 = vcmp.gt.f32.partialorder %v2671_v31, 0.0 }
 0x40b   :  { %2649 = vst.msk [vmem:[#allocation12 + $0x88] sm:$0xff] %vm1225_vm7, %v2641_v34  ;;  %2667 = vst.msk [vmem:[#allocation13 + $0x88] sm:$0xff] %vm1225_vm7, %v2659_v36  ;;  %v2691_v46 = vadd.f32 %v2671_v31, %v4791_v0 }
 0x40c   :  { %vm4858_vm3 = vmand %vm2675_vm12, %vm2679_vm11 }
 0x40d   :  { %v2687_v40 = vsel %vm4858_vm3, %v4818_v44, %v4793_v3 }
 0x41d   :  { %v2898_v41 = vpop.f32.mrf.mxu0 }
 0x41e   :  { %vm2909_vm2 = vcmp.ge.f32.partialorder %v2898_v41, 20.0 }
 0x41f   :  { %v2913_v45 = vsel %vm2909_vm2, %v2898_v41, 0.0  ;;  %v3480_v48 = vsel %vm2909_vm2, 1.0, %v3697_v22  ;;  %v2900_v32 = vpop.f32.mrf.mxu0 }
 0x420   :  { %2925 = vst [vmem:[#allocation12 + $0x90] sm:$0xff] %v2913_v45  ;;  %2929 = vst [vmem:[#allocation13 + $0x90] sm:$0xff] %v3480_v48  ;;  %v2933_v35 = vmul.f32 %v3480_v48, %v4579_v38  ;;  %vm2910_vm8 = vcmp.ge.f32.partialorder %v2900_v32, 20.0 }
 0x421   :  { %v2914_v25 = vsel %vm2910_vm8, %v2900_v32, 0.0  ;;  %v3481_v26 = vsel %vm2910_vm8, 1.0, %v3697_v22  ;;  %v2904_v51 = vpop.f32.mrf.mxu0 }
 0x422   :  { %vm2937_vm9 = vcmp.gt.f32.partialorder %v2933_v35, 0.0  ;;  %2926 = vst.msk [vmem:[#allocation12 + $0x98] sm:$0xff] %vm1225_vm7, %v2914_v25  ;;  %2930 = vst.msk [vmem:[#allocation13 + $0x98] sm:$0xff] %vm1225_vm7, %v3481_v26  ;;  %v2934_v52 = vmul.f32 %v3481_v26, %v4583_v20  ;;  %vm2911_vm15 = vcmp.ge.f32.partialorder %v2904_v51, 20.0  ;;  %v2953_v3 = vadd.f32 %v2933_v35, %v4808_v10 }
 0x423   :  { %vm2945_vm6 = vmand %vm2937_vm9, %vm2941_vm4  ;;  %v2915_v53 = vsel %vm2911_vm15, %v2904_v51, 0.0  ;;  %v3482_v56 = vsel %vm2911_vm15, 1.0, %v3697_v22  ;;  %v2906_v2 = vpop.f32.mrf.mxu0  ;;  %vm2944_vm4 = vcmp.eq.f32.partialorder %v2691_v46, 0.0 }
 0x424   :  { %v4876_v57 = vsel %vm2945_vm6, %v2898_v41, %v2684_v12  ;;  %vm2938_vm0 = vcmp.gt.f32.partialorder %v2934_v52, 0.0  ;;  %2927 = vst [vmem:[#allocation12 + $0xa0] sm:$0xf] %v2915_v53  ;;  %2931 = vst [vmem:[#allocation13 + $0xa0] sm:$0xf] %v3482_v56  ;;  %v2935_v27 = vmul.f32 %v3482_v56, %v4579_v38  ;;  %vm2912_vm12 = vcmp.ge.f32.partialorder %v2906_v2, 20.0 }
 0x425   :  { %vm2946_vm11 = vmand %vm2938_vm0, %vm2942_vm13  ;;  %v2916_v58 = vsel %vm2912_vm12, %v2906_v2, 0.0  ;;  %v3483_v59 = vsel %vm2912_vm12, 1.0, %v3697_v22  ;;  %v2954_v6 = vadd.f32 %v2934_v52, %v2689_v43  ;;  %vm3240_vm6 = vcmp.eq.f32.partialorder %v2953_v3, 0.0 }
 0x426   :  { %v2950_v1 = vsel %vm2946_vm11, %v2900_v32, %v2685_v23  ;;  %vm2939_vm3 = vcmp.gt.f32.partialorder %v2935_v27, 0.0  ;;  %2928 = vst.msk [vmem:[#allocation12 + $0xa8] sm:$0xf] %vm986_vm5, %v2916_v58  ;;  %2932 = vst.msk [vmem:[#allocation13 + $0xa8] sm:$0xf] %vm986_vm5, %v3483_v59  ;;  %v2936_v63 = vmul.f32 %v3483_v59, %v4583_v20  ;;  %v2955_v7 = vadd.f32 %v2935_v27, %v4840_v29 }
 0x427   :  { %vm2947_vm2 = vmand %vm2939_vm3, %vm2943_vm1  ;;  %vm3241_vm11 = vcmp.eq.f32.partialorder %v2954_v6, 0.0 }
 0x428   :  { %v4882_v60 = vsel %vm2947_vm2, %v2904_v51, %v2686_v50  ;;  %vm2940_vm8 = vcmp.gt.f32.partialorder %v2936_v63, 0.0  ;;  %vm3242_vm3 = vcmp.eq.f32.partialorder %v2955_v7, 0.0  ;;  %v2956_v13 = vadd.f32 %v2936_v63, %v2691_v46 }
 0x429   :  { %vm2948_vm9 = vmand %vm2940_vm8, %vm2944_vm4 }
 0x42a   :  { %v4886_v0 = vsel %vm2948_vm9, %v2906_v2, %v2687_v40 }
 0x43d   :  { %v3169_v4 = vpop.f32.mrf.mxu1 }
 0x43e   :  { %vm3180_vm13 = vcmp.ge.f32.partialorder %v3169_v4, 20.0 }
 0x43f   :  { %v3184_v33 = vsel %vm3180_vm13, %v3169_v4, 0.0  ;;  %v3488_v37 = vsel %vm3180_vm13, 1.0, %v3697_v22  ;;  %v3171_v55 = vpop.f32.mrf.mxu1 }
 0x440   :  { %v3200_v5 = vrot.slane %v3184_v33, 4  ;;  %v3218_v8 = vrot.slane %v3488_v37, 4  ;;  %v3232_v54 = vmul.f32 %v3488_v37, %v4579_v38  ;;  %vm3181_vm15 = vcmp.ge.f32.partialorder %v3171_v55, 20.0 }
 0x441   :  { %v3185_v9 = vsel %vm3181_vm15, %v3171_v55, 0.0  ;;  %v3489_v61 = vsel %vm3181_vm15, 1.0, %v3697_v22  ;;  %v3175_v11 = vpop.f32.mrf.mxu1 }
 0x442   :  { %3210 = vst [vmem:[#allocation12 + $0xa0] sm:$0xf0] %v3200_v5  ;;  %3228 = vst [vmem:[#allocation13 + $0xa0] sm:$0xf0] %v3218_v8  ;;  %vm3236_vm1 = vcmp.gt.f32.partialorder %v3232_v54, 0.0  ;;  %v4893_v10 = vadd.f32 %v3232_v54, %v2953_v3  ;;  %v3201_v62 = vrot.slane %v3185_v9, 4  ;;  %v3233_v12 = vmul.f32 %v3489_v61, %v4583_v20 }
 0x443   :  { %v3219_v42 = vrot.slane %v3489_v61, 4  ;;  %vm4895_vm0 = vmand %vm3236_vm1, %vm3240_vm6  ;;  %vm3182_vm12 = vcmp.ge.f32.partialorder %v3175_v11, 20.0  ;;  %v3177_v15 = vpop.f32.mrf.mxu1 }
 0x444   :  { %v3248_v16 = vsel %vm4895_vm0, %v3169_v4, %v4876_v57  ;;  %3211 = vst.msk [vmem:[#allocation12 + $0xa8] sm:$0xf0] %vm1002_vm14, %v3201_v62  ;;  %v3186_v17 = vsel %vm3182_vm12, %v3175_v11, 0.0  ;;  %v3490_v21 = vsel %vm3182_vm12, 1.0, %v3697_v22  ;;  %vm3237_vm2 = vcmp.gt.f32.partialorder %v3233_v12, 0.0 }
 0x445   :  { %3229 = vst.msk [vmem:[#allocation13 + $0xa8] sm:$0xf0] %vm1002_vm14, %v3219_v42  ;;  %v3253_v14 = vadd.f32 %v3233_v12, %v2954_v6  ;;  %v3202_v23 = vrot.slane %v3186_v17, 4  ;;  %vm3256_vm4 = vcmp.gt.f32.partialorder %v4893_v10, 0.0  ;;  %vm3245_vm8 = vmand %vm3237_vm2, %vm3241_vm11  ;;  %v3220_v24 = vrot.slane %v3490_v21, 4 }
 0x446   :  { %v3234_v47 = vmul.f32 %v3490_v21, %v4579_v38  ;;  %vm3183_vm9 = vcmp.ge.f32.partialorder %v3177_v15, 20.0  ;;  %v3249_v29 = vsel %vm3245_vm8, %v3171_v55, %v2950_v1  ;;  %v3260_v31 = vsel %vm3256_vm4, %v3248_v16, 0.0  ;;  %v981_v21 = vld [vmem:[#allocation11 + $0x10] sm:$0xf] }
 0x447   :  { %vm3257_vm13 = vcmp.gt.f32.partialorder %v3253_v14, 0.0  ;;  %v3203_v49 = vsel %vm1124_vm10, %v3200_v5, %v3202_v23  ;;  %v3187_v19 = vsel %vm3183_vm9, %v3177_v15, 0.0  ;;  %v3221_v18 = vsel %vm1124_vm10, %v3218_v8, %v3220_v24  ;;  %v980_v23 = vld [vmem:[#allocation11 + $0x8] sm:$0xff] }
 0x448   :  { %v3261_v28 = vsel %vm3257_vm13, %v3249_v29, 0.0  ;;  %3212 = vst [vmem:[#allocation12 + $0xb0] sm:$0xff] %v3203_v49  ;;  %vm3238_vm14 = vcmp.gt.f32.partialorder %v3234_v47, 0.0  ;;  %v3254_v30 = vadd.f32 %v3234_v47, %v2955_v7  ;;  %3230 = vst [vmem:[#allocation13 + $0xb0] sm:$0xff] %v3221_v18  ;;  %v3491_v38 = vsel %vm3183_vm9, 1.0, %v3697_v22 }
 0x449   :  { %vm4911_vm15 = vmand %vm3238_vm14, %vm3242_vm3  ;;  %v3204_v34 = vrot.slane %v3187_v19, 4  ;;  %v3264_v36 = vsel %vm1225_vm7, %v3261_v28, -inf  ;;  %v3222_v40 = vrot.slane %v3491_v38, 4  ;;  %v3235_v41 = vmul.f32 %v3491_v38, %v4583_v20 }
 0x44a   :  { %v3250_v39 = vsel %vm4911_vm15, %v3175_v11, %v4882_v60  ;;  %vm3258_vm6 = vcmp.gt.f32.partialorder %v3254_v30, 0.0  ;;  %v3265_v45 = vmax.f32 %v3260_v31, %v3264_v36  ;;  %vm3243_vm0 = vcmp.eq.f32.partialorder %v2956_v13, 0.0 }
 0x44b   :  { %v3205_v43 = vsel %vm1124_vm10, %v3201_v62, %v3204_v34  ;;  %v3223_v48 = vsel %vm1124_vm10, %v3219_v42, %v3222_v40  ;;  %vm3239_vm1 = vcmp.gt.f32.partialorder %v3235_v41, 0.0  ;;  %v3255_v22 = vadd.f32 %v3235_v41, %v2956_v13 }
 0x44c   :  { %3213 = vst.msk [vmem:[#allocation12 + $0xb8] sm:$0xff] %vm1225_vm7, %v3205_v43  ;;  %v3262_v32 = vsel %vm3258_vm6, %v3250_v39, 0.0  ;;  %3231 = vst.msk [vmem:[#allocation13 + $0xb8] sm:$0xff] %vm1225_vm7, %v3223_v48  ;;  %3266 = vmax.xlane.f32.xlu1 %v3265_v45 }
 0x44d   :  { %vm3247_vm11 = vmand %vm3239_vm1, %vm3243_vm0  ;;  %vm3259_vm12 = vcmp.gt.f32.partialorder %v3255_v22, 0.0  ;;  %v3268_v26 = vsel %vm1124_vm10, %v3262_v32, -inf }
 0x44e   :  { %v3251_v35 = vsel %vm3247_vm11, %v3177_v15, %v4886_v0 }
 0x44f   :  { %v3263_v25 = vsel %vm3259_vm12, %v3251_v35, 0.0 }
 0x450   :  { %v3269_v20 = vsel %vm986_vm5, %v3263_v25, -inf }
 0x451   :  { %v3270_v51 = vmax.f32 %v3268_v26, %v3269_v20 }
 0x453   :  { %3271 = vmax.xlane.f32.xlu0 %v3270_v51 }
 0x4d5   :  { %v3267_v53 = vpop.xlane.xlu1 %3266 }
 0x4dc   :  { %v3272_v52 = vpop.xlane.xlu0 %3271 }
 0x4dd   :  { %v3273_v56 = vsel %vm1124_vm10, %v3272_v52, -inf }
 0x4de   :  { %v3274_v2 = vmax.f32 %v3267_v53, %v3273_v56 }
 0x4e0   :  { %v3275_v57 = vrot.slane %v3274_v2, 4 }
 0x4e2   :  { %v3276_v27 = vmax.f32 %v3274_v2, %v3275_v57 }
 0x4e4   :  { %v3277_v46 = vrot.slane %v3276_v27, 2 }
 0x4e6   :  { %v3278_v1 = vmax.f32 %v3276_v27, %v3277_v46 }
 0x4e8   :  { %v3279_v58 = vrot.slane %v3278_v1, 1 }
 0x4ea   :  { %v3280_v59 = vmax.f32 %v3278_v1, %v3279_v58 }
 0x4ec   :  { %v3281_v60 = vmul.f32 8.0, %v3280_v59 }
 0x4ee   :  { %v3284_v63 = vadd.f32 %v3281_v60, %v3262_v32  ;;  %v3285_v0 = vadd.f32 %v3281_v60, %v3263_v25  ;;  %v3283_v3 = vadd.f32 %v3281_v60, %v3261_v28  ;;  %v3282_v4 = vadd.f32 %v3281_v60, %v3260_v31 }
 0x4f0   :  { %v3288_v6 = vmul.f32 %v3284_v63, %v3254_v30  ;;  %v3289_v7 = vmul.f32 %v3285_v0, %v3255_v22  ;;  %v3287_v33 = vmul.f32 %v3283_v3, %v3253_v14  ;;  %v3286_v8 = vmul.f32 %v3282_v4, %v4893_v10  ;;  %v982_v14 = vld [vmem:[#allocation11 + $0x18] sm:$0xf]  ;;  %v979_v10 = vld [vmem:[#allocation11] sm:$0xff] }
 0x4f2   :  { %v3294_v37 = vsel %vm1124_vm10, %v3288_v6, -inf  ;;  %v3295_v55 = vsel %vm986_vm5, %v3289_v7, -inf  ;;  %v3290_v54 = vsel %vm1225_vm7, %v3287_v33, -inf }
 0x4f3   :  { %v3296_v5 = vmax.f32 %v3294_v37, %v3295_v55  ;;  %v3291_v9 = vmax.f32 %v3286_v8, %v3290_v54 }
 0x4f5   :  { %3297 = vmax.xlane.f32.xlu0 %v3296_v5 }
 0x4f9   :  { %3292 = vmax.xlane.f32.xlu0 %v3291_v9 }
 0x57e   :  { %v3298_v61 = vpop.xlane.xlu0 %3297 }
 0x57f   :  { %v3299_v11 = vsel %vm1124_vm10, %v3298_v61, -inf }
 0x582   :  { %v3293_v62 = vpop.xlane.xlu0 %3292 }
 0x583   :  { %v3300_v42 = vmax.f32 %v3293_v62, %v3299_v11 }
 0x585   :  { %v3301_v44 = vrot.slane %v3300_v42, 4 }
 0x587   :  { %v3302_v12 = vmax.f32 %v3300_v42, %v3301_v44 }
 0x589   :  { %v3303_v15 = vrot.slane %v3302_v12, 2 }
 0x58b   :  { %v3304_v16 = vmax.f32 %v3302_v12, %v3303_v15 }
 0x58d   :  { %v3305_v17 = vrot.slane %v3304_v16, 1 }
 0x58f   :  { %v4934_v13 = vmax.f32 %v3304_v16, %v3305_v17 }
 0x591   :  { %vm3309_vm3 = vcmp.eq.f32.partialorder %v3288_v6, %v4934_v13  ;;  %vm3310_vm2 = vcmp.eq.f32.partialorder %v3289_v7, %v4934_v13  ;;  %vm3307_vm4 = vcmp.eq.f32.partialorder %v3286_v8, %v4934_v13  ;;  %vm3308_vm8 = vcmp.eq.f32.partialorder %v3287_v33, %v4934_v13 }
 0x592   :  { %v3313_v24 = vsel %vm3309_vm3, %v981_v21, 1073741824  ;;  %v3314_v47 = vsel %vm3310_vm2, %v982_v14, 1073741824  ;;  %v3311_v29 = vsel %vm3307_vm4, %v979_v10, 1073741824  ;;  %v3312_v49 = vsel %vm3308_vm8, %v980_v23, 1073741824 }
 0x593   :  { %v3332_v19 = vsel %vm1124_vm10, %v3313_v24, 2147483647  ;;  %v3333_v28 = vsel %vm986_vm5, %v3314_v47, 2147483647  ;;  %v3315_v18 = vsel %vm1225_vm7, %v3312_v49, 2147483647 }
 0x594   :  { %vm3334_vm9 = vcmp.lt.s32.totalorder %v3332_v19, %v3333_v28  ;;  %vm3316_vm13 = vcmp.lt.s32.totalorder %v3311_v29, %v3315_v18 }
 0x595   :  { %v3335_v30 = vsel %vm3334_vm9, %v3332_v19, %v3333_v28  ;;  %v3317_v31 = vsel %vm3316_vm13, %v3311_v29, %v3315_v18 }
 0x596   :  { %v3337_v50 = vshra.s32 %v3335_v30, 16  ;;  %v3319_v38 = vshra.s32 %v3317_v31, 16  ;;  %v3336_v39 = vand.u32 65535, %v3335_v30  ;;  %v3318_v40 = vand.u32 65535, %v3317_v31 }
 0x598   :  { %v3339_v34 = vcvt.s32.f32 %v3337_v50  ;;  %v3321_v36 = vcvt.s32.f32 %v3319_v38  ;;  %v3338_v45 = vcvt.s32.f32 %v3336_v39  ;;  %v3320_v48 = vcvt.s32.f32 %v3318_v40 }
 0x59a   :  { %3340 = vmin.xlane.f32.xlu1 %v3339_v34  ;;  %3322 = vmin.xlane.f32.xlu0 %v3321_v36 }
 0x623   :  { %v3341_v41 = vpop.xlane.xlu1 %3340  ;;  %v3323_v43 = vpop.xlane.xlu0 %3322 }
 0x624   :  { %vm3342_vm14 = vcmp.eq.f32.partialorder %v3339_v34, %v3341_v41  ;;  %vm3324_vm5 = vcmp.eq.f32.partialorder %v3321_v36, %v3323_v43 }
 0x625   :  { %v3343_v22 = vsel %vm3342_vm14, %v3338_v45, inf  ;;  %v3325_v32 = vsel %vm3324_vm5, %v3320_v48, inf }
 0x626   :  { %3344 = vmin.xlane.f32.xlu1 %v3343_v22  ;;  %3326 = vmin.xlane.f32.xlu0 %v3325_v32 }
 0x627   :  { %3604 = shalt.err (!%p3601_p5)
}
 0x628   :  { %3404 = dma.vmem_to_hbm [thread:$0]  %s3399_s18, 3072, %s4973_s5, [#allocation14], %s3665_s7, %s3665_s7, %s3666_s8  }
 0x629   :  { %s3613_s24 = scalar_lea.vmem %s3387_s20, 3072  ;;  %p3618_p7 = scmp.lt.s32.totalorder %s3387_s20, %s3387_s20 }
 0x62a   :  { %p3614_p6 = scmp.ne.s32.totalorder %s3387_s20, %s3613_s24  ;;  %p3619_p8 = scmp.lt.s32.totalorder %s3613_s24, %s3613_s24 }
 0x62c   :  { %p3620_p9 = por %p3619_p8, %p3618_p7 }
 0x62e   :  { %p3621_p10 = pnand %p3620_p9, %p3614_p6 }
 0x630   :  { %3624 = shalt.err (!%p3621_p10)
}
 0x631   :  { %3392 = dma.vmem_to_hbm [thread:$0]  %s3387_s20, 3072, %s4972_s4, [#allocation8], %s3665_s7, %s3665_s7, %s3666_s8   ;;  %v3347_v35 = vcvt.f32.s32 %v3341_v41  ;;  %v3329_v25 = vcvt.f32.s32 %v3323_v43  ;;  %vm3370_vm0 = vcmask 0   ;;  %vm3362_vm11 = vcmp.ne.f32.partialorder %v4934_v13, 0.0 }
 0x632   :  { %vm3373_vm12 = vcmask 8200   ;;  %s3700_s4 = smov [#allocation15]   ;;  %vm3379_vm3 = vcmask 24600  }
 0x633   :  { %v3348_v51 = vshll.u32 %v3347_v35, 16  ;;  %v3330_v52 = vshll.u32 %v3329_v25, 16  ;;  %s3411_s5 = sshll.u32 %s3700_s4, 4  ;;  %s3412_s5 = int_to_ptr.vmem [resolvable:$true] %s3411_s5 }
 0x634   :  { %s3633_s7 = scalar_lea.vmem %s3412_s5, 16  ;;  %s3637_s8 = scalar_lea.vmem %s3412_s5, 32 }
 0x635   :  { %p3634_p11 = scmp.ne.s32.totalorder %s3412_s5, %s3633_s7  ;;  %p3638_p12 = scmp.lt.s32.totalorder %s3412_s5, %s3412_s5 }
 0x636   :  { %p3639_p13 = scmp.lt.s32.totalorder %s3637_s8, %s3633_s7 }
 0x638   :  { %p3640_p0 = por %p3639_p13, %p3638_p12 }
 0x63a   :  { %p3641_p1 = pnand %p3640_p0, %p3634_p11 }
 0x6af   :  { %v3345_v20 = vpop.xlane.xlu1 %3344  ;;  %v3327_v26 = vpop.xlane.xlu0 %3326 }
 0x6b0   :  { %v3346_v53 = vcvt.f32.s32 %v3345_v20  ;;  %v3328_v56 = vcvt.f32.s32 %v3327_v26 }
 0x6b2   :  { %v3349_v2 = vadd.s32 %v3348_v51, %v3346_v53  ;;  %v3331_v57 = vadd.s32 %v3330_v52, %v3328_v56 }
 0x6b4   :  { %v3350_v27 = vsel %vm1124_vm10, %v3349_v2, 2147483647  ;;  %vm3376_vm10 = vcmask 16400  }
 0x6b5   :  { %vm3351_vm7 = vcmp.lt.s32.totalorder %v3331_v57, %v3350_v27 }
 0x6b6   :  { %v3352_v46 = vsel %vm3351_vm7, %v3331_v57, %v3350_v27 }
 0x6b7   :  { %v3353_v1 = vrot.slane %v3352_v46, 4 }
 0x6b9   :  { %vm3354_vm15 = vcmp.lt.s32.totalorder %v3352_v46, %v3353_v1 }
 0x6ba   :  { %v3355_v58 = vsel %vm3354_vm15, %v3352_v46, %v3353_v1 }
 0x6bb   :  { %v3356_v59 = vrot.slane %v3355_v58, 2 }
 0x6bd   :  { %vm3357_vm6 = vcmp.lt.s32.totalorder %v3355_v58, %v3356_v59 }
 0x6be   :  { %v3358_v60 = vsel %vm3357_vm6, %v3355_v58, %v3356_v59 }
 0x6bf   :  { %v3359_v63 = vrot.slane %v3358_v60, 1 }
 0x6c1   :  { %vm3360_vm1 = vcmp.lt.s32.totalorder %v3358_v60, %v3359_v63 }
 0x6c2   :  { %v3361_v0 = vsel %vm3360_vm1, %v3358_v60, %v3359_v63 }
 0x6c3   :  { %v3363_v3 = vshra.s32 %v3361_v0, 24  ;;  %v3364_v4 = vshra.s32 %v3361_v0, 16  ;;  %v3366_v6 = vshra.s32 %v3361_v0, 8  ;;  %v3368_v37 = vand.u32 255, %v3361_v0 }
 0x6c5   :  { %v3365_v7 = vand.u32 255, %v3364_v4  ;;  %v3367_v33 = vand.u32 255, %v3366_v6  ;;  %v3369_v55 = vsel %vm3362_vm11, %v3363_v3, 4294967295  ;;  %v3378_v54 = vsel %vm3362_vm11, %v3368_v37, 4294967295 }
 0x6c6   :  { %3371 = vst.msk [vmem:[#allocation15] sm:$0x1] %vm3370_vm0, %v3369_v55 }
 0x6c7   :  { %v3372_v5 = vsel %vm3362_vm11, %v3365_v7, 4294967295  ;;  %v3375_v8 = vsel %vm3362_vm11, %v3367_v33, 4294967295 }
 0x6c8   :  { %3374 = vst.msk [vmem:[#allocation15] sm:$0x1] %vm3373_vm12, %v3372_v5 }
 0x6c9   :  { %3377 = vst.msk [vmem:[#allocation15] sm:$0x1] %vm3376_vm10, %v3375_v8 }
 0x6ca   :  { %3380 = vst.msk [vmem:[#allocation15] sm:$0x1] %vm3379_vm3, %v3378_v54 }
 0x6cb   :  { %3644 = shalt.err (!%p3641_p1)
}
 0x6cc   :  { %3414 = dma.vmem_to_hbm [thread:$0]  %s3412_s5, 16, %s4974_s6, [#allocation14]  }
 0x6cd   :  { %3657 = dma.done.wait [#allocation8], 3072  }
 0x6ce   :  { %3658 = vsyncadd [#allocation8], 4294964224 }
 0x6cf   :  { %3659 = dma.done.wait [#allocation14], 3088  }
 0x6d0   :  { %3660 = vsyncadd [#allocation14], 4294964208 }
 0x6d1   :  { %3424 = vsyncpa [#allocation7], 1 }
 0x6d2   :  { %3425 = vsyncpa [#allocation10], 1 }
 0x6d3   :  { %3426 = vsyncpa [#allocation8], 1 }
 0x6d4   :  { %3427 = vsyncpa [#allocation14], 1 }

</bundles_post_ra>
